<compile_context>
chip_gen: v7x
topology: tpu7x:2x2x1
jax: 0.10.0
libtpu: 0.0.40
codegen_flags: <defaults>
</compile_context>

<pallas_src>
import functools

import jax
import jax.numpy as jnp
from jax.experimental import pallas as pl
from jax.experimental.pallas import tpu as pltpu


# ---------------------------------------------------------------------------
# Kernel body: fused  relu(relu(relu(x@W1+b1)@W2+b2)@W3+b3)@W4+b4
# bf16 operands into the MXU, f32 accumulation, f32 bias add, ReLU'd
# activations cast back to bf16 before the next matmul, final cast at store.
# ---------------------------------------------------------------------------
def _fcn_kernel(x_ref,
                w1_ref, b1_ref,
                w2_ref, b2_ref,
                w3_ref, b3_ref,
                w4_ref, b4_ref,
                o_ref):
    h = jnp.dot(x_ref[...], w1_ref[...], preferred_element_type=jnp.float32)
    h = jnp.maximum(h + b1_ref[...], 0.0).astype(w2_ref.dtype)

    h = jnp.dot(h, w2_ref[...], preferred_element_type=jnp.float32)
    h = jnp.maximum(h + b2_ref[...], 0.0).astype(w3_ref.dtype)

    h = jnp.dot(h, w3_ref[...], preferred_element_type=jnp.float32)
    h = jnp.maximum(h + b3_ref[...], 0.0).astype(w4_ref.dtype)

    h = jnp.dot(h, w4_ref[...], preferred_element_type=jnp.float32) + b4_ref[...]
    o_ref[...] = h.astype(o_ref.dtype)


# ---------------------------------------------------------------------------
# Hardware / feature queries (pure info queries: guarded, never touch the
# real kernel's error path).
# ---------------------------------------------------------------------------
def _tpu_vmem_cap_and_cores():
    """Returns (usable VMEM cap in bytes, TensorCores per chip)."""
    vmem_phys = 128 << 20                       # v5e / v6e default
    try:
        vmem_phys = int(pltpu.get_tpu_info().vmem_capacity_bytes)
    except Exception:
        pass
    num_cores = 1
    try:
        if "v7" in jax.devices()[0].device_kind.lower():
            num_cores = 2
    except Exception:
        pass
    if vmem_phys <= (64 << 20):                 # v7x: 64 MiB/TC, 2 TCs per chip
        num_cores = max(num_cores, 2)
    # 16 MiB headroom for compiler-internal scratch; cap at 100 MiB (v5e/v6e),
    # which naturally yields ~48 MiB on v7x's 64 MiB VMEM.
    cap = max(min(vmem_phys - (16 << 20), 100 << 20), 32 << 20)
    return int(cap), int(num_cores)


@functools.lru_cache(maxsize=1)
def _single_buffer_supported():
    """Feature probe: can this jax/Mosaic lower+compile pipeline_mode=Buffered(1)?"""
    if not hasattr(pl, "Buffered"):
        return False

    def k(x_ref, o_ref):
        o_ref[...] = x_ref[...] + 1.0

    try:
        fn = pl.pallas_call(
            k,
            out_shape=jax.ShapeDtypeStruct((16, 128), jnp.float32),
            grid_spec=pl.GridSpec(
                grid=(2,),
                in_specs=[pl.BlockSpec((8, 128), lambda i: (0, 0),
                                       pipeline_mode=pl.Buffered(1))],
                out_specs=pl.BlockSpec((8, 128), lambda i: (i, 0))),
        )
        jax.jit(fn).lower(jax.ShapeDtypeStruct((8, 128), jnp.float32)).compile()
        return True
    except Exception:
        return False


# ---------------------------------------------------------------------------
# Batch-tile selection.
# ---------------------------------------------------------------------------
def _pick_batch_tile(B, max_tile_rows, num_cores):
    """Pick the batch tile size.

    - >= 256 rows whenever possible (fills the 256-wide MXU M dim on v6e/v7x).
    - Single-TC chips: tb=B (grid=1) when the batch fits the VMEM row budget.
    - Multi-TC chips: prefer grid % num_cores == 0 with >= 2 steps per core,
      then the largest tile that fits the budget.
    """
    max_tile_rows = max(int(max_tile_rows), 256)
    if B <= 256:
        return B
    if num_cores <= 1 and B <= max_tile_rows:
        return B

    cands = [d for d in range(256, min(B, max_tile_rows) + 1, 256) if B % d == 0]
    if not cands:
        # B not a multiple of 256 -- fall back to plain divisors of B.
        cands = [d for d in range(1, min(B, max_tile_rows) + 1) if B % d == 0]

    def score(tb):
        grid = B // tb
        return (grid % num_cores == 0, grid >= 2 * num_cores, tb)

    return max(cands, key=score)


# ---------------------------------------------------------------------------
# Wrapper.
# ---------------------------------------------------------------------------
def fcn_forward(x, params, *, batch_tile=None, out_dtype=jnp.bfloat16):
    """Fused 4-layer MLP forward (matches PyTorch FCN.forward).

    x:      (B, in_features), any float dtype; cast to bf16 before the MXU.
    params: w1..w4 stored (fan_in, fan_out) bf16, b1..b4 stored (1, fan_out) f32.
    """
    x = x.astype(jnp.bfloat16)          # guarantee single-pass bf16 MXU issue
    B, F_in = x.shape
    H = params["w1"].shape[1]
    F_out = params["w4"].shape[1]

    cap, num_cores = _tpu_vmem_cap_and_cores()
    single_buffer = _single_buffer_supported()

    param_bytes = sum(int(v.size) * v.dtype.itemsize for v in params.values())
    resident_bytes = param_bytes if single_buffer else 2 * param_bytes
    if resident_bytes + (8 << 20) > cap:
        # TODO(synk): stream W2/W3 via pltpu.emit_pipeline / hidden-dim tiling with
        # an f32 accumulator instead of keeping all weights resident (needed for
        # H >~ 4096 on v7x's 64 MiB VMEM).
        raise NotImplementedError(
            "FCN weights do not fit resident in VMEM on this chip generation; "
            "hidden-dim streaming is not implemented.")

    # Per-batch-row VMEM bytes: double-buffered x/out tiles + in-body activation
    # temporaries (f32 accumulators + bf16 casts).
    out_itemsize = jnp.dtype(out_dtype).itemsize
    per_row = (2 * F_in * x.dtype.itemsize          # x tile, double-buffered
               + 2 * F_out * out_itemsize           # out tile, double-buffered
               + 4 * F_in + 6 * H + 4 * F_out)      # activation temporaries
    max_tile_rows = max((cap - resident_bytes - (4 << 20)) // per_row, 256)

    tb = batch_tile if batch_tile is not None else _pick_batch_tile(
        B, max_tile_rows, num_cores)
    assert B % tb == 0, "batch must be divisible by the batch tile"
    grid = (B // tb,)

    cost = pl.CostEstimate(
        flops=2 * B * (F_in * H + H * H + H * H + H * F_out),
        transcendentals=0,
        bytes_accessed=(param_bytes + B * F_in * x.dtype.itemsize
                        + B * F_out * out_itemsize))

    def const_spec(shape):
        # Block index never changes across the grid -> single-buffer if supported.
        if single_buffer:
            return pl.BlockSpec(shape, lambda i: (0, 0),
                                pipeline_mode=pl.Buffered(1))
        return pl.BlockSpec(shape, lambda i: (0, 0))

    in_specs = [
        pl.BlockSpec((tb, F_in), lambda i: (i, 0)),     # x: tiled over batch
        const_spec(params["w1"].shape), const_spec(params["b1"].shape),
        const_spec(params["w2"].shape), const_spec(params["b2"].shape),
        const_spec(params["w3"].shape), const_spec(params["b3"].shape),
        const_spec(params["w4"].shape), const_spec(params["b4"].shape),
    ]
    out_spec = pl.BlockSpec((tb, F_out), lambda i: (i, 0))

    return pl.pallas_call(
        _fcn_kernel,
        out_shape=jax.ShapeDtypeStruct((B, F_out), out_dtype),
        grid_spec=pl.GridSpec(grid=grid, in_specs=in_specs, out_specs=out_spec),
        compiler_params=pltpu.CompilerParams(
            dimension_semantics=("parallel",),
            vmem_limit_bytes=int(cap)),
        cost_estimate=cost,
    )(x,
      params["w1"], params["b1"],
      params["w2"], params["b2"],
      params["w3"], params["b3"],
      params["w4"], params["b4"])


# ---------------------------------------------------------------------------
# Params / reference.
# ---------------------------------------------------------------------------
def init_fcn_params(key, in_features, out_features, num_hidden_units):
    """Deterministic init mimicking nn.Linear (uniform +-1/sqrt(fan_in)).

    Weights stored transposed relative to PyTorch, (fan_in, fan_out), in bf16;
    biases (1, fan_out) in f32 (added to the f32 accumulator in-kernel).
    """
    dims = [(in_features, num_hidden_units),
            (num_hidden_units, num_hidden_units),
            (num_hidden_units, num_hidden_units),
            (num_hidden_units, out_features)]
    params = {}
    for idx, (fan_in, fan_out) in enumerate(dims, start=1):
        key, kw, kb = jax.random.split(key, 3)
        bound = 1.0 / jnp.sqrt(jnp.float32(fan_in))
        params[f"w{idx}"] = jax.random.uniform(
            kw, (fan_in, fan_out), jnp.float32,
            minval=-bound, maxval=bound).astype(jnp.bfloat16)
        params[f"b{idx}"] = jax.random.uniform(
            kb, (1, fan_out), jnp.float32, minval=-bound, maxval=bound)
    return params


def fcn_reference(x, params):
    """Pure-JAX reference with the same mixed precision as the kernel."""
    x = x.astype(jnp.bfloat16)

    def layer(h, w, b, relu):
        y = jnp.dot(h, w, preferred_element_type=jnp.float32) + b
        if relu:
            y = jnp.maximum(y, 0.0).astype(w.dtype)
        return y

    h = layer(x, params["w1"], params["b1"], True)
    h = layer(h, params["w2"], params["b2"], True)
    h = layer(h, params["w3"], params["b3"], True)
    return layer(h, params["w4"], params["b4"], False)


if __name__ == "__main__":
    key = jax.random.PRNGKey(0)

    # Small, MXU-aligned shapes (multiples of 128/256): ~164K params total.
    batch = 512
    in_features = 128
    num_hidden_units = 256
    out_features = 128          # lane-dense output -> unmasked stores

    key, kp, kx = jax.random.split(key, 3)
    params = init_fcn_params(kp, in_features, out_features, num_hidden_units)
    x = jax.random.normal(kx, (batch, in_features), jnp.float32)

    out = fcn_forward(x, params)            # bf16 output, f32 accumulation
    out = jax.block_until_ready(out)

    ref = fcn_reference(x, params)
    assert out.shape == (batch, out_features)
    assert jnp.allclose(out.astype(jnp.float32), ref.astype(jnp.float32),
                        atol=1e-2, rtol=1e-2), "mismatch vs reference"

    print("KERNEL_OK")
</pallas_src>

<mosaic_0001>
module attributes {stable_mosaic.version = 11 : i64} {
  func.func @_fcn_kernel(%arg0: i32, %arg1: memref<512x128xbf16, #tpu.memory_space<vmem>>, %arg2: memref<128x256xbf16, #tpu.memory_space<vmem>>, %arg3: memref<1x256xf32, #tpu.memory_space<vmem>>, %arg4: memref<256x256xbf16, #tpu.memory_space<vmem>>, %arg5: memref<1x256xf32, #tpu.memory_space<vmem>>, %arg6: memref<256x256xbf16, #tpu.memory_space<vmem>>, %arg7: memref<1x256xf32, #tpu.memory_space<vmem>>, %arg8: memref<256x128xbf16, #tpu.memory_space<vmem>>, %arg9: memref<1x128xf32, #tpu.memory_space<vmem>>, %arg10: memref<512x128xbf16, #tpu.memory_space<vmem>>) attributes {dimension_semantics = [#tpu.dimension_semantics<parallel>], iteration_bounds = array<i64: 1>, scalar_prefetch = 0 : i64, scratch_operands = 0 : i64, tpu.core_type = #tpu.core_type<tc>, window_params = [{transform_indices = @transform_0, window_bounds = array<i64: 512, 128>}, {pipeline_mode = #tpu.pipeline_mode<synchronous>, transform_indices = @transform_1, window_bounds = array<i64: 128, 256>}, {pipeline_mode = #tpu.pipeline_mode<synchronous>, transform_indices = @transform_2, window_bounds = array<i64: 1, 256>}, {pipeline_mode = #tpu.pipeline_mode<synchronous>, transform_indices = @transform_3, window_bounds = array<i64: 256, 256>}, {pipeline_mode = #tpu.pipeline_mode<synchronous>, transform_indices = @transform_4, window_bounds = array<i64: 1, 256>}, {pipeline_mode = #tpu.pipeline_mode<synchronous>, transform_indices = @transform_5, window_bounds = array<i64: 256, 256>}, {pipeline_mode = #tpu.pipeline_mode<synchronous>, transform_indices = @transform_6, window_bounds = array<i64: 1, 256>}, {pipeline_mode = #tpu.pipeline_mode<synchronous>, transform_indices = @transform_7, window_bounds = array<i64: 256, 128>}, {pipeline_mode = #tpu.pipeline_mode<synchronous>, transform_indices = @transform_8, window_bounds = array<i64: 1, 128>}, {transform_indices = @transform_9, window_bounds = array<i64: 512, 128>}]} {
    %c0 = arith.constant 0 : index
    %c0_0 = arith.constant 0 : index
    %0 = vector.load %arg1[%c0, %c0_0] : memref<512x128xbf16, #tpu.memory_space<vmem>>, vector<512x128xbf16>
    %c0_1 = arith.constant 0 : index
    %c0_2 = arith.constant 0 : index
    %1 = vector.load %arg2[%c0_1, %c0_2] : memref<128x256xbf16, #tpu.memory_space<vmem>>, vector<128x256xbf16>
    %cst = arith.constant dense<0.000000e+00> : vector<512x256xf32>
    %2 = tpu.matmul %0, %1, %cst {dimension_numbers = #tpu.dot_dimension_numbers<[1], [0], [0], [1], [0, 0, 1, 1], [], []>} : vector<512x128xbf16>, vector<128x256xbf16>, vector<512x256xf32> -> vector<512x256xf32>
    %c0_3 = arith.constant 0 : index
    %c0_4 = arith.constant 0 : index
    %3 = vector.load %arg3[%c0_3, %c0_4] : memref<1x256xf32, #tpu.memory_space<vmem>>, vector<1x256xf32>
    %4 = vector.broadcast %3 : vector<1x256xf32> to vector<512x256xf32>
    %5 = arith.addf %2, %4 : vector<512x256xf32>
    %cst_5 = arith.constant 0.000000e+00 : f32
    %6 = vector.broadcast %cst_5 : f32 to vector<512x256xf32>
    %7 = arith.maximumf %5, %6 : vector<512x256xf32>
    %8 = arith.truncf %7 : vector<512x256xf32> to vector<512x256xbf16>
    %c0_6 = arith.constant 0 : index
    %c0_7 = arith.constant 0 : index
    %9 = vector.load %arg4[%c0_6, %c0_7] : memref<256x256xbf16, #tpu.memory_space<vmem>>, vector<256x256xbf16>
    %cst_8 = arith.constant dense<0.000000e+00> : vector<512x256xf32>
    %10 = tpu.matmul %8, %9, %cst_8 {dimension_numbers = #tpu.dot_dimension_numbers<[1], [0], [0], [1], [0, 0, 1, 1], [], []>} : vector<512x256xbf16>, vector<256x256xbf16>, vector<512x256xf32> -> vector<512x256xf32>
    %c0_9 = arith.constant 0 : index
    %c0_10 = arith.constant 0 : index
    %11 = vector.load %arg5[%c0_9, %c0_10] : memref<1x256xf32, #tpu.memory_space<vmem>>, vector<1x256xf32>
    %12 = vector.broadcast %11 : vector<1x256xf32> to vector<512x256xf32>
    %13 = arith.addf %10, %12 : vector<512x256xf32>
    %cst_11 = arith.constant 0.000000e+00 : f32
    %14 = vector.broadcast %cst_11 : f32 to vector<512x256xf32>
    %15 = arith.maximumf %13, %14 : vector<512x256xf32>
    %16 = arith.truncf %15 : vector<512x256xf32> to vector<512x256xbf16>
    %c0_12 = arith.constant 0 : index
    %c0_13 = arith.constant 0 : index
    %17 = vector.load %arg6[%c0_12, %c0_13] : memref<256x256xbf16, #tpu.memory_space<vmem>>, vector<256x256xbf16>
    %cst_14 = arith.constant dense<0.000000e+00> : vector<512x256xf32>
    %18 = tpu.matmul %16, %17, %cst_14 {dimension_numbers = #tpu.dot_dimension_numbers<[1], [0], [0], [1], [0, 0, 1, 1], [], []>} : vector<512x256xbf16>, vector<256x256xbf16>, vector<512x256xf32> -> vector<512x256xf32>
    %c0_15 = arith.constant 0 : index
    %c0_16 = arith.constant 0 : index
    %19 = vector.load %arg7[%c0_15, %c0_16] : memref<1x256xf32, #tpu.memory_space<vmem>>, vector<1x256xf32>
    %20 = vector.broadcast %19 : vector<1x256xf32> to vector<512x256xf32>
    %21 = arith.addf %18, %20 : vector<512x256xf32>
    %cst_17 = arith.constant 0.000000e+00 : f32
    %22 = vector.broadcast %cst_17 : f32 to vector<512x256xf32>
    %23 = arith.maximumf %21, %22 : vector<512x256xf32>
    %24 = arith.truncf %23 : vector<512x256xf32> to vector<512x256xbf16>
    %c0_18 = arith.constant 0 : index
    %c0_19 = arith.constant 0 : index
    %25 = vector.load %arg8[%c0_18, %c0_19] : memref<256x128xbf16, #tpu.memory_space<vmem>>, vector<256x128xbf16>
    %cst_20 = arith.constant dense<0.000000e+00> : vector<512x128xf32>
    %26 = tpu.matmul %24, %25, %cst_20 {dimension_numbers = #tpu.dot_dimension_numbers<[1], [0], [0], [1], [0, 0, 1, 1], [], []>} : vector<512x256xbf16>, vector<256x128xbf16>, vector<512x128xf32> -> vector<512x128xf32>
    %c0_21 = arith.constant 0 : index
    %c0_22 = arith.constant 0 : index
    %27 = vector.load %arg9[%c0_21, %c0_22] : memref<1x128xf32, #tpu.memory_space<vmem>>, vector<1x128xf32>
    %28 = vector.broadcast %27 : vector<1x128xf32> to vector<512x128xf32>
    %29 = arith.addf %26, %28 : vector<512x128xf32>
    %30 = arith.truncf %29 : vector<512x128xf32> to vector<512x128xbf16>
    %c0_23 = arith.constant 0 : index
    %c0_24 = arith.constant 0 : index
    %31 = vector.load %arg10[%c0_23, %c0_24] : memref<512x128xbf16, #tpu.memory_space<vmem>>, vector<512x128xbf16>
    tpu.vector_store %arg10[%c0_23, %c0_24], %30 {strides = array<i32>} : memref<512x128xbf16, #tpu.memory_space<vmem>>, vector<512x128xbf16>,
    return
  }
  func.func @transform_0(%arg0: i32) -> (i32, i32) {
    %c0_i32 = arith.constant 0 : i32
    %c0_i32_0 = arith.constant 0 : i32
    return %arg0, %c0_i32 : i32, i32
  }
  func.func @transform_1(%arg0: i32) -> (i32, i32) {
    %c0_i32 = arith.constant 0 : i32
    %c0_i32_0 = arith.constant 0 : i32
    %c0_i32_1 = arith.constant 0 : i32
    return %c0_i32, %c0_i32_0 : i32, i32
  }
  func.func @transform_2(%arg0: i32) -> (i32, i32) {
    %c0_i32 = arith.constant 0 : i32
    %c0_i32_0 = arith.constant 0 : i32
    %c0_i32_1 = arith.constant 0 : i32
    return %c0_i32, %c0_i32_0 : i32, i32
  }
  func.func @transform_3(%arg0: i32) -> (i32, i32) {
    %c0_i32 = arith.constant 0 : i32
    %c0_i32_0 = arith.constant 0 : i32
    %c0_i32_1 = arith.constant 0 : i32
    return %c0_i32, %c0_i32_0 : i32, i32
  }
  func.func @transform_4(%arg0: i32) -> (i32, i32) {
    %c0_i32 = arith.constant 0 : i32
    %c0_i32_0 = arith.constant 0 : i32
    %c0_i32_1 = arith.constant 0 : i32
    return %c0_i32, %c0_i32_0 : i32, i32
  }
  func.func @transform_5(%arg0: i32) -> (i32, i32) {
    %c0_i32 = arith.constant 0 : i32
    %c0_i32_0 = arith.constant 0 : i32
    %c0_i32_1 = arith.constant 0 : i32
    return %c0_i32, %c0_i32_0 : i32, i32
  }
  func.func @transform_6(%arg0: i32) -> (i32, i32) {
    %c0_i32 = arith.constant 0 : i32
    %c0_i32_0 = arith.constant 0 : i32
    %c0_i32_1 = arith.constant 0 : i32
    return %c0_i32, %c0_i32_0 : i32, i32
  }
  func.func @transform_7(%arg0: i32) -> (i32, i32) {
    %c0_i32 = arith.constant 0 : i32
    %c0_i32_0 = arith.constant 0 : i32
    %c0_i32_1 = arith.constant 0 : i32
    return %c0_i32, %c0_i32_0 : i32, i32
  }
  func.func @transform_8(%arg0: i32) -> (i32, i32) {
    %c0_i32 = arith.constant 0 : i32
    %c0_i32_0 = arith.constant 0 : i32
    %c0_i32_1 = arith.constant 0 : i32
    return %c0_i32, %c0_i32_0 : i32, i32
  }
  func.func @transform_9(%arg0: i32) -> (i32, i32) {
    %c0_i32 = arith.constant 0 : i32
    %c0_i32_0 = arith.constant 0 : i32
    return %arg0, %c0_i32 : i32, i32
  }
}

</mosaic_0001>

<bundles_post_ra>
// kernel: tpu_custom_call.1
= control target key start
LH: loop header
LB: loop body
LE: loop exit
PB: predicated region body
PF: predicated region fallthrough
CT: control target
= control target key end

     0   :  { %14 = vsyncpa [#allocation3], 0  ;;  %s5010_s0 = inlined_call_operand.hbm [shape: bf16[512,128], index: 0, kind: input, shape index: {}]   ;;  %s5011_s1 = inlined_call_operand.hbm [shape: bf16[128,256], index: 1, kind: input, shape index: {}]   ;;  %s5012_s2 = inlined_call_operand.hbm [shape: f32[1,256], index: 2, kind: input, shape index: {}]   ;;  %s5013_s3 = inlined_call_operand.hbm [shape: bf16[256,256], index: 3, kind: input, shape index: {}]   ;;  %s5014_s4 = inlined_call_operand.hbm [shape: f32[1,256], index: 4, kind: input, shape index: {}]   ;;  %s5015_s5 = inlined_call_operand.hbm [shape: bf16[256,256], index: 5, kind: input, shape index: {}]   ;;  %s5016_s6 = inlined_call_operand.hbm [shape: f32[1,256], index: 6, kind: input, shape index: {}]   ;;  %s5017_s7 = inlined_call_operand.hbm [shape: bf16[256,128], index: 7, kind: input, shape index: {}]   ;;  %s5018_s8 = inlined_call_operand.hbm [shape: f32[1,128], index: 8, kind: input, shape index: {}]   ;;  %s5019_s9 = inlined_call_operand.hbm [shape: bf16[512,128], index: 9, kind: output, shape index: {}]  }
   0x1   :  { %15 = vsyncpa [#allocation6], 0 }
   0x2   :  { %16 = vsyncpa [#allocation9], 0 }
   0x3   :  { %17 = vsyncpa [#allocation12], 0 }
   0x4   :  { %18 = vsyncpa [#allocation15], 0 }
   0x5   :  { %19 = vsyncpa [#allocation4], 0  ;;  %s4215_s30 = smov [#allocation5]   ;;  %s3983_s13 = scalar_lea.hbm %s5011_s1, 2048 }
   0x6   :  { %s37_s10 = sshll.u32 %s4215_s30, 4  ;;  %p3984_p0 = scmp.ne.s32.totalorder %s5011_s1, %s3983_s13  ;;  %s38_s10 = int_to_ptr.vmem [resolvable:$true] %s37_s10 }
   0x7   :  { %p3987_p1 = scmp.lt.u32.totalorder %s3983_s13, %s5011_s1 }
   0x9   :  { %p3989_p2 = pnand %p3987_p1, %p3984_p0 }
   0xb   :  { %3992 = shalt.err (!%p3989_p2)
}
   0xc   :  { %s3993_s18 = scalar_lea.vmem %s38_s10, 2048  ;;  %p3998_p4 = scmp.lt.s32.totalorder %s38_s10, %s38_s10 }
   0xd   :  { %p3994_p3 = scmp.ne.s32.totalorder %s38_s10, %s3993_s18  ;;  %p3999_p5 = scmp.lt.s32.totalorder %s3993_s18, %s3993_s18 }
   0xf   :  { %p4000_p6 = por %p3999_p5, %p3998_p4 }
  0x11   :  { %p4001_p7 = pnand %p4000_p6, %p3994_p3 }
  0x13   :  { %4004 = shalt.err (!%p4001_p7)
}
  0x14   :  { %s4216_s19 = smov 128   ;;  %s4217_s20 = smov 8  }
  0x15   :  { %43 = dma.hbm_to_vmem [thread:$0]  %s5011_s1, 2048, %s38_s10, [#allocation6], %s4216_s19, %s4216_s19, %s4217_s20  }
  0x16   :  { %s4218_s23 = smov [#allocation8]   ;;  %s4219_s25 = smov [#allocation11]  }
  0x17   :  { %s59_s24 = sshll.u32 %s4218_s23, 4  ;;  %s81_s26 = sshll.u32 %s4219_s25, 4  ;;  %s60_s24 = int_to_ptr.vmem [resolvable:$true] %s59_s24  ;;  %s82_s26 = int_to_ptr.vmem [resolvable:$true] %s81_s26 }
  0x18   :  { %s4005_s29 = scalar_lea.hbm %s5013_s3, 4096 }
  0x19   :  { %p4006_p8 = scmp.ne.s32.totalorder %s5013_s3, %s4005_s29  ;;  %p4009_p9 = scmp.lt.u32.totalorder %s4005_s29, %s5013_s3 }
  0x1b   :  { %p4011_p10 = pnand %p4009_p9, %p4006_p8 }
  0x1d   :  { %4014 = shalt.err (!%p4011_p10)
}
  0x1e   :  { %s4015_s1 = scalar_lea.vmem %s60_s24, 4096  ;;  %p4020_p12 = scmp.lt.s32.totalorder %s60_s24, %s60_s24 }
  0x1f   :  { %p4016_p11 = scmp.ne.s32.totalorder %s60_s24, %s4015_s1  ;;  %p4021_p13 = scmp.lt.s32.totalorder %s4015_s1, %s4015_s1 }
  0x21   :  { %p4022_p0 = por %p4021_p13, %p4020_p12 }
  0x23   :  { %p4023_p1 = pnand %p4022_p0, %p4016_p11 }
  0x25   :  { %4026 = shalt.err (!%p4023_p1)
}
  0x26   :  { %65 = dma.hbm_to_vmem [thread:$0]  %s5013_s3, 4096, %s60_s24, [#allocation9], %s4216_s19, %s4216_s19, %s4217_s20  }
  0x27   :  { %s4027_s17 = scalar_lea.hbm %s5015_s5, 4096 }
  0x28   :  { %p4028_p2 = scmp.ne.s32.totalorder %s5015_s5, %s4027_s17  ;;  %p4031_p3 = scmp.lt.u32.totalorder %s4027_s17, %s5015_s5 }
  0x2a   :  { %p4033_p4 = pnand %p4031_p3, %p4028_p2 }
  0x2c   :  { %4036 = shalt.err (!%p4033_p4)
}
  0x2d   :  { %s4037_s25 = scalar_lea.vmem %s82_s26, 4096  ;;  %p4042_p6 = scmp.lt.s32.totalorder %s82_s26, %s82_s26 }
  0x2e   :  { %p4038_p5 = scmp.ne.s32.totalorder %s82_s26, %s4037_s25  ;;  %p4043_p7 = scmp.lt.s32.totalorder %s4037_s25, %s4037_s25 }
  0x30   :  { %p4044_p8 = por %p4043_p7, %p4042_p6 }
  0x32   :  { %p4045_p9 = pnand %p4044_p8, %p4038_p5 }
  0x34   :  { %4048 = shalt.err (!%p4045_p9)
}
  0x35   :  { %87 = dma.hbm_to_vmem [thread:$0]  %s5015_s5, 4096, %s82_s26, [#allocation12], %s4216_s19, %s4216_s19, %s4217_s20  }
  0x36   :  { %s4220_s27 = smov [#allocation14]   ;;  %s4221_s29 = smov [#allocation2]  }
  0x37   :  { %s103_s28 = sshll.u32 %s4220_s27, 4  ;;  %s25_s30 = sshll.u32 %s4221_s29, 4  ;;  %s104_s28 = int_to_ptr.vmem [resolvable:$true] %s103_s28  ;;  %s26_s30 = int_to_ptr.vmem [resolvable:$true] %s25_s30 }
  0x38   :  { %s4049_s13 = scalar_lea.hbm %s5017_s7, 2048 }
  0x39   :  { %p4050_p10 = scmp.ne.s32.totalorder %s5017_s7, %s4049_s13  ;;  %p4053_p11 = scmp.lt.u32.totalorder %s4049_s13, %s5017_s7 }
  0x3b   :  { %p4055_p12 = pnand %p4053_p11, %p4050_p10 }
  0x3d   :  { %4058 = shalt.err (!%p4055_p12)
}
  0x3e   :  { %s4059_s5 = scalar_lea.vmem %s104_s28, 2048  ;;  %p4064_p0 = scmp.lt.s32.totalorder %s104_s28, %s104_s28 }
  0x3f   :  { %p4060_p13 = scmp.ne.s32.totalorder %s104_s28, %s4059_s5  ;;  %p4065_p1 = scmp.lt.s32.totalorder %s4059_s5, %s4059_s5 }
  0x41   :  { %p4066_p2 = por %p4065_p1, %p4064_p0 }
  0x43   :  { %p4067_p3 = pnand %p4066_p2, %p4060_p13 }
  0x45   :  { %4070 = shalt.err (!%p4067_p3)
}
  0x46   :  { %s4222_s19 = smov 64   ;;  %s4223_s20 = smov 4  }
  0x47   :  { %109 = dma.hbm_to_vmem [thread:$0]  %s5017_s7, 2048, %s104_s28, [#allocation15], %s4222_s19, %s4222_s19, %s4223_s20  }
  0x48   :  { %s4071_s21 = scalar_lea.hbm %s5010_s0, 4096 }
  0x49   :  { %p4072_p4 = scmp.ne.s32.totalorder %s5010_s0, %s4071_s21  ;;  %p4075_p5 = scmp.lt.u32.totalorder %s4071_s21, %s5010_s0 }
  0x4b   :  { %p4077_p6 = pnand %p4075_p5, %p4072_p4 }
  0x4d   :  { %4080 = shalt.err (!%p4077_p6)
}
  0x4e   :  { %s4081_s24 = scalar_lea.vmem %s26_s30, 4096  ;;  %p4086_p8 = scmp.lt.s32.totalorder %s26_s30, %s26_s30 }
  0x4f   :  { %p4082_p7 = scmp.ne.s32.totalorder %s26_s30, %s4081_s24  ;;  %p4087_p9 = scmp.lt.s32.totalorder %s4081_s24, %s4081_s24 }
  0x51   :  { %p4088_p10 = por %p4087_p9, %p4086_p8 }
  0x53   :  { %p4089_p11 = pnand %p4088_p10, %p4082_p7 }
  0x55   :  { %4092 = shalt.err (!%p4089_p11)
}
  0x56   :  { %31 = dma.hbm_to_vmem [thread:$0]  %s5010_s0, 4096, %s26_s30, [#allocation3], %s4222_s19, %s4222_s19, %s4223_s20  }
  0x57   :  { %s4224_s28 = smov [#allocation7]   ;;  %s4225_s11 = smov [#allocation10]  }
  0x58   :  { %s50_s29 = sshll.u32 %s4224_s28, 4  ;;  %s72_s12 = sshll.u32 %s4225_s11, 4  ;;  %s51_s29 = int_to_ptr.vmem [resolvable:$true] %s50_s29  ;;  %s73_s12 = int_to_ptr.vmem [resolvable:$true] %s72_s12 }
  0x59   :  { %s4093_s10 = scalar_lea.hbm %s5012_s2, 32 }
  0x5a   :  { %p4094_p12 = scmp.ne.s32.totalorder %s5012_s2, %s4093_s10  ;;  %p4097_p13 = scmp.lt.u32.totalorder %s4093_s10, %s5012_s2 }
  0x5c   :  { %p4099_p0 = pnand %p4097_p13, %p4094_p12 }
  0x5e   :  { %4102 = shalt.err (!%p4099_p0)
}
  0x5f   :  { %s4103_s0 = scalar_lea.vmem %s51_s29, 32  ;;  %p4108_p2 = scmp.lt.s32.totalorder %s51_s29, %s51_s29 }
  0x60   :  { %p4104_p1 = scmp.ne.s32.totalorder %s51_s29, %s4103_s0  ;;  %p4109_p3 = scmp.lt.s32.totalorder %s4103_s0, %s4103_s0 }
  0x62   :  { %p4110_p4 = por %p4109_p3, %p4108_p2 }
  0x64   :  { %p4111_p5 = pnand %p4110_p4, %p4104_p1 }
  0x66   :  { %4114 = shalt.err (!%p4111_p5)
}
  0x67   :  { %53 = dma.hbm_to_vmem [thread:$0]  %s5012_s2, 32, %s51_s29, [#allocation6]  }
  0x68   :  { %s4115_s21 = scalar_lea.hbm %s5014_s4, 32 }
  0x69   :  { %p4116_p6 = scmp.ne.s32.totalorder %s5014_s4, %s4115_s21  ;;  %p4119_p7 = scmp.lt.u32.totalorder %s4115_s21, %s5014_s4 }
  0x6b   :  { %p4121_p8 = pnand %p4119_p7, %p4116_p6 }
  0x6d   :  { %4124 = shalt.err (!%p4121_p8)
}
  0x6e   :  { %s4125_s24 = scalar_lea.vmem %s73_s12, 32  ;;  %p4130_p10 = scmp.lt.s32.totalorder %s73_s12, %s73_s12 }
  0x6f   :  { %p4126_p9 = scmp.ne.s32.totalorder %s73_s12, %s4125_s24  ;;  %p4131_p11 = scmp.lt.s32.totalorder %s4125_s24, %s4125_s24 }
  0x71   :  { %p4132_p12 = por %p4131_p11, %p4130_p10 }
  0x73   :  { %p4133_p13 = pnand %p4132_p12, %p4126_p9 }
  0x75   :  { %4136 = shalt.err (!%p4133_p13)
}
  0x76   :  { %75 = dma.hbm_to_vmem [thread:$0]  %s5014_s4, 32, %s73_s12, [#allocation9]  }
  0x77   :  { %s4226_s27 = smov [#allocation13]   ;;  %s4227_s29 = smov [#allocation16]  }
  0x78   :  { %s94_s28 = sshll.u32 %s4226_s27, 4  ;;  %s116_s11 = sshll.u32 %s4227_s29, 4  ;;  %s95_s28 = int_to_ptr.vmem [resolvable:$true] %s94_s28  ;;  %s117_s11 = int_to_ptr.vmem [resolvable:$true] %s116_s11 }
  0x79   :  { %s4137_s10 = scalar_lea.hbm %s5016_s6, 32 }
  0x7a   :  { %p4138_p0 = scmp.ne.s32.totalorder %s5016_s6, %s4137_s10  ;;  %p4141_p1 = scmp.lt.u32.totalorder %s4137_s10, %s5016_s6 }
  0x7c   :  { %p4143_p2 = pnand %p4141_p1, %p4138_p0 }
  0x7e   :  { %4146 = shalt.err (!%p4143_p2)
}
  0x7f   :  { %s4147_s4 = scalar_lea.vmem %s95_s28, 32  ;;  %p4152_p4 = scmp.lt.s32.totalorder %s95_s28, %s95_s28 }
  0x80   :  { %p4148_p3 = scmp.ne.s32.totalorder %s95_s28, %s4147_s4  ;;  %p4153_p5 = scmp.lt.s32.totalorder %s4147_s4, %s4147_s4 }
  0x82   :  { %p4154_p6 = por %p4153_p5, %p4152_p4 }
  0x84   :  { %p4155_p7 = pnand %p4154_p6, %p4148_p3 }
  0x86   :  { %4158 = shalt.err (!%p4155_p7)
}
  0x87   :  { %97 = dma.hbm_to_vmem [thread:$0]  %s5016_s6, 32, %s95_s28, [#allocation12]  }
  0x88   :  { %s4159_s17 = scalar_lea.hbm %s5018_s8, 16 }
  0x89   :  { %p4160_p8 = scmp.ne.s32.totalorder %s5018_s8, %s4159_s17  ;;  %p4163_p9 = scmp.lt.u32.totalorder %s4159_s17, %s5018_s8 }
  0x8b   :  { %p4165_p10 = pnand %p4163_p9, %p4160_p8 }
  0x8d   :  { %4168 = shalt.err (!%p4165_p10)
}
  0x8e   :  { %s4169_s25 = scalar_lea.vmem %s117_s11, 16  ;;  %s4173_s3 = scalar_lea.vmem %s117_s11, 32 }
  0x8f   :  { %p4170_p11 = scmp.ne.s32.totalorder %s117_s11, %s4169_s25  ;;  %p4174_p12 = scmp.lt.s32.totalorder %s117_s11, %s117_s11 }
  0x90   :  { %p4175_p13 = scmp.lt.s32.totalorder %s4173_s3, %s4169_s25 }
  0x92   :  { %p4176_p0 = por %p4175_p13, %p4174_p12 }
  0x94   :  { %p4177_p1 = pnand %p4176_p0, %p4170_p11 }
  0x96   :  { %4180 = shalt.err (!%p4177_p1)
}
  0x97   :  { %119 = dma.hbm_to_vmem [thread:$0]  %s5018_s8, 16, %s117_s11, [#allocation15]  }
  0x98   :  { %4203 = dma.done.wait [#allocation3], 4096  }
  0x99   :  { %4204 = vsyncadd [#allocation3], 4294963200 }
  0x9a   :  { %4205 = dma.done.wait [#allocation6], 2080  }
  0x9b   :  { %4206 = vsyncadd [#allocation6], 4294965216 }
  0x9c   :  { %4207 = dma.done.wait [#allocation9], 4128  }
  0x9d   :  { %4208 = vsyncadd [#allocation9], 4294963168 }
  0x9e   :  { %4209 = dma.done.wait [#allocation12], 4128  }
  0x9f   :  { %4210 = vsyncadd [#allocation12], 4294963168 }
  0xa0   :  { %4211 = dma.done.wait [#allocation15], 2064  }
  0xa1   :  { %4212 = vsyncadd [#allocation15], 4294965232  ;;  %v4228_v0 = vmov 0   ;;  %v3815_v1 = vld [vmem:[#allocation5 + $0x4] ss:$8 sps:$4 sm:$0xff]   ;;  %v3841_v19 = vld [vmem:[#allocation2 + $0x10] sm:$0xff]  }
  0xa2   :  { %544 = vmatprep.mubr.bf16.mxu0 %v4228_v0  ;;  %v3817_v2 = vld [vmem:[#allocation5] ss:$8 sps:$4 sm:$0xff]   ;;  %512 = vmatprep.subr.bf16.mxu0 %v3815_v1  ;;  %v3818_v3 = vld [vmem:[#allocation5 + $0x14] ss:$8 sps:$4 sm:$0xff]   ;;  %v3820_v4 = vld [vmem:[#allocation5 + $0x10] ss:$8 sps:$4 sm:$0xff]  }
  0xa3   :  { %513 = vmatpush1.bf16.msra.mxu0 %v3817_v2  ;;  %v3821_v5 = vld [vmem:[#allocation5 + $0x24] ss:$8 sps:$4 sm:$0xff]   ;;  %v3823_v6 = vld [vmem:[#allocation5 + $0x20] ss:$8 sps:$4 sm:$0xff]   ;;  %v3824_v7 = vld [vmem:[#allocation5 + $0x34] ss:$8 sps:$4 sm:$0xff]  }
  0xa4   :  { %514 = vmatprep.subr.bf16.mxu0 %v3818_v3  ;;  %v3826_v8 = vld [vmem:[#allocation5 + $0x30] ss:$8 sps:$4 sm:$0xff]   ;;  %v3827_v9 = vld [vmem:[#allocation5 + $0x44] ss:$8 sps:$4 sm:$0xff]   ;;  %v3829_v10 = vld [vmem:[#allocation5 + $0x40] ss:$8 sps:$4 sm:$0xff]  }
  0xa5   :  { %v3830_v11 = vld [vmem:[#allocation5 + $0x54] ss:$8 sps:$4 sm:$0xff]   ;;  %v3832_v12 = vld [vmem:[#allocation5 + $0x50] ss:$8 sps:$4 sm:$0xff]   ;;  %v3833_v13 = vld [vmem:[#allocation5 + $0x64] ss:$8 sps:$4 sm:$0xff]  }
  0xa6   :  { %v3835_v14 = vld [vmem:[#allocation5 + $0x60] ss:$8 sps:$4 sm:$0xff]   ;;  %v3836_v15 = vld [vmem:[#allocation5 + $0x74] ss:$8 sps:$4 sm:$0xff]   ;;  %v3838_v16 = vld [vmem:[#allocation5 + $0x70] ss:$8 sps:$4 sm:$0xff]  }
  0xa7   :  { %515 = vmatpush1.bf16.msra.mxu0 %v3820_v4  ;;  %v3839_v17 = vld [vmem:[#allocation2] sm:$0xff]   ;;  %v3840_v18 = vld [vmem:[#allocation2 + $0x8] sm:$0xff]   ;;  %v3842_v20 = vld [vmem:[#allocation2 + $0x18] sm:$0xff]   ;;  %s4229_s8 = smov [#allocation17]  }
  0xa8   :  { %516 = vmatprep.subr.bf16.mxu0 %v3821_v5  ;;  %v3859_v21 = vld [vmem:[#allocation8 + $0x4] ss:$8 sps:$4 sm:$0xff]   ;;  %v3861_v22 = vld [vmem:[#allocation8] ss:$8 sps:$4 sm:$0xff]   ;;  %v3863_v24 = vld [vmem:[#allocation8 + $0x14] ss:$8 sps:$4 sm:$0xff]  }
  0xa9   :  { %v3843_v23 = vld [vmem:[#allocation2 + $0x20] sm:$0xff]   ;;  %1261 = vmatprep.subr.bf16.mxu1 %v3859_v21  ;;  %v3865_v25 = vld [vmem:[#allocation8 + $0x10] ss:$8 sps:$4 sm:$0xff]   ;;  %v3844_v28 = vld [vmem:[#allocation2 + $0x28] sm:$0xff]   ;;  %s3304_s2 = sshll.u32 %s4229_s8, 4  ;;  %s3305_s2 = int_to_ptr.vmem [resolvable:$true] %s3304_s2 }
  0xaa   :  { %1262 = vmatpush1.bf16.msra.mxu1 %v3861_v22  ;;  %v3866_v26 = vld [vmem:[#allocation8 + $0x24] ss:$8 sps:$4 sm:$0xff]   ;;  %v3868_v27 = vld [vmem:[#allocation8 + $0x20] ss:$8 sps:$4 sm:$0xff]   ;;  %v3870_v29 = vld [vmem:[#allocation8 + $0x34] ss:$8 sps:$4 sm:$0xff]   ;;  %p4186_p3 = scmp.lt.s32.totalorder %s3305_s2, %s3305_s2 }
  0xab   :  { %517 = vmatpush1.bf16.msra.mxu0 %v3823_v6  ;;  %1263 = vmatprep.subr.bf16.mxu1 %v3863_v24  ;;  %v3872_v30 = vld [vmem:[#allocation8 + $0x30] ss:$8 sps:$4 sm:$0xff]   ;;  %v3873_v31 = vld [vmem:[#allocation8 + $0x44] ss:$8 sps:$4 sm:$0xff]   ;;  %v3875_v32 = vld [vmem:[#allocation8 + $0x40] ss:$8 sps:$4 sm:$0xff]  }
  0xac   :  { %518 = vmatprep.subr.bf16.mxu0 %v3824_v7  ;;  %v3845_v33 = vld [vmem:[#allocation2 + $0x30] sm:$0xff]   ;;  %v3882_v37 = vld [vmem:[#allocation8 + $0x60] ss:$8 sps:$4 sm:$0xff]   ;;  %v3846_v38 = vld [vmem:[#allocation2 + $0x38] sm:$0xff]   ;;  %s4181_s7 = scalar_lea.vmem %s3305_s2, 4096 }
  0xad   :  { %v3877_v34 = vld [vmem:[#allocation8 + $0x54] ss:$8 sps:$4 sm:$0xff]   ;;  %v3879_v35 = vld [vmem:[#allocation8 + $0x50] ss:$8 sps:$4 sm:$0xff]   ;;  %v3880_v36 = vld [vmem:[#allocation8 + $0x64] ss:$8 sps:$4 sm:$0xff]   ;;  %p4182_p2 = scmp.ne.s32.totalorder %s3305_s2, %s4181_s7  ;;  %p4187_p4 = scmp.lt.s32.totalorder %s4181_s7, %s4181_s7 }
  0xae   :  { %1264 = vmatpush1.bf16.msra.mxu1 %v3865_v25  ;;  %v3884_v39 = vld [vmem:[#allocation8 + $0x74] ss:$8 sps:$4 sm:$0xff]   ;;  %v3886_v40 = vld [vmem:[#allocation8 + $0x70] ss:$8 sps:$4 sm:$0xff]   ;;  %v3887_v41 = vld [vmem:[#allocation11] ss:$8 sps:$4 sm:$0xff]  }
  0xaf   :  { %519 = vmatpush1.bf16.msra.mxu0 %v3826_v8  ;;  %1265 = vmatprep.subr.bf16.mxu1 %v3866_v26  ;;  %v3889_v42 = vld [vmem:[#allocation11 + $0x4] ss:$8 sps:$4 sm:$0xff]   ;;  %v3847_v45 = vld [vmem:[#allocation2 + $0x40] sm:$0xff]   ;;  %v3904_v53 = vld [vmem:[#allocation11 + $0x10] ss:$8 sps:$4 sm:$0xff]   ;;  %p4188_p5 = por %p4187_p4, %p4186_p3 }
  0xb0   :  { %520 = vmatprep.subr.bf16.mxu0 %v3827_v9  ;;  %v3890_v43 = vld [vmem:[#allocation8 + $0x84] ss:$8 sps:$4 sm:$0xff]   ;;  %v3892_v44 = vld [vmem:[#allocation8 + $0x80] ss:$8 sps:$4 sm:$0xff]   ;;  %v3894_v46 = vld [vmem:[#allocation8 + $0x94] ss:$8 sps:$4 sm:$0xff]  }
  0xb1   :  { %v3896_v47 = vld [vmem:[#allocation8 + $0x90] ss:$8 sps:$4 sm:$0xff]   ;;  %v3897_v48 = vld [vmem:[#allocation8 + $0xa4] ss:$8 sps:$4 sm:$0xff]   ;;  %v3899_v49 = vld [vmem:[#allocation8 + $0xa0] ss:$8 sps:$4 sm:$0xff]   ;;  %p4189_p6 = pnand %p4188_p5, %p4182_p2 }
  0xb2   :  { %1266 = vmatpush1.bf16.msra.mxu1 %v3868_v27  ;;  %v3848_v50 = vld [vmem:[#allocation2 + $0x48] sm:$0xff]   ;;  %v3901_v51 = vld [vmem:[#allocation8 + $0xb4] ss:$8 sps:$4 sm:$0xff]   ;;  %v3903_v52 = vld [vmem:[#allocation8 + $0xb0] ss:$8 sps:$4 sm:$0xff]  }
  0xb3   :  { %521 = vmatpush1.bf16.msra.mxu0 %v3829_v10  ;;  %1267 = vmatprep.subr.bf16.mxu1 %v3870_v29  ;;  %v3906_v54 = vld [vmem:[#allocation11 + $0x14] ss:$8 sps:$4 sm:$0xff]   ;;  %v3907_v55 = vld [vmem:[#allocation8 + $0xc4] ss:$8 sps:$4 sm:$0xff]   ;;  %v3926_v7 = vld [vmem:[#allocation11 + $0x30] ss:$8 sps:$4 sm:$0xff]  }
  0xb4   :  { %522 = vmatprep.subr.bf16.mxu0 %v3830_v11  ;;  %v3909_v56 = vld [vmem:[#allocation8 + $0xc0] ss:$8 sps:$4 sm:$0xff]   ;;  %v3849_v57 = vld [vmem:[#allocation2 + $0x50] sm:$0xff]   ;;  %v3850_v60 = vld [vmem:[#allocation2 + $0x58] sm:$0xff]  }
  0xb5   :  { %v3911_v58 = vld [vmem:[#allocation8 + $0xd4] ss:$8 sps:$4 sm:$0xff]   ;;  %v3913_v59 = vld [vmem:[#allocation8 + $0xd0] ss:$8 sps:$4 sm:$0xff]   ;;  %v3914_v61 = vld [vmem:[#allocation8 + $0xe4] ss:$8 sps:$4 sm:$0xff]  }
  0xb6   :  { %1268 = vmatpush1.bf16.msra.mxu1 %v3872_v30  ;;  %v3916_v62 = vld [vmem:[#allocation8 + $0xe0] ss:$8 sps:$4 sm:$0xff]   ;;  %v3918_v63 = vld [vmem:[#allocation8 + $0xf4] ss:$8 sps:$4 sm:$0xff]   ;;  %v3920_v1 = vld [vmem:[#allocation8 + $0xf0] ss:$8 sps:$4 sm:$0xff]   ;;  %v230_v30 = vlaneseq }
  0xb7   :  { %523 = vmatpush1.bf16.msra.mxu0 %v3832_v12  ;;  %1269 = vmatprep.subr.bf16.mxu1 %v3873_v31  ;;  %v3851_v2 = vld [vmem:[#allocation2 + $0x60] sm:$0xff]   ;;  %v3923_v4 = vld [vmem:[#allocation11 + $0x24] ss:$8 sps:$4 sm:$0xff]   ;;  %v3854_v9 = vld [vmem:[#allocation2 + $0x78] sm:$0xff]  }
  0xb8   :  { %524 = vmatprep.subr.bf16.mxu0 %v3833_v13  ;;  %v3921_v3 = vld [vmem:[#allocation11 + $0x20] ss:$8 sps:$4 sm:$0xff]   ;;  %v3853_v6 = vld [vmem:[#allocation2 + $0x70] sm:$0xff]   ;;  %v3928_v8 = vld [vmem:[#allocation11 + $0x34] ss:$8 sps:$4 sm:$0xff]   ;;  %v231_v31 = vshrl.u32 %v230_v30, 7 }
  0xb9   :  { %v3852_v5 = vld [vmem:[#allocation2 + $0x68] sm:$0xff]   ;;  %v3855_v10 = vld [vmem:[#allocation2 + $0x80] sm:$0xff]   ;;  %v3876_v22 = vld [vmem:[#allocation2 + $0xb0] sm:$0xff]  }
  0xba   :  { %1270 = vmatpush1.bf16.msra.mxu1 %v3875_v32  ;;  %v3931_v11 = vld [vmem:[#allocation11 + $0x40] ss:$8 sps:$4 sm:$0xff]   ;;  %v3933_v12 = vld [vmem:[#allocation11 + $0x44] ss:$8 sps:$4 sm:$0xff]   ;;  %v3942_v24 = vld [vmem:[#allocation11 + $0x74] ss:$8 sps:$4 sm:$0xff]  }
  0xbb   :  { %525 = vmatpush1.bf16.msra.mxu0 %v3835_v14  ;;  %1271 = vmatprep.subr.bf16.mxu1 %v3877_v34  ;;  %v3856_v13 = vld [vmem:[#allocation2 + $0x88] sm:$0xff]   ;;  %v3857_v14 = vld [vmem:[#allocation2 + $0x90] sm:$0xff]   ;;  %v3883_v25 = vld [vmem:[#allocation2 + $0xb8] sm:$0xff]  }
  0xbc   :  { %526 = vmatprep.subr.bf16.mxu0 %v3836_v15  ;;  %v3934_v15 = vld [vmem:[#allocation11 + $0x50] ss:$8 sps:$4 sm:$0xff]   ;;  %v3869_v21 = vld [vmem:[#allocation2 + $0xa8] sm:$0xff]   ;;  %v3893_v26 = vld [vmem:[#allocation2 + $0xc0] sm:$0xff]  }
  0xbd   :  { %v3943_v27 = vld [vmem:[#allocation11 + $0x80] ss:$8 sps:$4 sm:$0xff]   ;;  %v3910_v32 = vld [vmem:[#allocation2 + $0xd0] sm:$0xff]   ;;  %v228_v34 = vld [vmem:[#allocation7] sm:$0x3] }
  0xbe   :  { %1272 = vmatpush1.bf16.msra.mxu1 %v3879_v35  ;;  %v3900_v29 = vld [vmem:[#allocation2 + $0xc8] sm:$0xff]   ;;  %v4433_v35 = vsub.s32 1, %v231_v31 }
  0xbf   :  { %527 = vmatpush1.bf16.msra.mxu0 %v3838_v16  ;;  %1273 = vmatprep.subr.bf16.mxu1 %v3880_v36  ;;  %v3936_v16 = vld [vmem:[#allocation11 + $0x54] ss:$8 sps:$4 sm:$0xff]   ;;  %v3946_v36 = vld [vmem:[#allocation11 + $0x90] ss:$8 sps:$4 sm:$0xff]  }
  0xc0   :  { %2010 = vmatprep.subr.bf16.mxu0 %v3889_v42 }
  0xc2   :  { %545 = vmatmul.mubr.bf16.vlgmr.msra.gmra.mrb[0].mxu0 %v3839_v17  ;;  %1274 = vmatpush1.bf16.msra.mxu1 %v3882_v37  ;;  %v3858_v17 = vld [vmem:[#allocation2 + $0x98] sm:$0xff]  }
  0xc3   :  { %554 = vmatprep.mubr.bf16.mxu0 %v4228_v0  ;;  %1275 = vmatprep.subr.bf16.mxu1 %v3884_v39  ;;  %v3948_v37 = vld [vmem:[#allocation11 + $0x94] ss:$8 sps:$4 sm:$0xff]   ;;  %v4440_v39 = vrot.slane %v228_v34, %v4433_v35 }
  0xc4   :  { %2011 = vmatpush1.bf16.msra.mxu0 %v3887_v41 }
  0xc5   :  { %2012 = vmatprep.subr.bf16.mxu0 %v3906_v54 }
  0xc6   :  { %1276 = vmatpush1.bf16.msra.mxu1 %v3886_v40 }
  0xc7   :  { %1277 = vmatprep.subr.bf16.mxu1 %v3890_v43  ;;  %v3917_v43 = vld [vmem:[#allocation2 + $0xd8] sm:$0xff]  }
  0xc8   :  { %2013 = vmatpush1.bf16.msra.mxu0 %v3904_v53 }
  0xc9   :  { %2014 = vmatprep.subr.bf16.mxu0 %v3923_v4 }
  0xca   :  { %555 = vmatmul.mubr.bf16.gmra.mrb[4].mxu0 %v3840_v18  ;;  %1278 = vmatpush1.bf16.msra.mxu1 %v3892_v44  ;;  %v3862_v18 = vld [vmem:[#allocation2 + $0xa0] sm:$0xff]  }
  0xcb   :  { %564 = vmatprep.mubr.bf16.mxu0 %v4228_v0  ;;  %1279 = vmatprep.subr.bf16.mxu1 %v3894_v46 }
  0xcc   :  { %2015 = vmatpush1.bf16.msra.mxu0 %v3921_v3 }
  0xcd   :  { %2016 = vmatprep.subr.bf16.mxu0 %v3928_v8 }
  0xce   :  { %1280 = vmatpush1.bf16.msra.mxu1 %v3896_v47 }
  0xcf   :  { %1281 = vmatprep.subr.bf16.mxu1 %v3897_v48 }
  0xd0   :  { %2017 = vmatpush1.bf16.msra.mxu0 %v3926_v7 }
  0xd1   :  { %2018 = vmatprep.subr.bf16.mxu0 %v3933_v12  ;;  %v3925_v12 = vld [vmem:[#allocation2 + $0xe8] sm:$0xff]  }
  0xd2   :  { %565 = vmatmul.mubr.bf16.gmra.mrb[8].mxu0 %v3841_v19  ;;  %1282 = vmatpush1.bf16.msra.mxu1 %v3899_v49  ;;  %v3937_v19 = vld [vmem:[#allocation11 + $0x60] ss:$8 sps:$4 sm:$0xff]  }
  0xd3   :  { %574 = vmatprep.mubr.bf16.mxu0 %v4228_v0  ;;  %1283 = vmatprep.subr.bf16.mxu1 %v3901_v51 }
  0xd4   :  { %2019 = vmatpush1.bf16.msra.mxu0 %v3931_v11 }
  0xd5   :  { %2020 = vmatprep.subr.bf16.mxu0 %v3936_v16 }
  0xd6   :  { %1284 = vmatpush1.bf16.msra.mxu1 %v3903_v52 }
  0xd7   :  { %1285 = vmatprep.subr.bf16.mxu1 %v3907_v55 }
  0xd8   :  { %2021 = vmatpush1.bf16.msra.mxu0 %v3934_v15 }
  0xda   :  { %575 = vmatmul.mubr.bf16.gmra.mrb[12].mxu0 %v3842_v20  ;;  %1286 = vmatpush1.bf16.msra.mxu1 %v3909_v56  ;;  %v3939_v20 = vld [vmem:[#allocation11 + $0x64] ss:$8 sps:$4 sm:$0xff]  }
  0xdb   :  { %584 = vmatprep.mubr.bf16.mxu0 %v4228_v0  ;;  %1287 = vmatprep.subr.bf16.mxu1 %v3911_v58  ;;  %v3924_v58 = vld [vmem:[#allocation2 + $0xe0] sm:$0xff]  }
  0xdc   :  { %2022 = vmatprep.subr.bf16.mxu0 %v3939_v20 }
  0xdd   :  { %2023 = vmatpush1.bf16.msra.mxu0 %v3937_v19 }
  0xde   :  { %1288 = vmatpush1.bf16.msra.mxu1 %v3913_v59  ;;  %2024 = vmatprep.subr.bf16.mxu0 %v3942_v24 }
  0xdf   :  { %1289 = vmatprep.subr.bf16.mxu1 %v3914_v61 }
  0xe2   :  { %585 = vmatmul.mubr.bf16.gmra.mrb[16].mxu0 %v3843_v23  ;;  %1290 = vmatpush1.bf16.msra.mxu1 %v3916_v62  ;;  %v3940_v23 = vld [vmem:[#allocation11 + $0x70] ss:$8 sps:$4 sm:$0xff]  }
  0xe3   :  { %594 = vmatprep.mubr.bf16.mxu0 %v4228_v0  ;;  %1291 = vmatprep.subr.bf16.mxu1 %v3918_v63  ;;  %v3949_v63 = vld [vmem:[#allocation11 + $0xa0] ss:$8 sps:$4 sm:$0xff]  }
  0xe4   :  { %2025 = vmatpush1.bf16.msra.mxu0 %v3940_v23 }
  0xe6   :  { %1292 = vmatpush1.bf16.msra.mxu1 %v3920_v1  ;;  %v3951_v1 = vld [vmem:[#allocation11 + $0xa4] ss:$8 sps:$4 sm:$0xff]  }
  0xe7   :  { %3768 = vmatprep.subr.bf16.mxu1 %v4228_v0 }
  0xea   :  { %595 = vmatmul.mubr.bf16.gmra.mrb[20].mxu0 %v3844_v28  ;;  %v3945_v28 = vld [vmem:[#allocation11 + $0x84] ss:$8 sps:$4 sm:$0xff]  }
  0xeb   :  { %604 = vmatprep.mubr.bf16.mxu0 %v4228_v0  ;;  %2026 = vmatprep.subr.bf16.mxu0 %v3945_v28 }
  0xec   :  { %2027 = vmatpush1.bf16.msra.mxu0 %v3943_v27  ;;  %v3929_v27 = vld [vmem:[#allocation2 + $0xf0] sm:$0xff]  }
  0xed   :  { %2028 = vmatprep.subr.bf16.mxu0 %v3948_v37 }
  0xf0   :  { %2029 = vmatpush1.bf16.msra.mxu0 %v3946_v36 }
  0xf1   :  { %2030 = vmatprep.subr.bf16.mxu0 %v3951_v1 }
  0xf2   :  { %605 = vmatmul.mubr.bf16.gmra.mrb[24].mxu0 %v3845_v33  ;;  %v4431_v33 = vsub.s32 0, %v231_v31 }
  0xf3   :  { %614 = vmatprep.mubr.bf16.mxu0 %v4228_v0 }
  0xf4   :  { %2031 = vmatpush1.bf16.msra.mxu0 %v3949_v63 }
  0xfa   :  { %615 = vmatmul.mubr.bf16.gmra.mrb[28].mxu0 %v3846_v38  ;;  %v4436_v38 = vrot.slane %v228_v34, %v4431_v33  ;;  %v3954_v34 = vld [vmem:[#allocation11 + $0xb4] ss:$8 sps:$4 sm:$0xff]  }
  0xfb   :  { %624 = vmatprep.mubr.bf16.mxu0 %v4228_v0  ;;  %2032 = vmatprep.subr.bf16.mxu0 %v3954_v34 }
 0x102   :  { %625 = vmatmul.mubr.bf16.gmra.mrb[32].mxu0 %v3847_v45 }
 0x103   :  { %634 = vmatprep.mubr.bf16.mxu0 %v4228_v0 }
 0x10a   :  { %635 = vmatmul.mubr.bf16.gmra.mrb[36].mxu0 %v3848_v50 }
 0x10b   :  { %644 = vmatprep.mubr.bf16.mxu0 %v4228_v0 }
 0x112   :  { %645 = vmatmul.mubr.bf16.gmra.mrb[40].mxu0 %v3849_v57 }
 0x113   :  { %654 = vmatprep.mubr.bf16.mxu0 %v4228_v0 }
 0x11a   :  { %655 = vmatmul.mubr.bf16.gmra.mrb[44].mxu0 %v3850_v60 }
 0x11b   :  { %664 = vmatprep.mubr.bf16.mxu0 %v4228_v0 }
 0x122   :  { %665 = vmatmul.mubr.bf16.gmra.mrb[48].mxu0 %v3851_v2 }
 0x123   :  { %674 = vmatprep.mubr.bf16.mxu0 %v4228_v0 }
 0x12a   :  { %675 = vmatmul.mubr.bf16.gmra.mrb[52].mxu0 %v3852_v5 }
 0x12b   :  { %684 = vmatprep.mubr.bf16.mxu0 %v4228_v0 }
 0x132   :  { %685 = vmatmul.mubr.bf16.gmra.mrb[56].mxu0 %v3853_v6 }
 0x133   :  { %694 = vmatprep.mubr.bf16.mxu0 %v4228_v0 }
 0x13a   :  { %695 = vmatmul.mubr.bf16.gmra.mrb[60].mxu0 %v3854_v9 }
 0x13b   :  { %704 = vmatprep.mubr.bf16.mxu0 %v4228_v0 }
 0x142   :  { %705 = vmatmul.mubr.bf16.gmra.mrb[64].mxu0 %v3855_v10 }
 0x143   :  { %714 = vmatprep.mubr.bf16.mxu0 %v4228_v0 }
 0x14a   :  { %715 = vmatmul.mubr.bf16.gmra.mrb[68].mxu0 %v3856_v13 }
 0x14b   :  { %724 = vmatprep.mubr.bf16.mxu0 %v4228_v0 }
 0x152   :  { %725 = vmatmul.mubr.bf16.gmra.mrb[72].mxu0 %v3857_v14 }
 0x153   :  { %734 = vmatprep.mubr.bf16.mxu0 %v4228_v0 }
 0x15a   :  { %735 = vmatmul.mubr.bf16.gmra.mrb[76].mxu0 %v3858_v17 }
 0x15b   :  { %744 = vmatprep.mubr.bf16.mxu0 %v4228_v0 }
 0x162   :  { %745 = vmatmul.mubr.bf16.gmra.mrb[80].mxu0 %v3862_v18 }
 0x163   :  { %754 = vmatprep.mubr.bf16.mxu0 %v4228_v0 }
 0x16a   :  { %755 = vmatmul.mubr.bf16.gmra.mrb[84].mxu0 %v3869_v21 }
 0x16b   :  { %764 = vmatprep.mubr.bf16.mxu0 %v4228_v0 }
 0x172   :  { %765 = vmatmul.mubr.bf16.gmra.mrb[88].mxu0 %v3876_v22 }
 0x173   :  { %774 = vmatprep.mubr.bf16.mxu0 %v4228_v0 }
 0x17a   :  { %775 = vmatmul.mubr.bf16.gmra.mrb[92].mxu0 %v3883_v25 }
 0x17b   :  { %784 = vmatprep.mubr.bf16.mxu0 %v4228_v0 }
 0x182   :  { %785 = vmatmul.mubr.bf16.gmra.mrb[96].mxu0 %v3893_v26 }
 0x183   :  { %794 = vmatprep.mubr.bf16.mxu0 %v4228_v0 }
 0x18a   :  { %795 = vmatmul.mubr.bf16.gmra.mrb[100].mxu0 %v3900_v29 }
 0x18b   :  { %804 = vmatprep.mubr.bf16.mxu0 %v4228_v0 }
 0x192   :  { %805 = vmatmul.mubr.bf16.gmra.mrb[104].mxu0 %v3910_v32  ;;  %v3952_v32 = vld [vmem:[#allocation11 + $0xb0] ss:$8 sps:$4 sm:$0xff]  }
 0x193   :  { %814 = vmatprep.mubr.bf16.mxu0 %v4228_v0  ;;  %2033 = vmatpush1.bf16.msra.mxu0 %v3952_v32 }
 0x195   :  { %v546_v40 = vpop.f32.mrb[0].mxu0 }
 0x196   :  { %v547_v41 = vadd.f32 %v546_v40, %v4436_v38  ;;  %v548_v42 = vpop.f32.mrb[1].mxu0 }
 0x197   :  { %v550_v44 = vpop.f32.mrb[2].mxu0  ;;  %v549_v45 = vadd.f32 %v548_v42, %v4440_v39 }
 0x198   :  { %v551_v46 = vadd.f32 %v550_v44, %v4436_v38  ;;  %v552_v47 = vpop.f32.mrb[3].mxu0  ;;  %v865_v49 = vmax.f32 %v547_v41, 0.0 }
 0x199   :  { %v553_v48 = vadd.f32 %v552_v47, %v4440_v39  ;;  %v866_v51 = vmax.f32 %v549_v45, 0.0 }
 0x19a   :  { %v867_v50 = vmax.f32 %v551_v46, 0.0  ;;  %815 = vmatmul.mubr.bf16.gmra.mrb[108].mxu0 %v3917_v43 }
 0x19b   :  { %v868_v52 = vmax.f32 %v553_v48, 0.0  ;;  %824 = vmatprep.mubr.bf16.mxu0 %v4228_v0  ;;  %v3930_v48 = vld [vmem:[#allocation2 + $0xf8] sm:$0xff]  }
 0x19c   :  { %v993_v53 = vpack.c.bf16 %v867_v50, %v865_v49 }
 0x19d   :  { %v556_v54 = vpop.f32.mrb[4].mxu0  ;;  %v994_v55 = vpack.c.bf16 %v868_v52, %v866_v51 }
 0x19e   :  { %v557_v56 = vadd.f32 %v556_v54, %v4436_v38  ;;  %v558_v57 = vpop.f32.mrb[5].mxu0 }
 0x19f   :  { %v559_v59 = vadd.f32 %v558_v57, %v4440_v39  ;;  %v560_v60 = vpop.f32.mrb[6].mxu0  ;;  %1293 = vmatprep.mubr.bf16.mxu1 %v994_v55 }
 0x1a0   :  { %v561_v61 = vadd.f32 %v560_v60, %v4436_v38  ;;  %v562_v62 = vpop.f32.mrb[7].mxu0  ;;  %1294 = vmatmul.mubr.bf16.vlgmr.msra.gmra.mrb[0].mxu1 %v993_v53  ;;  %v869_v3 = vmax.f32 %v557_v56, 0.0 }
 0x1a1   :  { %v563_v2 = vadd.f32 %v562_v62, %v4440_v39  ;;  %v870_v5 = vmax.f32 %v559_v59, 0.0 }
 0x1a2   :  { %v871_v4 = vmax.f32 %v561_v61, 0.0  ;;  %825 = vmatmul.mubr.bf16.gmra.mrb[112].mxu0 %v3924_v58 }
 0x1a3   :  { %v872_v6 = vmax.f32 %v563_v2, 0.0  ;;  %834 = vmatprep.mubr.bf16.mxu0 %v4228_v0 }
 0x1a4   :  { %v995_v7 = vpack.c.bf16 %v871_v4, %v869_v3  ;;  %v3955_v4 = vld [vmem:[#allocation11 + $0xc0] ss:$8 sps:$4 sm:$0xff]  }
 0x1a5   :  { %v566_v8 = vpop.f32.mrb[8].mxu0  ;;  %v996_v9 = vpack.c.bf16 %v872_v6, %v870_v5  ;;  %v3957_v5 = vld [vmem:[#allocation11 + $0xc4] ss:$8 sps:$4 sm:$0xff]  }
 0x1a6   :  { %v567_v10 = vadd.f32 %v566_v8, %v4436_v38  ;;  %v568_v11 = vpop.f32.mrb[9].mxu0  ;;  %2034 = vmatprep.subr.bf16.mxu0 %v3957_v5  ;;  %v3961_v5 = vld [vmem:[#allocation11 + $0xe0] ss:$8 sps:$4 sm:$0xff]  }
 0x1a7   :  { %v569_v13 = vadd.f32 %v568_v11, %v4440_v39  ;;  %v570_v14 = vpop.f32.mrb[10].mxu0  ;;  %1303 = vmatprep.mubr.bf16.mxu1 %v996_v9  ;;  %2035 = vmatpush1.bf16.msra.mxu0 %v3955_v4 }
 0x1a8   :  { %v571_v15 = vadd.f32 %v570_v14, %v4436_v38  ;;  %v572_v16 = vpop.f32.mrb[11].mxu0  ;;  %1304 = vmatmul.mubr.bf16.gmra.mrb[4].mxu1 %v995_v7  ;;  %v873_v18 = vmax.f32 %v567_v10, 0.0 }
 0x1a9   :  { %v573_v17 = vadd.f32 %v572_v16, %v4440_v39  ;;  %v874_v20 = vmax.f32 %v569_v13, 0.0 }
 0x1aa   :  { %v875_v19 = vmax.f32 %v571_v15, 0.0  ;;  %835 = vmatmul.mubr.bf16.gmra.mrb[116].mxu0 %v3925_v12 }
 0x1ab   :  { %v876_v21 = vmax.f32 %v573_v17, 0.0  ;;  %844 = vmatprep.mubr.bf16.mxu0 %v4228_v0 }
 0x1ac   :  { %v997_v22 = vpack.c.bf16 %v875_v19, %v873_v18 }
 0x1ad   :  { %v998_v23 = vpack.c.bf16 %v876_v21, %v874_v20  ;;  %v576_v24 = vpop.f32.mrb[12].mxu0 }
 0x1ae   :  { %v577_v25 = vadd.f32 %v576_v24, %v4436_v38  ;;  %v578_v26 = vpop.f32.mrb[13].mxu0 }
 0x1af   :  { %v579_v28 = vadd.f32 %v578_v26, %v4440_v39  ;;  %v580_v29 = vpop.f32.mrb[14].mxu0  ;;  %1313 = vmatprep.mubr.bf16.mxu1 %v998_v23 }
 0x1b0   :  { %v581_v30 = vadd.f32 %v580_v29, %v4436_v38  ;;  %v582_v31 = vpop.f32.mrb[15].mxu0  ;;  %1314 = vmatmul.mubr.bf16.gmra.mrb[8].mxu1 %v997_v22  ;;  %v877_v37 = vmax.f32 %v577_v25, 0.0 }
 0x1b1   :  { %v583_v36 = vadd.f32 %v582_v31, %v4440_v39  ;;  %v878_v41 = vmax.f32 %v579_v28, 0.0 }
 0x1b2   :  { %v879_v40 = vmax.f32 %v581_v30, 0.0  ;;  %845 = vmatmul.mubr.bf16.gmra.mrb[120].mxu0 %v3929_v27 }
 0x1b3   :  { %v880_v42 = vmax.f32 %v583_v36, 0.0  ;;  %854 = vmatprep.mubr.bf16.mxu0 %v4228_v0  ;;  %v3958_v36 = vld [vmem:[#allocation11 + $0xd0] ss:$8 sps:$4 sm:$0xff]  }
 0x1b4   :  { %v999_v43 = vpack.c.bf16 %v879_v40, %v877_v37  ;;  %v3960_v37 = vld [vmem:[#allocation11 + $0xd4] ss:$8 sps:$4 sm:$0xff]  }
 0x1b5   :  { %v1000_v44 = vpack.c.bf16 %v880_v42, %v878_v41  ;;  %v586_v45 = vpop.f32.mrb[16].mxu0  ;;  %2036 = vmatprep.subr.bf16.mxu0 %v3960_v37 }
 0x1b6   :  { %v587_v46 = vadd.f32 %v586_v45, %v4436_v38  ;;  %v588_v47 = vpop.f32.mrb[17].mxu0  ;;  %2037 = vmatpush1.bf16.msra.mxu0 %v3958_v36 }
 0x1b7   :  { %v589_v49 = vadd.f32 %v588_v47, %v4440_v39  ;;  %v590_v50 = vpop.f32.mrb[18].mxu0  ;;  %1323 = vmatprep.mubr.bf16.mxu1 %v1000_v44 }
 0x1b8   :  { %v591_v51 = vadd.f32 %v590_v50, %v4436_v38  ;;  %v592_v52 = vpop.f32.mrb[19].mxu0  ;;  %1324 = vmatmul.mubr.bf16.gmra.mrb[12].mxu1 %v999_v43  ;;  %v881_v54 = vmax.f32 %v587_v46, 0.0 }
 0x1b9   :  { %v593_v53 = vadd.f32 %v592_v52, %v4440_v39  ;;  %v882_v56 = vmax.f32 %v589_v49, 0.0 }
 0x1ba   :  { %v883_v55 = vmax.f32 %v591_v51, 0.0  ;;  %855 = vmatmul.mubr.bf16.gmra.mrb[124].mxu0 %v3930_v48 }
 0x1bb   :  { %v884_v57 = vmax.f32 %v593_v53, 0.0 }
 0x1bc   :  { %v1001_v58 = vpack.c.bf16 %v883_v55, %v881_v54 }
 0x1bd   :  { %v1002_v59 = vpack.c.bf16 %v884_v57, %v882_v56  ;;  %v596_v60 = vpop.f32.mrb[20].mxu0 }
 0x1be   :  { %v597_v61 = vadd.f32 %v596_v60, %v4436_v38  ;;  %v598_v62 = vpop.f32.mrb[21].mxu0 }
 0x1bf   :  { %v599_v63 = vadd.f32 %v598_v62, %v4440_v39  ;;  %v600_v1 = vpop.f32.mrb[22].mxu0  ;;  %1333 = vmatprep.mubr.bf16.mxu1 %v1002_v59 }
 0x1c0   :  { %v601_v2 = vadd.f32 %v600_v1, %v4436_v38  ;;  %v602_v3 = vpop.f32.mrb[23].mxu0  ;;  %1334 = vmatmul.mubr.bf16.gmra.mrb[16].mxu1 %v1001_v58  ;;  %v885_v7 = vmax.f32 %v597_v61, 0.0 }
 0x1c1   :  { %v603_v6 = vadd.f32 %v602_v3, %v4440_v39  ;;  %v886_v9 = vmax.f32 %v599_v63, 0.0 }
 0x1c2   :  { %v887_v8 = vmax.f32 %v601_v2, 0.0 }
 0x1c3   :  { %v888_v10 = vmax.f32 %v603_v6, 0.0  ;;  %v3963_v6 = vld [vmem:[#allocation11 + $0xe4] ss:$8 sps:$4 sm:$0xff]  }
 0x1c4   :  { %v1003_v11 = vpack.c.bf16 %v887_v8, %v885_v7  ;;  %2038 = vmatprep.subr.bf16.mxu0 %v3963_v6 }
 0x1c5   :  { %v1004_v12 = vpack.c.bf16 %v888_v10, %v886_v9  ;;  %v606_v13 = vpop.f32.mrb[24].mxu0  ;;  %2039 = vmatpush1.bf16.msra.mxu0 %v3961_v5  ;;  %v4505_v5 = vld [vmem:[#allocation14 + $0x8] sm:$0xff]  }
 0x1c6   :  { %v607_v14 = vadd.f32 %v606_v13, %v4436_v38  ;;  %v608_v15 = vpop.f32.mrb[25].mxu0 }
 0x1c7   :  { %v609_v16 = vadd.f32 %v608_v15, %v4440_v39  ;;  %v610_v17 = vpop.f32.mrb[26].mxu0  ;;  %1343 = vmatprep.mubr.bf16.mxu1 %v1004_v12 }
 0x1c8   :  { %v611_v18 = vadd.f32 %v610_v17, %v4436_v38  ;;  %v612_v19 = vpop.f32.mrb[27].mxu0  ;;  %1344 = vmatmul.mubr.bf16.gmra.mrb[20].mxu1 %v1003_v11  ;;  %v889_v21 = vmax.f32 %v607_v14, 0.0 }
 0x1c9   :  { %v613_v20 = vadd.f32 %v612_v19, %v4440_v39  ;;  %v890_v23 = vmax.f32 %v609_v16, 0.0 }
 0x1ca   :  { %v891_v22 = vmax.f32 %v611_v18, 0.0 }
 0x1cb   :  { %v892_v24 = vmax.f32 %v613_v20, 0.0 }
 0x1cc   :  { %v1005_v25 = vpack.c.bf16 %v891_v22, %v889_v21 }
 0x1cd   :  { %v1006_v26 = vpack.c.bf16 %v892_v24, %v890_v23  ;;  %v616_v27 = vpop.f32.mrb[28].mxu0 }
 0x1ce   :  { %v617_v28 = vadd.f32 %v616_v27, %v4436_v38  ;;  %v618_v29 = vpop.f32.mrb[29].mxu0 }
 0x1cf   :  { %v619_v30 = vadd.f32 %v618_v29, %v4440_v39  ;;  %v620_v31 = vpop.f32.mrb[30].mxu0  ;;  %1353 = vmatprep.mubr.bf16.mxu1 %v1006_v26  ;;  %v4490_v29 = vld [vmem:[#allocation14] sm:$0xff]  }
 0x1d0   :  { %v621_v32 = vadd.f32 %v620_v31, %v4436_v38  ;;  %v622_v34 = vpop.f32.mrb[31].mxu0  ;;  %1354 = vmatmul.mubr.bf16.gmra.mrb[24].mxu1 %v1005_v25  ;;  %v893_v41 = vmax.f32 %v617_v28, 0.0 }
 0x1d1   :  { %v623_v40 = vadd.f32 %v622_v34, %v4440_v39  ;;  %v894_v43 = vmax.f32 %v619_v30, 0.0  ;;  %3784 = vmatpush1.bf16.msra.mxu1 %v4490_v29 }
 0x1d2   :  { %v895_v42 = vmax.f32 %v621_v32, 0.0  ;;  %3769 = vmatprep.subr.bf16.mxu1 %v4228_v0 }
 0x1d3   :  { %v896_v44 = vmax.f32 %v623_v40, 0.0  ;;  %v3965_v40 = vld [vmem:[#allocation11 + $0xf0] ss:$8 sps:$4 sm:$0xff]  }
 0x1d4   :  { %v1007_v45 = vpack.c.bf16 %v895_v42, %v893_v41  ;;  %v3967_v41 = vld [vmem:[#allocation11 + $0xf4] ss:$8 sps:$4 sm:$0xff]  }
 0x1d5   :  { %v1008_v46 = vpack.c.bf16 %v896_v44, %v894_v43  ;;  %v626_v47 = vpop.f32.mrb[32].mxu0  ;;  %2040 = vmatprep.subr.bf16.mxu0 %v3967_v41  ;;  %3785 = vmatpush1.bf16.msra.mxu1 %v4505_v5 }
 0x1d6   :  { %v627_v48 = vadd.f32 %v626_v47, %v4436_v38  ;;  %v628_v49 = vpop.f32.mrb[33].mxu0  ;;  %2041 = vmatpush1.bf16.msra.mxu0 %v3965_v40  ;;  %3770 = vmatprep.subr.bf16.mxu1 %v4228_v0 }
 0x1d7   :  { %v629_v50 = vadd.f32 %v628_v49, %v4440_v39  ;;  %v630_v51 = vpop.f32.mrb[34].mxu0  ;;  %1363 = vmatprep.mubr.bf16.mxu1 %v1008_v46  ;;  %2690 = vmatprep.subr.bf16.mxu0 %v4228_v0 }
 0x1d8   :  { %v631_v52 = vadd.f32 %v630_v51, %v4436_v38  ;;  %v632_v53 = vpop.f32.mrb[35].mxu0  ;;  %1364 = vmatmul.mubr.bf16.gmra.mrb[28].mxu1 %v1007_v45  ;;  %v897_v55 = vmax.f32 %v627_v48, 0.0 }
 0x1d9   :  { %v633_v54 = vadd.f32 %v632_v53, %v4440_v39  ;;  %v898_v57 = vmax.f32 %v629_v50, 0.0 }
 0x1da   :  { %v899_v56 = vmax.f32 %v631_v52, 0.0 }
 0x1db   :  { %v900_v58 = vmax.f32 %v633_v54, 0.0 }
 0x1dc   :  { %v1009_v59 = vpack.c.bf16 %v899_v56, %v897_v55 }
 0x1dd   :  { %v1010_v60 = vpack.c.bf16 %v900_v58, %v898_v57  ;;  %v636_v61 = vpop.f32.mrb[36].mxu0 }
 0x1de   :  { %v637_v62 = vadd.f32 %v636_v61, %v4436_v38  ;;  %v638_v63 = vpop.f32.mrb[37].mxu0 }
 0x1df   :  { %v639_v1 = vadd.f32 %v638_v63, %v4440_v39  ;;  %v640_v2 = vpop.f32.mrb[38].mxu0  ;;  %1373 = vmatprep.mubr.bf16.mxu1 %v1010_v60 }
 0x1e0   :  { %v641_v3 = vadd.f32 %v640_v2, %v4436_v38  ;;  %v642_v4 = vpop.f32.mrb[39].mxu0  ;;  %1374 = vmatmul.mubr.bf16.gmra.mrb[32].mxu1 %v1009_v59  ;;  %v901_v8 = vmax.f32 %v637_v62, 0.0 }
 0x1e1   :  { %v643_v7 = vadd.f32 %v642_v4, %v4440_v39  ;;  %v902_v10 = vmax.f32 %v639_v1, 0.0 }
 0x1e2   :  { %v903_v9 = vmax.f32 %v641_v3, 0.0 }
 0x1e3   :  { %v904_v11 = vmax.f32 %v643_v7, 0.0 }
 0x1e4   :  { %v1011_v12 = vpack.c.bf16 %v903_v9, %v901_v8 }
 0x1e5   :  { %v1012_v13 = vpack.c.bf16 %v904_v11, %v902_v10  ;;  %v646_v14 = vpop.f32.mrb[40].mxu0 }
 0x1e6   :  { %v647_v15 = vadd.f32 %v646_v14, %v4436_v38  ;;  %v648_v16 = vpop.f32.mrb[41].mxu0 }
 0x1e7   :  { %v649_v17 = vadd.f32 %v648_v16, %v4440_v39  ;;  %v650_v18 = vpop.f32.mrb[42].mxu0  ;;  %1383 = vmatprep.mubr.bf16.mxu1 %v1012_v13 }
 0x1e8   :  { %v651_v19 = vadd.f32 %v650_v18, %v4436_v38  ;;  %v652_v20 = vpop.f32.mrb[43].mxu0  ;;  %1384 = vmatmul.mubr.bf16.gmra.mrb[36].mxu1 %v1011_v12  ;;  %v905_v22 = vmax.f32 %v647_v15, 0.0 }
 0x1e9   :  { %v653_v21 = vadd.f32 %v652_v20, %v4440_v39  ;;  %v906_v24 = vmax.f32 %v649_v17, 0.0 }
 0x1ea   :  { %v907_v23 = vmax.f32 %v651_v19, 0.0 }
 0x1eb   :  { %v908_v25 = vmax.f32 %v653_v21, 0.0 }
 0x1ec   :  { %v1013_v26 = vpack.c.bf16 %v907_v23, %v905_v22 }
 0x1ed   :  { %v1014_v27 = vpack.c.bf16 %v908_v25, %v906_v24  ;;  %v656_v28 = vpop.f32.mrb[44].mxu0 }
 0x1ee   :  { %v657_v30 = vadd.f32 %v656_v28, %v4436_v38  ;;  %v658_v31 = vpop.f32.mrb[45].mxu0 }
 0x1ef   :  { %v659_v32 = vadd.f32 %v658_v31, %v4440_v39  ;;  %v660_v34 = vpop.f32.mrb[46].mxu0  ;;  %1393 = vmatprep.mubr.bf16.mxu1 %v1014_v27 }
 0x1f0   :  { %v661_v36 = vadd.f32 %v660_v34, %v4436_v38  ;;  %v662_v37 = vpop.f32.mrb[47].mxu0  ;;  %1394 = vmatmul.mubr.bf16.gmra.mrb[40].mxu1 %v1013_v26  ;;  %v909_v43 = vmax.f32 %v657_v30, 0.0 }
 0x1f1   :  { %v663_v42 = vadd.f32 %v662_v37, %v4440_v39  ;;  %v910_v45 = vmax.f32 %v659_v32, 0.0  ;;  %v4517_v37 = vld [vmem:[#allocation14 + $0x10] sm:$0xff]  }
 0x1f2   :  { %v911_v44 = vmax.f32 %v661_v36, 0.0  ;;  %3786 = vmatpush1.bf16.msra.mxu1 %v4517_v37 }
 0x1f3   :  { %v912_v46 = vmax.f32 %v663_v42, 0.0  ;;  %3771 = vmatprep.subr.bf16.mxu1 %v4228_v0 }
 0x1f4   :  { %v1015_v47 = vpack.c.bf16 %v911_v44, %v909_v43 }
 0x1f5   :  { %v1016_v48 = vpack.c.bf16 %v912_v46, %v910_v45  ;;  %v666_v49 = vpop.f32.mrb[48].mxu0 }
 0x1f6   :  { %v667_v50 = vadd.f32 %v666_v49, %v4436_v38  ;;  %v668_v51 = vpop.f32.mrb[49].mxu0 }
 0x1f7   :  { %v669_v52 = vadd.f32 %v668_v51, %v4440_v39  ;;  %v670_v53 = vpop.f32.mrb[50].mxu0  ;;  %1403 = vmatprep.mubr.bf16.mxu1 %v1016_v48 }
 0x1f8   :  { %v671_v54 = vadd.f32 %v670_v53, %v4436_v38  ;;  %v672_v55 = vpop.f32.mrb[51].mxu0  ;;  %1404 = vmatmul.mubr.bf16.gmra.mrb[44].mxu1 %v1015_v47  ;;  %v913_v57 = vmax.f32 %v667_v50, 0.0 }
 0x1f9   :  { %v673_v56 = vadd.f32 %v672_v55, %v4440_v39  ;;  %v914_v59 = vmax.f32 %v669_v52, 0.0 }
 0x1fa   :  { %v915_v58 = vmax.f32 %v671_v54, 0.0 }
 0x1fb   :  { %v916_v60 = vmax.f32 %v673_v56, 0.0 }
 0x1fc   :  { %v1017_v61 = vpack.c.bf16 %v915_v58, %v913_v57 }
 0x1fd   :  { %v1018_v62 = vpack.c.bf16 %v916_v60, %v914_v59  ;;  %v676_v63 = vpop.f32.mrb[52].mxu0 }
 0x1fe   :  { %v677_v1 = vadd.f32 %v676_v63, %v4436_v38  ;;  %v678_v2 = vpop.f32.mrb[53].mxu0 }
 0x1ff   :  { %v679_v3 = vadd.f32 %v678_v2, %v4440_v39  ;;  %v680_v4 = vpop.f32.mrb[54].mxu0  ;;  %1413 = vmatprep.mubr.bf16.mxu1 %v1018_v62 }
 0x200   :  { %v681_v6 = vadd.f32 %v680_v4, %v4436_v38  ;;  %v682_v7 = vpop.f32.mrb[55].mxu0  ;;  %1414 = vmatmul.mubr.bf16.gmra.mrb[48].mxu1 %v1017_v61  ;;  %v917_v9 = vmax.f32 %v677_v1, 0.0 }
 0x201   :  { %v683_v8 = vadd.f32 %v682_v7, %v4440_v39  ;;  %v918_v11 = vmax.f32 %v679_v3, 0.0 }
 0x202   :  { %v919_v10 = vmax.f32 %v681_v6, 0.0  ;;  %v4529_v6 = vld [vmem:[#allocation14 + $0x18] sm:$0xff]  }
 0x203   :  { %v920_v12 = vmax.f32 %v683_v8, 0.0  ;;  %3787 = vmatpush1.bf16.msra.mxu1 %v4529_v6 }
 0x204   :  { %v1019_v13 = vpack.c.bf16 %v919_v10, %v917_v9  ;;  %3772 = vmatprep.subr.bf16.mxu1 %v4228_v0 }
 0x205   :  { %v1020_v14 = vpack.c.bf16 %v920_v12, %v918_v11  ;;  %v686_v15 = vpop.f32.mrb[56].mxu0 }
 0x206   :  { %v687_v16 = vadd.f32 %v686_v15, %v4436_v38  ;;  %v688_v17 = vpop.f32.mrb[57].mxu0 }
 0x207   :  { %v689_v18 = vadd.f32 %v688_v17, %v4440_v39  ;;  %v690_v19 = vpop.f32.mrb[58].mxu0  ;;  %1423 = vmatprep.mubr.bf16.mxu1 %v1020_v14 }
 0x208   :  { %v691_v20 = vadd.f32 %v690_v19, %v4436_v38  ;;  %v692_v21 = vpop.f32.mrb[59].mxu0  ;;  %1424 = vmatmul.mubr.bf16.gmra.mrb[52].mxu1 %v1019_v13  ;;  %v921_v23 = vmax.f32 %v687_v16, 0.0 }
 0x209   :  { %v693_v22 = vadd.f32 %v692_v21, %v4440_v39  ;;  %v922_v25 = vmax.f32 %v689_v18, 0.0 }
 0x20a   :  { %v923_v24 = vmax.f32 %v691_v20, 0.0 }
 0x20b   :  { %v924_v26 = vmax.f32 %v693_v22, 0.0 }
 0x20c   :  { %v1021_v27 = vpack.c.bf16 %v923_v24, %v921_v23 }
 0x20d   :  { %v1022_v28 = vpack.c.bf16 %v924_v26, %v922_v25  ;;  %v696_v30 = vpop.f32.mrb[60].mxu0 }
 0x20e   :  { %v697_v31 = vadd.f32 %v696_v30, %v4436_v38  ;;  %v698_v32 = vpop.f32.mrb[61].mxu0 }
 0x20f   :  { %v699_v34 = vadd.f32 %v698_v32, %v4440_v39  ;;  %v700_v36 = vpop.f32.mrb[62].mxu0  ;;  %1433 = vmatprep.mubr.bf16.mxu1 %v1022_v28 }
 0x210   :  { %v701_v40 = vadd.f32 %v700_v36, %v4436_v38  ;;  %v702_v41 = vpop.f32.mrb[63].mxu0  ;;  %1434 = vmatmul.mubr.bf16.gmra.mrb[56].mxu1 %v1021_v27  ;;  %v925_v43 = vmax.f32 %v697_v31, 0.0 }
 0x211   :  { %v703_v42 = vadd.f32 %v702_v41, %v4440_v39  ;;  %v926_v45 = vmax.f32 %v699_v34, 0.0  ;;  %v4541_v41 = vld [vmem:[#allocation14 + $0x20] sm:$0xff]  }
 0x212   :  { %v927_v44 = vmax.f32 %v701_v40, 0.0  ;;  %3788 = vmatpush1.bf16.msra.mxu1 %v4541_v41 }
 0x213   :  { %v928_v46 = vmax.f32 %v703_v42, 0.0  ;;  %3773 = vmatprep.subr.bf16.mxu1 %v4228_v0 }
 0x214   :  { %v1023_v47 = vpack.c.bf16 %v927_v44, %v925_v43 }
 0x215   :  { %v1024_v48 = vpack.c.bf16 %v928_v46, %v926_v45  ;;  %v706_v49 = vpop.f32.mrb[64].mxu0 }
 0x216   :  { %v707_v50 = vadd.f32 %v706_v49, %v4436_v38  ;;  %v708_v51 = vpop.f32.mrb[65].mxu0 }
 0x217   :  { %v709_v52 = vadd.f32 %v708_v51, %v4440_v39  ;;  %v710_v53 = vpop.f32.mrb[66].mxu0  ;;  %1443 = vmatprep.mubr.bf16.mxu1 %v1024_v48 }
 0x218   :  { %v711_v54 = vadd.f32 %v710_v53, %v4436_v38  ;;  %v712_v55 = vpop.f32.mrb[67].mxu0  ;;  %1444 = vmatmul.mubr.bf16.gmra.mrb[60].mxu1 %v1023_v47  ;;  %v929_v57 = vmax.f32 %v707_v50, 0.0 }
 0x219   :  { %v713_v56 = vadd.f32 %v712_v55, %v4440_v39  ;;  %v930_v59 = vmax.f32 %v709_v52, 0.0 }
 0x21a   :  { %v931_v58 = vmax.f32 %v711_v54, 0.0 }
 0x21b   :  { %v932_v60 = vmax.f32 %v713_v56, 0.0 }
 0x21c   :  { %v1025_v61 = vpack.c.bf16 %v931_v58, %v929_v57 }
 0x21d   :  { %v1026_v62 = vpack.c.bf16 %v932_v60, %v930_v59  ;;  %v716_v63 = vpop.f32.mrb[68].mxu0 }
 0x21e   :  { %v717_v1 = vadd.f32 %v716_v63, %v4436_v38  ;;  %v718_v2 = vpop.f32.mrb[69].mxu0 }
 0x21f   :  { %v719_v3 = vadd.f32 %v718_v2, %v4440_v39  ;;  %v720_v4 = vpop.f32.mrb[70].mxu0  ;;  %1453 = vmatprep.mubr.bf16.mxu1 %v1026_v62 }
 0x220   :  { %v721_v7 = vadd.f32 %v720_v4, %v4436_v38  ;;  %v722_v8 = vpop.f32.mrb[71].mxu0  ;;  %1454 = vmatmul.mubr.bf16.gmra.mrb[64].mxu1 %v1025_v61  ;;  %v933_v10 = vmax.f32 %v717_v1, 0.0 }
 0x221   :  { %v723_v9 = vadd.f32 %v722_v8, %v4440_v39  ;;  %v934_v12 = vmax.f32 %v719_v3, 0.0 }
 0x222   :  { %v935_v11 = vmax.f32 %v721_v7, 0.0 }
 0x223   :  { %v936_v13 = vmax.f32 %v723_v9, 0.0  ;;  %v4553_v9 = vld [vmem:[#allocation14 + $0x28] sm:$0xff]  }
 0x224   :  { %v1027_v14 = vpack.c.bf16 %v935_v11, %v933_v10  ;;  %3789 = vmatpush1.bf16.msra.mxu1 %v4553_v9 }
 0x225   :  { %v1028_v15 = vpack.c.bf16 %v936_v13, %v934_v12  ;;  %v726_v16 = vpop.f32.mrb[72].mxu0  ;;  %3774 = vmatprep.subr.bf16.mxu1 %v4228_v0 }
 0x226   :  { %v727_v17 = vadd.f32 %v726_v16, %v4436_v38  ;;  %v728_v18 = vpop.f32.mrb[73].mxu0 }
 0x227   :  { %v729_v19 = vadd.f32 %v728_v18, %v4440_v39  ;;  %v730_v20 = vpop.f32.mrb[74].mxu0  ;;  %1463 = vmatprep.mubr.bf16.mxu1 %v1028_v15 }
 0x228   :  { %v731_v21 = vadd.f32 %v730_v20, %v4436_v38  ;;  %v732_v22 = vpop.f32.mrb[75].mxu0  ;;  %1464 = vmatmul.mubr.bf16.gmra.mrb[68].mxu1 %v1027_v14  ;;  %v937_v24 = vmax.f32 %v727_v17, 0.0 }
 0x229   :  { %v733_v23 = vadd.f32 %v732_v22, %v4440_v39  ;;  %v938_v26 = vmax.f32 %v729_v19, 0.0 }
 0x22a   :  { %v939_v25 = vmax.f32 %v731_v21, 0.0 }
 0x22b   :  { %v940_v27 = vmax.f32 %v733_v23, 0.0 }
 0x22c   :  { %v1029_v28 = vpack.c.bf16 %v939_v25, %v937_v24 }
 0x22d   :  { %v1030_v30 = vpack.c.bf16 %v940_v27, %v938_v26  ;;  %v736_v31 = vpop.f32.mrb[76].mxu0 }
 0x22e   :  { %v737_v32 = vadd.f32 %v736_v31, %v4436_v38  ;;  %v738_v34 = vpop.f32.mrb[77].mxu0 }
 0x22f   :  { %v739_v36 = vadd.f32 %v738_v34, %v4440_v39  ;;  %v740_v40 = vpop.f32.mrb[78].mxu0  ;;  %1473 = vmatprep.mubr.bf16.mxu1 %v1030_v30 }
 0x230   :  { %v741_v42 = vadd.f32 %v740_v40, %v4436_v38  ;;  %v742_v43 = vpop.f32.mrb[79].mxu0  ;;  %1474 = vmatmul.mubr.bf16.gmra.mrb[72].mxu1 %v1029_v28  ;;  %v941_v45 = vmax.f32 %v737_v32, 0.0 }
 0x231   :  { %v743_v44 = vadd.f32 %v742_v43, %v4440_v39  ;;  %v942_v47 = vmax.f32 %v739_v36, 0.0 }
 0x232   :  { %v943_v46 = vmax.f32 %v741_v42, 0.0 }
 0x233   :  { %v944_v48 = vmax.f32 %v743_v44, 0.0 }
 0x234   :  { %v1031_v49 = vpack.c.bf16 %v943_v46, %v941_v45  ;;  %v4565_v45 = vld [vmem:[#allocation14 + $0x30] sm:$0xff]  }
 0x235   :  { %v1032_v50 = vpack.c.bf16 %v944_v48, %v942_v47  ;;  %v746_v51 = vpop.f32.mrb[80].mxu0  ;;  %3790 = vmatpush1.bf16.msra.mxu1 %v4565_v45 }
 0x236   :  { %v747_v52 = vadd.f32 %v746_v51, %v4436_v38  ;;  %v748_v53 = vpop.f32.mrb[81].mxu0  ;;  %3775 = vmatprep.subr.bf16.mxu1 %v4228_v0 }
 0x237   :  { %v749_v54 = vadd.f32 %v748_v53, %v4440_v39  ;;  %v750_v55 = vpop.f32.mrb[82].mxu0  ;;  %1483 = vmatprep.mubr.bf16.mxu1 %v1032_v50 }
 0x238   :  { %v751_v56 = vadd.f32 %v750_v55, %v4436_v38  ;;  %v752_v57 = vpop.f32.mrb[83].mxu0  ;;  %1484 = vmatmul.mubr.bf16.gmra.mrb[76].mxu1 %v1031_v49  ;;  %v945_v59 = vmax.f32 %v747_v52, 0.0 }
 0x239   :  { %v753_v58 = vadd.f32 %v752_v57, %v4440_v39  ;;  %v946_v61 = vmax.f32 %v749_v54, 0.0 }
 0x23a   :  { %v947_v60 = vmax.f32 %v751_v56, 0.0 }
 0x23b   :  { %v948_v62 = vmax.f32 %v753_v58, 0.0 }
 0x23c   :  { %v1033_v63 = vpack.c.bf16 %v947_v60, %v945_v59 }
 0x23d   :  { %v1034_v1 = vpack.c.bf16 %v948_v62, %v946_v61  ;;  %v756_v2 = vpop.f32.mrb[84].mxu0 }
 0x23e   :  { %v757_v3 = vadd.f32 %v756_v2, %v4436_v38  ;;  %v758_v4 = vpop.f32.mrb[85].mxu0 }
 0x23f   :  { %v759_v7 = vadd.f32 %v758_v4, %v4440_v39  ;;  %v760_v8 = vpop.f32.mrb[86].mxu0  ;;  %1493 = vmatprep.mubr.bf16.mxu1 %v1034_v1 }
 0x240   :  { %v761_v10 = vadd.f32 %v760_v8, %v4436_v38  ;;  %v762_v11 = vpop.f32.mrb[87].mxu0  ;;  %1494 = vmatmul.mubr.bf16.gmra.mrb[80].mxu1 %v1033_v63  ;;  %v949_v13 = vmax.f32 %v757_v3, 0.0 }
 0x241   :  { %v763_v12 = vadd.f32 %v762_v11, %v4440_v39  ;;  %v950_v15 = vmax.f32 %v759_v7, 0.0 }
 0x242   :  { %v951_v14 = vmax.f32 %v761_v10, 0.0 }
 0x243   :  { %v952_v16 = vmax.f32 %v763_v12, 0.0 }
 0x244   :  { %v1035_v17 = vpack.c.bf16 %v951_v14, %v949_v13  ;;  %v4577_v14 = vld [vmem:[#allocation14 + $0x38] sm:$0xff]  }
 0x245   :  { %v1036_v18 = vpack.c.bf16 %v952_v16, %v950_v15  ;;  %v766_v19 = vpop.f32.mrb[88].mxu0  ;;  %3791 = vmatpush1.bf16.msra.mxu1 %v4577_v14 }
 0x246   :  { %v767_v20 = vadd.f32 %v766_v19, %v4436_v38  ;;  %v768_v21 = vpop.f32.mrb[89].mxu0  ;;  %3776 = vmatprep.subr.bf16.mxu1 %v4228_v0 }
 0x247   :  { %v769_v22 = vadd.f32 %v768_v21, %v4440_v39  ;;  %v770_v23 = vpop.f32.mrb[90].mxu0  ;;  %1503 = vmatprep.mubr.bf16.mxu1 %v1036_v18 }
 0x248   :  { %v771_v24 = vadd.f32 %v770_v23, %v4436_v38  ;;  %v772_v25 = vpop.f32.mrb[91].mxu0  ;;  %1504 = vmatmul.mubr.bf16.gmra.mrb[84].mxu1 %v1035_v17  ;;  %v953_v27 = vmax.f32 %v767_v20, 0.0 }
 0x249   :  { %v773_v26 = vadd.f32 %v772_v25, %v4440_v39  ;;  %v954_v30 = vmax.f32 %v769_v22, 0.0 }
 0x24a   :  { %v955_v28 = vmax.f32 %v771_v24, 0.0 }
 0x24b   :  { %v956_v31 = vmax.f32 %v773_v26, 0.0 }
 0x24c   :  { %v1037_v32 = vpack.c.bf16 %v955_v28, %v953_v27 }
 0x24d   :  { %v1038_v34 = vpack.c.bf16 %v956_v31, %v954_v30  ;;  %v776_v36 = vpop.f32.mrb[92].mxu0 }
 0x24e   :  { %v777_v40 = vadd.f32 %v776_v36, %v4436_v38  ;;  %v778_v42 = vpop.f32.mrb[93].mxu0 }
 0x24f   :  { %v779_v43 = vadd.f32 %v778_v42, %v4440_v39  ;;  %v780_v44 = vpop.f32.mrb[94].mxu0  ;;  %1513 = vmatprep.mubr.bf16.mxu1 %v1038_v34 }
 0x250   :  { %v781_v46 = vadd.f32 %v780_v44, %v4436_v38  ;;  %v782_v47 = vpop.f32.mrb[95].mxu0  ;;  %1514 = vmatmul.mubr.bf16.gmra.mrb[88].mxu1 %v1037_v32  ;;  %v957_v49 = vmax.f32 %v777_v40, 0.0 }
 0x251   :  { %v783_v48 = vadd.f32 %v782_v47, %v4440_v39  ;;  %v958_v51 = vmax.f32 %v779_v43, 0.0  ;;  %v1089_v47 = vld [vmem:[#allocation10] sm:$0x3] }
 0x252   :  { %v959_v50 = vmax.f32 %v781_v46, 0.0 }
 0x253   :  { %v960_v52 = vmax.f32 %v783_v48, 0.0 }
 0x254   :  { %v1039_v53 = vpack.c.bf16 %v959_v50, %v957_v49 }
 0x255   :  { %v1040_v54 = vpack.c.bf16 %v960_v52, %v958_v51  ;;  %v786_v55 = vpop.f32.mrb[96].mxu0  ;;  %v4589_v52 = vld [vmem:[#allocation14 + $0x40] sm:$0xff]  }
 0x256   :  { %v787_v56 = vadd.f32 %v786_v55, %v4436_v38  ;;  %v788_v57 = vpop.f32.mrb[97].mxu0  ;;  %v4593_v55 = vrot.slane %v1089_v47, %v4431_v33  ;;  %3792 = vmatpush1.bf16.msra.mxu1 %v4589_v52 }
 0x257   :  { %v789_v58 = vadd.f32 %v788_v57, %v4440_v39  ;;  %v790_v59 = vpop.f32.mrb[98].mxu0  ;;  %1523 = vmatprep.mubr.bf16.mxu1 %v1040_v54  ;;  %v4597_v57 = vrot.slane %v1089_v47, %v4433_v35  ;;  %3777 = vmatprep.subr.bf16.mxu1 %v4228_v0 }
 0x258   :  { %v791_v60 = vadd.f32 %v790_v59, %v4436_v38  ;;  %v792_v61 = vpop.f32.mrb[99].mxu0  ;;  %1524 = vmatmul.mubr.bf16.gmra.mrb[92].mxu1 %v1039_v53  ;;  %v961_v63 = vmax.f32 %v787_v56, 0.0 }
 0x259   :  { %v793_v62 = vadd.f32 %v792_v61, %v4440_v39  ;;  %v962_v2 = vmax.f32 %v789_v58, 0.0 }
 0x25a   :  { %v963_v1 = vmax.f32 %v791_v60, 0.0 }
 0x25b   :  { %v964_v3 = vmax.f32 %v793_v62, 0.0 }
 0x25c   :  { %v1041_v4 = vpack.c.bf16 %v963_v1, %v961_v63 }
 0x25d   :  { %v1042_v7 = vpack.c.bf16 %v964_v3, %v962_v2  ;;  %v796_v8 = vpop.f32.mrb[100].mxu0 }
 0x25e   :  { %v797_v10 = vadd.f32 %v796_v8, %v4436_v38  ;;  %v798_v11 = vpop.f32.mrb[101].mxu0 }
 0x25f   :  { %v799_v12 = vadd.f32 %v798_v11, %v4440_v39  ;;  %v800_v13 = vpop.f32.mrb[102].mxu0  ;;  %1533 = vmatprep.mubr.bf16.mxu1 %v1042_v7 }
 0x260   :  { %v801_v15 = vadd.f32 %v800_v13, %v4436_v38  ;;  %v802_v16 = vpop.f32.mrb[103].mxu0  ;;  %1534 = vmatmul.mubr.bf16.gmra.mrb[96].mxu1 %v1041_v4  ;;  %v965_v18 = vmax.f32 %v797_v10, 0.0 }
 0x261   :  { %v803_v17 = vadd.f32 %v802_v16, %v4440_v39  ;;  %v966_v20 = vmax.f32 %v799_v12, 0.0 }
 0x262   :  { %v967_v19 = vmax.f32 %v801_v15, 0.0 }
 0x263   :  { %v968_v21 = vmax.f32 %v803_v17, 0.0 }
 0x264   :  { %v1043_v22 = vpack.c.bf16 %v967_v19, %v965_v18 }
 0x265   :  { %v1044_v23 = vpack.c.bf16 %v968_v21, %v966_v20  ;;  %v806_v24 = vpop.f32.mrb[104].mxu0 }
 0x266   :  { %v807_v25 = vadd.f32 %v806_v24, %v4436_v38  ;;  %v808_v26 = vpop.f32.mrb[105].mxu0 }
 0x267   :  { %v809_v27 = vadd.f32 %v808_v26, %v4440_v39  ;;  %v810_v28 = vpop.f32.mrb[106].mxu0  ;;  %1543 = vmatprep.mubr.bf16.mxu1 %v1044_v23 }
 0x268   :  { %v811_v30 = vadd.f32 %v810_v28, %v4436_v38  ;;  %v812_v31 = vpop.f32.mrb[107].mxu0  ;;  %1544 = vmatmul.mubr.bf16.gmra.mrb[100].mxu1 %v1043_v22  ;;  %v969_v34 = vmax.f32 %v807_v25, 0.0 }
 0x269   :  { %v813_v32 = vadd.f32 %v812_v31, %v4440_v39  ;;  %v970_v40 = vmax.f32 %v809_v27, 0.0 }
 0x26a   :  { %v971_v36 = vmax.f32 %v811_v30, 0.0 }
 0x26b   :  { %v972_v42 = vmax.f32 %v813_v32, 0.0 }
 0x26c   :  { %v1045_v43 = vpack.c.bf16 %v971_v36, %v969_v34 }
 0x26d   :  { %v1046_v44 = vpack.c.bf16 %v972_v42, %v970_v40  ;;  %v816_v46 = vpop.f32.mrb[108].mxu0 }
 0x26e   :  { %v817_v48 = vadd.f32 %v816_v46, %v4436_v38  ;;  %v818_v49 = vpop.f32.mrb[109].mxu0 }
 0x26f   :  { %v819_v50 = vadd.f32 %v818_v49, %v4440_v39  ;;  %v820_v51 = vpop.f32.mrb[110].mxu0  ;;  %1553 = vmatprep.mubr.bf16.mxu1 %v1046_v44 }
 0x270   :  { %v821_v53 = vadd.f32 %v820_v51, %v4436_v38  ;;  %v822_v54 = vpop.f32.mrb[111].mxu0  ;;  %1554 = vmatmul.mubr.bf16.gmra.mrb[104].mxu1 %v1045_v43  ;;  %v973_v58 = vmax.f32 %v817_v48, 0.0 }
 0x271   :  { %v823_v56 = vadd.f32 %v822_v54, %v4440_v39  ;;  %v974_v60 = vmax.f32 %v819_v50, 0.0 }
 0x272   :  { %v975_v59 = vmax.f32 %v821_v53, 0.0 }
 0x273   :  { %v976_v61 = vmax.f32 %v823_v56, 0.0  ;;  %v1295_v62 = vpop.f32.mrb[0].mxu1  ;;  %v4615_v56 = vld [vmem:[#allocation14 + $0x48] sm:$0xff]  }
 0x274   :  { %v1047_v63 = vpack.c.bf16 %v975_v59, %v973_v58  ;;  %v1296_v1 = vadd.f32 %v1295_v62, %v4593_v55  ;;  %v1297_v2 = vpop.f32.mrb[1].mxu1  ;;  %3793 = vmatpush1.bf16.msra.mxu1 %v4615_v56 }
 0x275   :  { %v1048_v3 = vpack.c.bf16 %v976_v61, %v974_v60  ;;  %v1298_v4 = vadd.f32 %v1297_v2, %v4597_v57  ;;  %v826_v7 = vpop.f32.mrb[112].mxu0  ;;  %v1299_v8 = vpop.f32.mrb[2].mxu1  ;;  %3778 = vmatprep.subr.bf16.mxu1 %v4228_v0 }
 0x276   :  { %v827_v10 = vadd.f32 %v826_v7, %v4436_v38  ;;  %v1300_v11 = vadd.f32 %v1299_v8, %v4593_v55  ;;  %v828_v12 = vpop.f32.mrb[113].mxu0  ;;  %v1301_v13 = vpop.f32.mrb[3].mxu1  ;;  %v1614_v18 = vmax.f32 %v1296_v1, 0.0 }
 0x277   :  { %v829_v15 = vadd.f32 %v828_v12, %v4440_v39  ;;  %v1302_v16 = vadd.f32 %v1301_v13, %v4597_v57  ;;  %v830_v17 = vpop.f32.mrb[114].mxu0  ;;  %1563 = vmatprep.mubr.bf16.mxu1 %v1048_v3  ;;  %v1615_v22 = vmax.f32 %v1298_v4, 0.0 }
 0x278   :  { %v1616_v19 = vmax.f32 %v1300_v11, 0.0  ;;  %v831_v20 = vadd.f32 %v830_v17, %v4436_v38  ;;  %v832_v21 = vpop.f32.mrb[115].mxu0  ;;  %1564 = vmatmul.mubr.bf16.gmra.mrb[108].mxu1 %v1047_v63  ;;  %v977_v25 = vmax.f32 %v827_v10, 0.0 }
 0x279   :  { %v1617_v23 = vmax.f32 %v1302_v16, 0.0  ;;  %v833_v24 = vadd.f32 %v832_v21, %v4440_v39  ;;  %v978_v28 = vmax.f32 %v829_v15, 0.0 }
 0x27a   :  { %v1742_v26 = vpack.c.bf16 %v1616_v19, %v1614_v18  ;;  %v979_v27 = vmax.f32 %v831_v20, 0.0 }
 0x27b   :  { %v1743_v30 = vpack.c.bf16 %v1617_v23, %v1615_v22  ;;  %v980_v31 = vmax.f32 %v833_v24, 0.0  ;;  %v1305_v32 = vpop.f32.mrb[4].mxu1 }
 0x27c   :  { %v1049_v34 = vpack.c.bf16 %v979_v27, %v977_v25  ;;  %v1306_v36 = vadd.f32 %v1305_v32, %v4593_v55  ;;  %v1307_v40 = vpop.f32.mrb[5].mxu1 }
 0x27d   :  { %v1050_v42 = vpack.c.bf16 %v980_v31, %v978_v28  ;;  %v1308_v43 = vadd.f32 %v1307_v40, %v4597_v57  ;;  %v836_v44 = vpop.f32.mrb[116].mxu0  ;;  %v1309_v46 = vpop.f32.mrb[6].mxu1  ;;  %2042 = vmatprep.mubr.bf16.mxu0 %v1743_v30 }
 0x27e   :  { %v837_v47 = vadd.f32 %v836_v44, %v4436_v38  ;;  %v1310_v48 = vadd.f32 %v1309_v46, %v4593_v55  ;;  %v838_v49 = vpop.f32.mrb[117].mxu0  ;;  %v1311_v50 = vpop.f32.mrb[7].mxu1  ;;  %2043 = vmatmul.mubr.bf16.vlgmr.msra.gmra.mrb[128].mxu0 %v1742_v26  ;;  %v1618_v58 = vmax.f32 %v1306_v36, 0.0 }
 0x27f   :  { %v839_v51 = vadd.f32 %v838_v49, %v4440_v39  ;;  %v1312_v53 = vadd.f32 %v1311_v50, %v4597_v57  ;;  %v840_v54 = vpop.f32.mrb[118].mxu0  ;;  %1573 = vmatprep.mubr.bf16.mxu1 %v1050_v42  ;;  %2691 = vmatpush1.bf16.msra.mxu0 %v4490_v29  ;;  %v1619_v62 = vmax.f32 %v1308_v43, 0.0 }
 0x280   :  { %v1620_v59 = vmax.f32 %v1310_v48, 0.0  ;;  %v841_v60 = vadd.f32 %v840_v54, %v4436_v38  ;;  %v842_v61 = vpop.f32.mrb[119].mxu0  ;;  %1574 = vmatmul.mubr.bf16.gmra.mrb[112].mxu1 %v1049_v34  ;;  %2692 = vmatprep.subr.bf16.mxu0 %v4228_v0  ;;  %v981_v2 = vmax.f32 %v837_v47, 0.0 }
 0x281   :  { %v1621_v63 = vmax.f32 %v1312_v53, 0.0  ;;  %v843_v1 = vadd.f32 %v842_v61, %v4440_v39  ;;  %v982_v29 = vmax.f32 %v839_v51, 0.0 }
 0x282   :  { %v1744_v3 = vpack.c.bf16 %v1620_v59, %v1618_v58  ;;  %v983_v4 = vmax.f32 %v841_v60, 0.0 }
 0x283   :  { %v1745_v7 = vpack.c.bf16 %v1621_v63, %v1619_v62  ;;  %v984_v8 = vmax.f32 %v843_v1, 0.0  ;;  %v1315_v10 = vpop.f32.mrb[8].mxu1  ;;  %2693 = vmatpush1.bf16.msra.mxu0 %v4505_v5  ;;  %v4643_v63 = vld [vmem:[#allocation14 + $0x50] sm:$0xff]  }
 0x284   :  { %v1051_v11 = vpack.c.bf16 %v983_v4, %v981_v2  ;;  %v1316_v12 = vadd.f32 %v1315_v10, %v4593_v55  ;;  %v1317_v13 = vpop.f32.mrb[9].mxu1  ;;  %2694 = vmatprep.subr.bf16.mxu0 %v4228_v0  ;;  %3794 = vmatpush1.bf16.msra.mxu1 %v4643_v63 }
 0x285   :  { %v1052_v15 = vpack.c.bf16 %v984_v8, %v982_v29  ;;  %v1318_v16 = vadd.f32 %v1317_v13, %v4597_v57  ;;  %v846_v17 = vpop.f32.mrb[120].mxu0  ;;  %v1319_v18 = vpop.f32.mrb[10].mxu1  ;;  %2052 = vmatprep.mubr.bf16.mxu0 %v1745_v7  ;;  %3779 = vmatprep.subr.bf16.mxu1 %v4228_v0 }
 0x286   :  { %v847_v19 = vadd.f32 %v846_v17, %v4436_v38  ;;  %v1320_v20 = vadd.f32 %v1319_v18, %v4593_v55  ;;  %v848_v21 = vpop.f32.mrb[121].mxu0  ;;  %v1321_v22 = vpop.f32.mrb[11].mxu1  ;;  %2053 = vmatmul.mubr.bf16.gmra.mrb[132].mxu0 %v1744_v3  ;;  %v1622_v25 = vmax.f32 %v1316_v12, 0.0 }
 0x287   :  { %v849_v5 = vadd.f32 %v848_v21, %v4440_v39  ;;  %v1322_v23 = vadd.f32 %v1321_v22, %v4597_v57  ;;  %v850_v24 = vpop.f32.mrb[122].mxu0  ;;  %1583 = vmatprep.mubr.bf16.mxu1 %v1052_v15  ;;  %2695 = vmatpush1.bf16.msra.mxu0 %v4517_v37  ;;  %v1623_v30 = vmax.f32 %v1318_v16, 0.0 }
 0x288   :  { %v1624_v26 = vmax.f32 %v1320_v20, 0.0  ;;  %v851_v27 = vadd.f32 %v850_v24, %v4436_v38  ;;  %v852_v28 = vpop.f32.mrb[123].mxu0  ;;  %1584 = vmatmul.mubr.bf16.gmra.mrb[116].mxu1 %v1051_v11  ;;  %2696 = vmatprep.subr.bf16.mxu0 %v4228_v0  ;;  %v985_v34 = vmax.f32 %v847_v19, 0.0 }
 0x289   :  { %v1625_v31 = vmax.f32 %v1322_v23, 0.0  ;;  %v853_v32 = vadd.f32 %v852_v28, %v4440_v39  ;;  %v986_v42 = vmax.f32 %v849_v5, 0.0 }
 0x28a   :  { %v1746_v36 = vpack.c.bf16 %v1624_v26, %v1622_v25  ;;  %v987_v40 = vmax.f32 %v851_v27, 0.0 }
 0x28b   :  { %v1747_v43 = vpack.c.bf16 %v1625_v31, %v1623_v30  ;;  %v988_v44 = vmax.f32 %v853_v32, 0.0  ;;  %v1325_v46 = vpop.f32.mrb[12].mxu1  ;;  %2697 = vmatpush1.bf16.msra.mxu0 %v4529_v6 }
 0x28c   :  { %v1053_v37 = vpack.c.bf16 %v987_v40, %v985_v34  ;;  %v1326_v47 = vadd.f32 %v1325_v46, %v4593_v55  ;;  %v1327_v48 = vpop.f32.mrb[13].mxu1  ;;  %2698 = vmatprep.subr.bf16.mxu0 %v4228_v0 }
 0x28d   :  { %v1054_v49 = vpack.c.bf16 %v988_v44, %v986_v42  ;;  %v1328_v50 = vadd.f32 %v1327_v48, %v4597_v57  ;;  %v856_v51 = vpop.f32.mrb[124].mxu0  ;;  %v1329_v53 = vpop.f32.mrb[14].mxu1  ;;  %2062 = vmatprep.mubr.bf16.mxu0 %v1747_v43  ;;  %v3978_v42 = vld [vmem:[#allocation14 + $0x58] sm:$0xff]  }
 0x28e   :  { %v857_v54 = vadd.f32 %v856_v51, %v4436_v38  ;;  %v1330_v58 = vadd.f32 %v1329_v53, %v4593_v55  ;;  %v858_v59 = vpop.f32.mrb[125].mxu0  ;;  %v1331_v60 = vpop.f32.mrb[15].mxu1  ;;  %2063 = vmatmul.mubr.bf16.gmra.mrb[136].mxu0 %v1746_v36  ;;  %v1626_v1 = vmax.f32 %v1326_v47, 0.0  ;;  %3795 = vmatpush1.bf16.msra.mxu1 %v3978_v42 }
 0x28f   :  { %v859_v6 = vadd.f32 %v858_v59, %v4440_v39  ;;  %v1332_v61 = vadd.f32 %v1331_v60, %v4597_v57  ;;  %v860_v62 = vpop.f32.mrb[126].mxu0  ;;  %1593 = vmatprep.mubr.bf16.mxu1 %v1054_v49  ;;  %2699 = vmatpush1.bf16.msra.mxu0 %v4541_v41  ;;  %v1627_v29 = vmax.f32 %v1328_v50, 0.0 }
 0x290   :  { %v1628_v2 = vmax.f32 %v1330_v58, 0.0  ;;  %v861_v3 = vadd.f32 %v860_v62, %v4436_v38  ;;  %v862_v4 = vpop.f32.mrb[127].mxu0  ;;  %1594 = vmatmul.mubr.bf16.gmra.mrb[120].mxu1 %v1053_v37  ;;  %2700 = vmatprep.subr.bf16.mxu0 %v4228_v0  ;;  %v989_v10 = vmax.f32 %v857_v54, 0.0 }
 0x291   :  { %v1629_v7 = vmax.f32 %v1332_v61, 0.0  ;;  %v863_v8 = vadd.f32 %v862_v4, %v4440_v39  ;;  %v990_v41 = vmax.f32 %v859_v6, 0.0  ;;  %3780 = vmatprep.subr.bf16.mxu1 %v4228_v0 }
 0x292   :  { %v1748_v11 = vpack.c.bf16 %v1628_v2, %v1626_v1  ;;  %v991_v12 = vmax.f32 %v861_v3, 0.0 }
 0x293   :  { %v1749_v13 = vpack.c.bf16 %v1629_v7, %v1627_v29  ;;  %v992_v15 = vmax.f32 %v863_v8, 0.0  ;;  %v1335_v16 = vpop.f32.mrb[16].mxu1  ;;  %2701 = vmatpush1.bf16.msra.mxu0 %v4553_v9 }
 0x294   :  { %v1055_v38 = vpack.c.bf16 %v991_v12, %v989_v10  ;;  %v1336_v17 = vadd.f32 %v1335_v16, %v4593_v55  ;;  %v1337_v18 = vpop.f32.mrb[17].mxu1  ;;  %2702 = vmatprep.subr.bf16.mxu0 %v4228_v0  ;;  %v3979_v10 = vld [vmem:[#allocation14 + $0x60] sm:$0xff]  }
 0x295   :  { %v1056_v39 = vpack.c.bf16 %v992_v15, %v990_v41  ;;  %v1338_v19 = vadd.f32 %v1337_v18, %v4597_v57  ;;  %v1339_v20 = vpop.f32.mrb[18].mxu1  ;;  %2072 = vmatprep.mubr.bf16.mxu0 %v1749_v13  ;;  %3796 = vmatpush1.bf16.msra.mxu1 %v3979_v10 }
 0x296   :  { %v1340_v21 = vadd.f32 %v1339_v20, %v4593_v55  ;;  %v1341_v22 = vpop.f32.mrb[19].mxu1  ;;  %2073 = vmatmul.mubr.bf16.gmra.mrb[140].mxu0 %v1748_v11  ;;  %v1630_v9 = vmax.f32 %v1336_v17, 0.0  ;;  %3781 = vmatprep.subr.bf16.mxu1 %v4228_v0 }
 0x297   :  { %v1342_v5 = vadd.f32 %v1341_v22, %v4597_v57  ;;  %1603 = vmatprep.mubr.bf16.mxu1 %v1056_v39  ;;  %2703 = vmatpush1.bf16.msra.mxu0 %v4565_v45  ;;  %v1631_v24 = vmax.f32 %v1338_v19, 0.0 }
 0x298   :  { %v1632_v23 = vmax.f32 %v1340_v21, 0.0  ;;  %1604 = vmatmul.mubr.bf16.gmra.mrb[124].mxu1 %v1055_v38  ;;  %2704 = vmatprep.subr.bf16.mxu0 %v4228_v0 }
 0x299   :  { %v1633_v25 = vmax.f32 %v1342_v5, 0.0 }
 0x29a   :  { %v1750_v26 = vpack.c.bf16 %v1632_v23, %v1630_v9 }
 0x29b   :  { %v1751_v27 = vpack.c.bf16 %v1633_v25, %v1631_v24  ;;  %v1345_v28 = vpop.f32.mrb[20].mxu1  ;;  %2705 = vmatpush1.bf16.msra.mxu0 %v4577_v14 }
 0x29c   :  { %v1346_v30 = vadd.f32 %v1345_v28, %v4593_v55  ;;  %v1347_v31 = vpop.f32.mrb[21].mxu1  ;;  %2706 = vmatprep.subr.bf16.mxu0 %v4228_v0 }
 0x29d   :  { %v1348_v32 = vadd.f32 %v1347_v31, %v4597_v57  ;;  %v1349_v45 = vpop.f32.mrb[22].mxu1  ;;  %2082 = vmatprep.mubr.bf16.mxu0 %v1751_v27 }
 0x29e   :  { %v1350_v34 = vadd.f32 %v1349_v45, %v4593_v55  ;;  %v1351_v36 = vpop.f32.mrb[23].mxu1  ;;  %2083 = vmatmul.mubr.bf16.gmra.mrb[144].mxu0 %v1750_v26  ;;  %v1634_v43 = vmax.f32 %v1346_v30, 0.0 }
 0x29f   :  { %v1352_v40 = vadd.f32 %v1351_v36, %v4597_v57  ;;  %2707 = vmatpush1.bf16.msra.mxu0 %v4589_v52  ;;  %v1635_v44 = vmax.f32 %v1348_v32, 0.0 }
 0x2a0   :  { %v1636_v14 = vmax.f32 %v1350_v34, 0.0  ;;  %2708 = vmatprep.subr.bf16.mxu0 %v4228_v0 }
 0x2a1   :  { %v1637_v46 = vmax.f32 %v1352_v40, 0.0  ;;  %v3980_v40 = vld [vmem:[#allocation14 + $0x68] sm:$0xff]  }
 0x2a2   :  { %v1752_v37 = vpack.c.bf16 %v1636_v14, %v1634_v43  ;;  %3797 = vmatpush1.bf16.msra.mxu1 %v3980_v40 }
 0x2a3   :  { %v1753_v47 = vpack.c.bf16 %v1637_v46, %v1635_v44  ;;  %v1355_v48 = vpop.f32.mrb[24].mxu1  ;;  %2709 = vmatpush1.bf16.msra.mxu0 %v4615_v56  ;;  %3782 = vmatprep.subr.bf16.mxu1 %v4228_v0 }
 0x2a4   :  { %v1356_v49 = vadd.f32 %v1355_v48, %v4593_v55  ;;  %v1357_v50 = vpop.f32.mrb[25].mxu1  ;;  %2710 = vmatprep.subr.bf16.mxu0 %v4228_v0 }
 0x2a5   :  { %v1358_v52 = vadd.f32 %v1357_v50, %v4597_v57  ;;  %v1359_v51 = vpop.f32.mrb[26].mxu1  ;;  %2092 = vmatprep.mubr.bf16.mxu0 %v1753_v47 }
 0x2a6   :  { %v1360_v53 = vadd.f32 %v1359_v51, %v4593_v55  ;;  %v1361_v54 = vpop.f32.mrb[27].mxu1  ;;  %2093 = vmatmul.mubr.bf16.gmra.mrb[148].mxu0 %v1752_v37  ;;  %v1638_v59 = vmax.f32 %v1356_v49, 0.0 }
 0x2a7   :  { %v1362_v58 = vadd.f32 %v1361_v54, %v4597_v57  ;;  %2711 = vmatpush1.bf16.msra.mxu0 %v4643_v63  ;;  %v1639_v56 = vmax.f32 %v1358_v52, 0.0 }
 0x2a8   :  { %v1640_v60 = vmax.f32 %v1360_v53, 0.0  ;;  %2712 = vmatprep.subr.bf16.mxu0 %v4228_v0 }
 0x2a9   :  { %v1641_v6 = vmax.f32 %v1362_v58, 0.0 }
 0x2aa   :  { %v1754_v61 = vpack.c.bf16 %v1640_v60, %v1638_v59 }
 0x2ab   :  { %v1755_v62 = vpack.c.bf16 %v1641_v6, %v1639_v56  ;;  %v1365_v1 = vpop.f32.mrb[28].mxu1  ;;  %2713 = vmatpush1.bf16.msra.mxu0 %v3978_v42 }
 0x2ac   :  { %v1366_v2 = vadd.f32 %v1365_v1, %v4593_v55  ;;  %v1367_v3 = vpop.f32.mrb[29].mxu1  ;;  %2714 = vmatprep.subr.bf16.mxu0 %v4228_v0 }
 0x2ad   :  { %v1368_v4 = vadd.f32 %v1367_v3, %v4597_v57  ;;  %v1369_v29 = vpop.f32.mrb[30].mxu1  ;;  %2102 = vmatprep.mubr.bf16.mxu0 %v1755_v62 }
 0x2ae   :  { %v1370_v63 = vadd.f32 %v1369_v29, %v4593_v55  ;;  %v1371_v7 = vpop.f32.mrb[31].mxu1  ;;  %2103 = vmatmul.mubr.bf16.gmra.mrb[152].mxu0 %v1754_v61  ;;  %v1642_v11 = vmax.f32 %v1366_v2, 0.0 }
 0x2af   :  { %v1372_v8 = vadd.f32 %v1371_v7, %v4597_v57  ;;  %v1643_v41 = vmax.f32 %v1368_v4, 0.0  ;;  %2715 = vmatpush1.bf16.msra.mxu0 %v3979_v10 }
 0x2b0   :  { %v1644_v12 = vmax.f32 %v1370_v63, 0.0  ;;  %2716 = vmatprep.subr.bf16.mxu0 %v4228_v0 }
 0x2b1   :  { %v1645_v13 = vmax.f32 %v1372_v8, 0.0  ;;  %v3981_v8 = vld [vmem:[#allocation14 + $0x70] sm:$0xff]  }
 0x2b2   :  { %v1756_v15 = vpack.c.bf16 %v1644_v12, %v1642_v11  ;;  %3798 = vmatpush1.bf16.msra.mxu1 %v3981_v8 }
 0x2b3   :  { %v1757_v16 = vpack.c.bf16 %v1645_v13, %v1643_v41  ;;  %v1375_v38 = vpop.f32.mrb[32].mxu1  ;;  %2717 = vmatpush1.bf16.msra.mxu0 %v3980_v40  ;;  %3783 = vmatprep.subr.bf16.mxu1 %v4228_v0 }
 0x2b4   :  { %v1376_v17 = vadd.f32 %v1375_v38, %v4593_v55  ;;  %v1377_v18 = vpop.f32.mrb[33].mxu1  ;;  %2718 = vmatprep.subr.bf16.mxu0 %v4228_v0 }
 0x2b5   :  { %v1378_v39 = vadd.f32 %v1377_v18, %v4597_v57  ;;  %v1379_v19 = vpop.f32.mrb[34].mxu1  ;;  %2112 = vmatprep.mubr.bf16.mxu0 %v1757_v16 }
 0x2b6   :  { %v1380_v20 = vadd.f32 %v1379_v19, %v4593_v55  ;;  %v1381_v21 = vpop.f32.mrb[35].mxu1  ;;  %2113 = vmatmul.mubr.bf16.gmra.mrb[156].mxu0 %v1756_v15  ;;  %v1646_v5 = vmax.f32 %v1376_v17, 0.0 }
 0x2b7   :  { %v1382_v22 = vadd.f32 %v1381_v21, %v4597_v57  ;;  %v1647_v23 = vmax.f32 %v1378_v39, 0.0  ;;  %2719 = vmatpush1.bf16.msra.mxu0 %v3981_v8 }
 0x2b8   :  { %v1648_v9 = vmax.f32 %v1380_v20, 0.0  ;;  %2720 = vmatprep.subr.bf16.mxu0 %v4228_v0 }
 0x2b9   :  { %v1649_v24 = vmax.f32 %v1382_v22, 0.0 }
 0x2ba   :  { %v1758_v25 = vpack.c.bf16 %v1648_v9, %v1646_v5 }
 0x2bb   :  { %v1759_v26 = vpack.c.bf16 %v1649_v24, %v1647_v23  ;;  %v1385_v27 = vpop.f32.mrb[36].mxu1 }
 0x2bc   :  { %v1386_v28 = vadd.f32 %v1385_v27, %v4593_v55  ;;  %v1387_v30 = vpop.f32.mrb[37].mxu1 }
 0x2bd   :  { %v1388_v31 = vadd.f32 %v1387_v30, %v4597_v57  ;;  %v1389_v32 = vpop.f32.mrb[38].mxu1  ;;  %2122 = vmatprep.mubr.bf16.mxu0 %v1759_v26 }
 0x2be   :  { %v1390_v45 = vadd.f32 %v1389_v32, %v4593_v55  ;;  %v1391_v34 = vpop.f32.mrb[39].mxu1  ;;  %2123 = vmatmul.mubr.bf16.gmra.mrb[160].mxu0 %v1758_v25  ;;  %v1650_v42 = vmax.f32 %v1386_v28, 0.0 }
 0x2bf   :  { %v1392_v36 = vadd.f32 %v1391_v34, %v4597_v57  ;;  %v1651_v14 = vmax.f32 %v1388_v31, 0.0 }
 0x2c0   :  { %v1652_v43 = vmax.f32 %v1390_v45, 0.0 }
 0x2c1   :  { %v1653_v44 = vmax.f32 %v1392_v36, 0.0 }
 0x2c2   :  { %v1760_v46 = vpack.c.bf16 %v1652_v43, %v1650_v42  ;;  %v3982_v43 = vld [vmem:[#allocation14 + $0x78] sm:$0xff]  }
 0x2c3   :  { %v1761_v37 = vpack.c.bf16 %v1653_v44, %v1651_v14  ;;  %v1395_v47 = vpop.f32.mrb[40].mxu1  ;;  %3799 = vmatpush1.bf16.msra.mxu1 %v3982_v43  ;;  %2721 = vmatpush1.bf16.msra.mxu0 %v3982_v43 }
 0x2c4   :  { %v1396_v48 = vadd.f32 %v1395_v47, %v4593_v55  ;;  %v1397_v49 = vpop.f32.mrb[41].mxu1 }
 0x2c5   :  { %v1398_v50 = vadd.f32 %v1397_v49, %v4597_v57  ;;  %v1399_v52 = vpop.f32.mrb[42].mxu1  ;;  %2132 = vmatprep.mubr.bf16.mxu0 %v1761_v37 }
 0x2c6   :  { %v1400_v51 = vadd.f32 %v1399_v52, %v4593_v55  ;;  %v1401_v53 = vpop.f32.mrb[43].mxu1  ;;  %2133 = vmatmul.mubr.bf16.gmra.mrb[164].mxu0 %v1760_v46  ;;  %v1654_v58 = vmax.f32 %v1396_v48, 0.0 }
 0x2c7   :  { %v1402_v54 = vadd.f32 %v1401_v53, %v4597_v57  ;;  %v1655_v60 = vmax.f32 %v1398_v50, 0.0 }
 0x2c8   :  { %v1656_v59 = vmax.f32 %v1400_v51, 0.0 }
 0x2c9   :  { %v1657_v56 = vmax.f32 %v1402_v54, 0.0 }
 0x2ca   :  { %v1762_v6 = vpack.c.bf16 %v1656_v59, %v1654_v58 }
 0x2cb   :  { %v1763_v61 = vpack.c.bf16 %v1657_v56, %v1655_v60  ;;  %v1405_v62 = vpop.f32.mrb[44].mxu1 }
 0x2cc   :  { %v1406_v1 = vadd.f32 %v1405_v62, %v4593_v55  ;;  %v1407_v2 = vpop.f32.mrb[45].mxu1 }
 0x2cd   :  { %v1408_v3 = vadd.f32 %v1407_v2, %v4597_v57  ;;  %v1409_v4 = vpop.f32.mrb[46].mxu1  ;;  %2142 = vmatprep.mubr.bf16.mxu0 %v1763_v61 }
 0x2ce   :  { %v1410_v29 = vadd.f32 %v1409_v4, %v4593_v55  ;;  %v1411_v63 = vpop.f32.mrb[47].mxu1  ;;  %2143 = vmatmul.mubr.bf16.gmra.mrb[168].mxu0 %v1762_v6  ;;  %v1658_v10 = vmax.f32 %v1406_v1, 0.0 }
 0x2cf   :  { %v1412_v7 = vadd.f32 %v1411_v63, %v4597_v57  ;;  %v1659_v12 = vmax.f32 %v1408_v3, 0.0 }
 0x2d0   :  { %v1660_v11 = vmax.f32 %v1410_v29, 0.0 }
 0x2d1   :  { %v1661_v41 = vmax.f32 %v1412_v7, 0.0 }
 0x2d2   :  { %v1764_v13 = vpack.c.bf16 %v1660_v11, %v1658_v10 }
 0x2d3   :  { %v1765_v15 = vpack.c.bf16 %v1661_v41, %v1659_v12  ;;  %v1415_v16 = vpop.f32.mrb[48].mxu1 }
 0x2d4   :  { %v1416_v38 = vadd.f32 %v1415_v16, %v4593_v55  ;;  %v1417_v17 = vpop.f32.mrb[49].mxu1 }
 0x2d5   :  { %v1418_v18 = vadd.f32 %v1417_v17, %v4597_v57  ;;  %v1419_v39 = vpop.f32.mrb[50].mxu1  ;;  %2152 = vmatprep.mubr.bf16.mxu0 %v1765_v15 }
 0x2d6   :  { %v1420_v19 = vadd.f32 %v1419_v39, %v4593_v55  ;;  %v1421_v20 = vpop.f32.mrb[51].mxu1  ;;  %2153 = vmatmul.mubr.bf16.gmra.mrb[172].mxu0 %v1764_v13  ;;  %v1662_v22 = vmax.f32 %v1416_v38, 0.0 }
 0x2d7   :  { %v1422_v21 = vadd.f32 %v1421_v20, %v4597_v57  ;;  %v1663_v9 = vmax.f32 %v1418_v18, 0.0 }
 0x2d8   :  { %v1664_v5 = vmax.f32 %v1420_v19, 0.0 }
 0x2d9   :  { %v1665_v23 = vmax.f32 %v1422_v21, 0.0 }
 0x2da   :  { %v1766_v0 = vpack.c.bf16 %v1664_v5, %v1662_v22 }
 0x2db   :  { %v1767_v24 = vpack.c.bf16 %v1665_v23, %v1663_v9  ;;  %v1425_v25 = vpop.f32.mrb[52].mxu1 }
 0x2dc   :  { %v1426_v26 = vadd.f32 %v1425_v25, %v4593_v55  ;;  %v1427_v27 = vpop.f32.mrb[53].mxu1 }
 0x2dd   :  { %v1428_v28 = vadd.f32 %v1427_v27, %v4597_v57  ;;  %v1429_v30 = vpop.f32.mrb[54].mxu1  ;;  %2162 = vmatprep.mubr.bf16.mxu0 %v1767_v24 }
 0x2de   :  { %v1430_v31 = vadd.f32 %v1429_v30, %v4593_v55  ;;  %v1431_v32 = vpop.f32.mrb[55].mxu1  ;;  %2163 = vmatmul.mubr.bf16.gmra.mrb[176].mxu0 %v1766_v0  ;;  %v1666_v34 = vmax.f32 %v1426_v26, 0.0 }
 0x2df   :  { %v1432_v45 = vadd.f32 %v1431_v32, %v4597_v57  ;;  %v1667_v40 = vmax.f32 %v1428_v28, 0.0 }
 0x2e0   :  { %v1668_v36 = vmax.f32 %v1430_v31, 0.0 }
 0x2e1   :  { %v1669_v42 = vmax.f32 %v1432_v45, 0.0 }
 0x2e2   :  { %v1768_v14 = vpack.c.bf16 %v1668_v36, %v1666_v34 }
 0x2e3   :  { %v1769_v44 = vpack.c.bf16 %v1669_v42, %v1667_v40  ;;  %v1435_v46 = vpop.f32.mrb[56].mxu1 }
 0x2e4   :  { %v1436_v37 = vadd.f32 %v1435_v46, %v4593_v55  ;;  %v1437_v47 = vpop.f32.mrb[57].mxu1 }
 0x2e5   :  { %v1438_v48 = vadd.f32 %v1437_v47, %v4597_v57  ;;  %v1439_v49 = vpop.f32.mrb[58].mxu1  ;;  %2172 = vmatprep.mubr.bf16.mxu0 %v1769_v44 }
 0x2e6   :  { %v1440_v50 = vadd.f32 %v1439_v49, %v4593_v55  ;;  %v1441_v52 = vpop.f32.mrb[59].mxu1  ;;  %2173 = vmatmul.mubr.bf16.gmra.mrb[180].mxu0 %v1768_v14  ;;  %v1670_v53 = vmax.f32 %v1436_v37, 0.0 }
 0x2e7   :  { %v1442_v51 = vadd.f32 %v1441_v52, %v4597_v57  ;;  %v1671_v58 = vmax.f32 %v1438_v48, 0.0 }
 0x2e8   :  { %v1672_v54 = vmax.f32 %v1440_v50, 0.0 }
 0x2e9   :  { %v1673_v59 = vmax.f32 %v1442_v51, 0.0 }
 0x2ea   :  { %v1770_v60 = vpack.c.bf16 %v1672_v54, %v1670_v53 }
 0x2eb   :  { %v1771_v56 = vpack.c.bf16 %v1673_v59, %v1671_v58  ;;  %v1445_v6 = vpop.f32.mrb[60].mxu1 }
 0x2ec   :  { %v1446_v61 = vadd.f32 %v1445_v6, %v4593_v55  ;;  %v1447_v62 = vpop.f32.mrb[61].mxu1 }
 0x2ed   :  { %v1448_v1 = vadd.f32 %v1447_v62, %v4597_v57  ;;  %v1449_v2 = vpop.f32.mrb[62].mxu1  ;;  %2182 = vmatprep.mubr.bf16.mxu0 %v1771_v56 }
 0x2ee   :  { %v1450_v3 = vadd.f32 %v1449_v2, %v4593_v55  ;;  %v1451_v4 = vpop.f32.mrb[63].mxu1  ;;  %2183 = vmatmul.mubr.bf16.gmra.mrb[184].mxu0 %v1770_v60  ;;  %v1674_v63 = vmax.f32 %v1446_v61, 0.0 }
 0x2ef   :  { %v1452_v29 = vadd.f32 %v1451_v4, %v4597_v57  ;;  %v1675_v8 = vmax.f32 %v1448_v1, 0.0 }
 0x2f0   :  { %v1676_v7 = vmax.f32 %v1450_v3, 0.0 }
 0x2f1   :  { %v1677_v10 = vmax.f32 %v1452_v29, 0.0 }
 0x2f2   :  { %v1772_v11 = vpack.c.bf16 %v1676_v7, %v1674_v63 }
 0x2f3   :  { %v1773_v12 = vpack.c.bf16 %v1677_v10, %v1675_v8  ;;  %v1455_v41 = vpop.f32.mrb[64].mxu1 }
 0x2f4   :  { %v1456_v13 = vadd.f32 %v1455_v41, %v4593_v55  ;;  %v1457_v15 = vpop.f32.mrb[65].mxu1 }
 0x2f5   :  { %v1458_v16 = vadd.f32 %v1457_v15, %v4597_v57  ;;  %v1459_v38 = vpop.f32.mrb[66].mxu1  ;;  %2192 = vmatprep.mubr.bf16.mxu0 %v1773_v12 }
 0x2f6   :  { %v1460_v17 = vadd.f32 %v1459_v38, %v4593_v55  ;;  %v1461_v18 = vpop.f32.mrb[67].mxu1  ;;  %2193 = vmatmul.mubr.bf16.gmra.mrb[188].mxu0 %v1772_v11  ;;  %v1678_v19 = vmax.f32 %v1456_v13, 0.0 }
 0x2f7   :  { %v1462_v39 = vadd.f32 %v1461_v18, %v4597_v57  ;;  %v1679_v21 = vmax.f32 %v1458_v16, 0.0 }
 0x2f8   :  { %v1680_v20 = vmax.f32 %v1460_v17, 0.0 }
 0x2f9   :  { %v1681_v22 = vmax.f32 %v1462_v39, 0.0 }
 0x2fa   :  { %v1774_v5 = vpack.c.bf16 %v1680_v20, %v1678_v19 }
 0x2fb   :  { %v1775_v9 = vpack.c.bf16 %v1681_v22, %v1679_v21  ;;  %v1465_v23 = vpop.f32.mrb[68].mxu1 }
 0x2fc   :  { %v1466_v0 = vadd.f32 %v1465_v23, %v4593_v55  ;;  %v1467_v24 = vpop.f32.mrb[69].mxu1 }
 0x2fd   :  { %v1468_v25 = vadd.f32 %v1467_v24, %v4597_v57  ;;  %v1469_v26 = vpop.f32.mrb[70].mxu1  ;;  %2202 = vmatprep.mubr.bf16.mxu0 %v1775_v9 }
 0x2fe   :  { %v1470_v27 = vadd.f32 %v1469_v26, %v4593_v55  ;;  %v1471_v28 = vpop.f32.mrb[71].mxu1  ;;  %2203 = vmatmul.mubr.bf16.gmra.mrb[192].mxu0 %v1774_v5  ;;  %v1682_v31 = vmax.f32 %v1466_v0, 0.0 }
 0x2ff   :  { %v1472_v30 = vadd.f32 %v1471_v28, %v4597_v57  ;;  %v1683_v45 = vmax.f32 %v1468_v25, 0.0 }
 0x300   :  { %v1684_v32 = vmax.f32 %v1470_v27, 0.0 }
 0x301   :  { %v1685_v34 = vmax.f32 %v1472_v30, 0.0 }
 0x302   :  { %v1776_v36 = vpack.c.bf16 %v1684_v32, %v1682_v31 }
 0x303   :  { %v1777_v40 = vpack.c.bf16 %v1685_v34, %v1683_v45  ;;  %v1475_v42 = vpop.f32.mrb[72].mxu1 }
 0x304   :  { %v1476_v43 = vadd.f32 %v1475_v42, %v4593_v55  ;;  %v1477_v14 = vpop.f32.mrb[73].mxu1 }
 0x305   :  { %v1478_v44 = vadd.f32 %v1477_v14, %v4597_v57  ;;  %v1479_v46 = vpop.f32.mrb[74].mxu1  ;;  %2212 = vmatprep.mubr.bf16.mxu0 %v1777_v40 }
 0x306   :  { %v1480_v37 = vadd.f32 %v1479_v46, %v4593_v55  ;;  %v1481_v47 = vpop.f32.mrb[75].mxu1  ;;  %2213 = vmatmul.mubr.bf16.gmra.mrb[196].mxu0 %v1776_v36  ;;  %v1686_v49 = vmax.f32 %v1476_v43, 0.0 }
 0x307   :  { %v1482_v48 = vadd.f32 %v1481_v47, %v4597_v57  ;;  %v1687_v52 = vmax.f32 %v1478_v44, 0.0 }
 0x308   :  { %v1688_v50 = vmax.f32 %v1480_v37, 0.0 }
 0x309   :  { %v1689_v51 = vmax.f32 %v1482_v48, 0.0 }
 0x30a   :  { %v1778_v53 = vpack.c.bf16 %v1688_v50, %v1686_v49 }
 0x30b   :  { %v1779_v54 = vpack.c.bf16 %v1689_v51, %v1687_v52  ;;  %v1485_v58 = vpop.f32.mrb[76].mxu1 }
 0x30c   :  { %v1486_v59 = vadd.f32 %v1485_v58, %v4593_v55  ;;  %v1487_v60 = vpop.f32.mrb[77].mxu1 }
 0x30d   :  { %v1488_v56 = vadd.f32 %v1487_v60, %v4597_v57  ;;  %v1489_v6 = vpop.f32.mrb[78].mxu1  ;;  %2222 = vmatprep.mubr.bf16.mxu0 %v1779_v54 }
 0x30e   :  { %v1490_v61 = vadd.f32 %v1489_v6, %v4593_v55  ;;  %v1491_v62 = vpop.f32.mrb[79].mxu1  ;;  %2223 = vmatmul.mubr.bf16.gmra.mrb[200].mxu0 %v1778_v53  ;;  %v1690_v2 = vmax.f32 %v1486_v59, 0.0 }
 0x30f   :  { %v1492_v1 = vadd.f32 %v1491_v62, %v4597_v57  ;;  %v1691_v4 = vmax.f32 %v1488_v56, 0.0 }
 0x310   :  { %v1692_v3 = vmax.f32 %v1490_v61, 0.0 }
 0x311   :  { %v1693_v29 = vmax.f32 %v1492_v1, 0.0 }
 0x312   :  { %v1780_v63 = vpack.c.bf16 %v1692_v3, %v1690_v2 }
 0x313   :  { %v1781_v7 = vpack.c.bf16 %v1693_v29, %v1691_v4  ;;  %v1495_v8 = vpop.f32.mrb[80].mxu1 }
 0x314   :  { %v1496_v10 = vadd.f32 %v1495_v8, %v4593_v55  ;;  %v1497_v11 = vpop.f32.mrb[81].mxu1 }
 0x315   :  { %v1498_v12 = vadd.f32 %v1497_v11, %v4597_v57  ;;  %v1499_v41 = vpop.f32.mrb[82].mxu1  ;;  %2232 = vmatprep.mubr.bf16.mxu0 %v1781_v7 }
 0x316   :  { %v1500_v13 = vadd.f32 %v1499_v41, %v4593_v55  ;;  %v1501_v15 = vpop.f32.mrb[83].mxu1  ;;  %2233 = vmatmul.mubr.bf16.gmra.mrb[204].mxu0 %v1780_v63  ;;  %v1694_v38 = vmax.f32 %v1496_v10, 0.0 }
 0x317   :  { %v1502_v16 = vadd.f32 %v1501_v15, %v4597_v57  ;;  %v1695_v18 = vmax.f32 %v1498_v12, 0.0 }
 0x318   :  { %v1696_v17 = vmax.f32 %v1500_v13, 0.0 }
 0x319   :  { %v1697_v39 = vmax.f32 %v1502_v16, 0.0 }
 0x31a   :  { %v1782_v19 = vpack.c.bf16 %v1696_v17, %v1694_v38 }
 0x31b   :  { %v1783_v20 = vpack.c.bf16 %v1697_v39, %v1695_v18  ;;  %v1505_v21 = vpop.f32.mrb[84].mxu1 }
 0x31c   :  { %v1506_v22 = vadd.f32 %v1505_v21, %v4593_v55  ;;  %v1507_v5 = vpop.f32.mrb[85].mxu1 }
 0x31d   :  { %v1508_v9 = vadd.f32 %v1507_v5, %v4597_v57  ;;  %v1509_v23 = vpop.f32.mrb[86].mxu1  ;;  %2242 = vmatprep.mubr.bf16.mxu0 %v1783_v20 }
 0x31e   :  { %v1510_v0 = vadd.f32 %v1509_v23, %v4593_v55  ;;  %v1511_v24 = vpop.f32.mrb[87].mxu1  ;;  %2243 = vmatmul.mubr.bf16.gmra.mrb[208].mxu0 %v1782_v19  ;;  %v1698_v26 = vmax.f32 %v1506_v22, 0.0 }
 0x31f   :  { %v1512_v25 = vadd.f32 %v1511_v24, %v4597_v57  ;;  %v1699_v28 = vmax.f32 %v1508_v9, 0.0 }
 0x320   :  { %v1700_v27 = vmax.f32 %v1510_v0, 0.0 }
 0x321   :  { %v1701_v30 = vmax.f32 %v1512_v25, 0.0 }
 0x322   :  { %v1784_v31 = vpack.c.bf16 %v1700_v27, %v1698_v26 }
 0x323   :  { %v1785_v32 = vpack.c.bf16 %v1701_v30, %v1699_v28  ;;  %v1515_v45 = vpop.f32.mrb[88].mxu1 }
 0x324   :  { %v1516_v34 = vadd.f32 %v1515_v45, %v4593_v55  ;;  %v1517_v36 = vpop.f32.mrb[89].mxu1 }
 0x325   :  { %v1518_v40 = vadd.f32 %v1517_v36, %v4597_v57  ;;  %v1519_v42 = vpop.f32.mrb[90].mxu1  ;;  %2252 = vmatprep.mubr.bf16.mxu0 %v1785_v32 }
 0x326   :  { %v1520_v43 = vadd.f32 %v1519_v42, %v4593_v55  ;;  %v1521_v14 = vpop.f32.mrb[91].mxu1  ;;  %2253 = vmatmul.mubr.bf16.gmra.mrb[212].mxu0 %v1784_v31  ;;  %v1702_v46 = vmax.f32 %v1516_v34, 0.0 }
 0x327   :  { %v1522_v44 = vadd.f32 %v1521_v14, %v4597_v57  ;;  %v1703_v47 = vmax.f32 %v1518_v40, 0.0 }
 0x328   :  { %v1704_v37 = vmax.f32 %v1520_v43, 0.0 }
 0x329   :  { %v1705_v48 = vmax.f32 %v1522_v44, 0.0 }
 0x32a   :  { %v1786_v49 = vpack.c.bf16 %v1704_v37, %v1702_v46 }
 0x32b   :  { %v1787_v50 = vpack.c.bf16 %v1705_v48, %v1703_v47  ;;  %v1525_v52 = vpop.f32.mrb[92].mxu1  ;;  %v1838_v48 = vld [vmem:[#allocation13] sm:$0x3] }
 0x32c   :  { %v1526_v51 = vadd.f32 %v1525_v52, %v4593_v55  ;;  %v1527_v53 = vpop.f32.mrb[93].mxu1 }
 0x32d   :  { %v1528_v54 = vadd.f32 %v1527_v53, %v4597_v57  ;;  %v1529_v58 = vpop.f32.mrb[94].mxu1  ;;  %2262 = vmatprep.mubr.bf16.mxu0 %v1787_v50 }
 0x32e   :  { %v1530_v59 = vadd.f32 %v1529_v58, %v4593_v55  ;;  %v1531_v60 = vpop.f32.mrb[95].mxu1  ;;  %2263 = vmatmul.mubr.bf16.gmra.mrb[216].mxu0 %v1786_v49  ;;  %v1706_v6 = vmax.f32 %v1526_v51, 0.0  ;;  %v4767_v58 = vrot.slane %v1838_v48, %v4431_v33 }
 0x32f   :  { %v1532_v56 = vadd.f32 %v1531_v60, %v4597_v57  ;;  %v1707_v62 = vmax.f32 %v1528_v54, 0.0  ;;  %v4771_v60 = vrot.slane %v1838_v48, %v4433_v35 }
 0x330   :  { %v1708_v61 = vmax.f32 %v1530_v59, 0.0 }
 0x331   :  { %v1709_v1 = vmax.f32 %v1532_v56, 0.0 }
 0x332   :  { %v1788_v2 = vpack.c.bf16 %v1708_v61, %v1706_v6 }
 0x333   :  { %v1789_v3 = vpack.c.bf16 %v1709_v1, %v1707_v62  ;;  %v1535_v4 = vpop.f32.mrb[96].mxu1 }
 0x334   :  { %v1536_v29 = vadd.f32 %v1535_v4, %v4593_v55  ;;  %v1537_v63 = vpop.f32.mrb[97].mxu1 }
 0x335   :  { %v1538_v7 = vadd.f32 %v1537_v63, %v4597_v57  ;;  %v1539_v8 = vpop.f32.mrb[98].mxu1  ;;  %2272 = vmatprep.mubr.bf16.mxu0 %v1789_v3 }
 0x336   :  { %v1540_v10 = vadd.f32 %v1539_v8, %v4593_v55  ;;  %v1541_v11 = vpop.f32.mrb[99].mxu1  ;;  %2273 = vmatmul.mubr.bf16.gmra.mrb[220].mxu0 %v1788_v2  ;;  %v1710_v41 = vmax.f32 %v1536_v29, 0.0 }
 0x337   :  { %v1542_v12 = vadd.f32 %v1541_v11, %v4597_v57  ;;  %v1711_v15 = vmax.f32 %v1538_v7, 0.0 }
 0x338   :  { %v1712_v13 = vmax.f32 %v1540_v10, 0.0 }
 0x339   :  { %v1713_v16 = vmax.f32 %v1542_v12, 0.0 }
 0x33a   :  { %v1790_v38 = vpack.c.bf16 %v1712_v13, %v1710_v41 }
 0x33b   :  { %v1791_v17 = vpack.c.bf16 %v1713_v16, %v1711_v15  ;;  %v1545_v18 = vpop.f32.mrb[100].mxu1 }
 0x33c   :  { %v1546_v39 = vadd.f32 %v1545_v18, %v4593_v55  ;;  %v1547_v19 = vpop.f32.mrb[101].mxu1 }
 0x33d   :  { %v1548_v20 = vadd.f32 %v1547_v19, %v4597_v57  ;;  %v1549_v21 = vpop.f32.mrb[102].mxu1  ;;  %2282 = vmatprep.mubr.bf16.mxu0 %v1791_v17 }
 0x33e   :  { %v1550_v22 = vadd.f32 %v1549_v21, %v4593_v55  ;;  %v1551_v5 = vpop.f32.mrb[103].mxu1  ;;  %2283 = vmatmul.mubr.bf16.gmra.mrb[224].mxu0 %v1790_v38  ;;  %v1714_v23 = vmax.f32 %v1546_v39, 0.0 }
 0x33f   :  { %v1552_v9 = vadd.f32 %v1551_v5, %v4597_v57  ;;  %v1715_v24 = vmax.f32 %v1548_v20, 0.0 }
 0x340   :  { %v1716_v0 = vmax.f32 %v1550_v22, 0.0 }
 0x341   :  { %v1717_v25 = vmax.f32 %v1552_v9, 0.0 }
 0x342   :  { %v1792_v26 = vpack.c.bf16 %v1716_v0, %v1714_v23 }
 0x343   :  { %v1793_v27 = vpack.c.bf16 %v1717_v25, %v1715_v24  ;;  %v1555_v28 = vpop.f32.mrb[104].mxu1 }
 0x344   :  { %v1556_v30 = vadd.f32 %v1555_v28, %v4593_v55  ;;  %v1557_v31 = vpop.f32.mrb[105].mxu1 }
 0x345   :  { %v1558_v32 = vadd.f32 %v1557_v31, %v4597_v57  ;;  %v1559_v45 = vpop.f32.mrb[106].mxu1  ;;  %2292 = vmatprep.mubr.bf16.mxu0 %v1793_v27 }
 0x346   :  { %v1560_v34 = vadd.f32 %v1559_v45, %v4593_v55  ;;  %v1561_v36 = vpop.f32.mrb[107].mxu1  ;;  %2293 = vmatmul.mubr.bf16.gmra.mrb[228].mxu0 %v1792_v26  ;;  %v1718_v42 = vmax.f32 %v1556_v30, 0.0 }
 0x347   :  { %v1562_v40 = vadd.f32 %v1561_v36, %v4597_v57  ;;  %v1719_v14 = vmax.f32 %v1558_v32, 0.0 }
 0x348   :  { %v1720_v43 = vmax.f32 %v1560_v34, 0.0 }
 0x349   :  { %v1721_v44 = vmax.f32 %v1562_v40, 0.0 }
 0x34a   :  { %v1794_v46 = vpack.c.bf16 %v1720_v43, %v1718_v42 }
 0x34b   :  { %v1795_v37 = vpack.c.bf16 %v1721_v44, %v1719_v14  ;;  %v1565_v47 = vpop.f32.mrb[108].mxu1 }
 0x34c   :  { %v1566_v49 = vadd.f32 %v1565_v47, %v4593_v55  ;;  %v1567_v50 = vpop.f32.mrb[109].mxu1 }
 0x34d   :  { %v1568_v52 = vadd.f32 %v1567_v50, %v4597_v57  ;;  %v1569_v51 = vpop.f32.mrb[110].mxu1  ;;  %2302 = vmatprep.mubr.bf16.mxu0 %v1795_v37 }
 0x34e   :  { %v1570_v53 = vadd.f32 %v1569_v51, %v4593_v55  ;;  %v1571_v54 = vpop.f32.mrb[111].mxu1  ;;  %2303 = vmatmul.mubr.bf16.gmra.mrb[232].mxu0 %v1794_v46  ;;  %v1722_v56 = vmax.f32 %v1566_v49, 0.0 }
 0x34f   :  { %v1572_v59 = vadd.f32 %v1571_v54, %v4597_v57  ;;  %v1723_v61 = vmax.f32 %v1568_v52, 0.0 }
 0x350   :  { %v1724_v6 = vmax.f32 %v1570_v53, 0.0 }
 0x351   :  { %v1725_v62 = vmax.f32 %v1572_v59, 0.0  ;;  %v2044_v1 = vpop.f32.mrb[128].mxu0 }
 0x352   :  { %v1796_v2 = vpack.c.bf16 %v1724_v6, %v1722_v56  ;;  %v2045_v3 = vadd.f32 %v2044_v1, %v4767_v58  ;;  %v2046_v4 = vpop.f32.mrb[129].mxu0 }
 0x353   :  { %v1797_v29 = vpack.c.bf16 %v1725_v62, %v1723_v61  ;;  %v2047_v63 = vadd.f32 %v2046_v4, %v4771_v60  ;;  %v1575_v7 = vpop.f32.mrb[112].mxu1  ;;  %v2048_v33 = vpop.f32.mrb[130].mxu0 }
 0x354   :  { %v1576_v8 = vadd.f32 %v1575_v7, %v4593_v55  ;;  %v2049_v10 = vadd.f32 %v2048_v33, %v4767_v58  ;;  %v1577_v35 = vpop.f32.mrb[113].mxu1  ;;  %v2050_v11 = vpop.f32.mrb[131].mxu0  ;;  %v2363_v15 = vmax.f32 %v2045_v3, 0.0 }
 0x355   :  { %v1578_v12 = vadd.f32 %v1577_v35, %v4597_v57  ;;  %v2051_v41 = vadd.f32 %v2050_v11, %v4771_v60  ;;  %v1579_v13 = vpop.f32.mrb[114].mxu1  ;;  %2312 = vmatprep.mubr.bf16.mxu0 %v1797_v29  ;;  %v2364_v18 = vmax.f32 %v2047_v63, 0.0 }
 0x356   :  { %v2365_v16 = vmax.f32 %v2049_v10, 0.0  ;;  %v1580_v38 = vadd.f32 %v1579_v13, %v4593_v55  ;;  %v1581_v17 = vpop.f32.mrb[115].mxu1  ;;  %2313 = vmatmul.mubr.bf16.gmra.mrb[236].mxu0 %v1796_v2  ;;  %v1726_v20 = vmax.f32 %v1576_v8, 0.0 }
 0x357   :  { %v2366_v39 = vmax.f32 %v2051_v41, 0.0  ;;  %v1582_v19 = vadd.f32 %v1581_v17, %v4597_v57  ;;  %v1727_v5 = vmax.f32 %v1578_v12, 0.0 }
 0x358   :  { %v4781_v21 = vpack.c.bf16 %v2365_v16, %v2363_v15  ;;  %v1728_v22 = vmax.f32 %v1580_v38, 0.0 }
 0x359   :  { %v4783_v9 = vpack.c.bf16 %v2366_v39, %v2364_v18  ;;  %v1729_v23 = vmax.f32 %v1582_v19, 0.0  ;;  %v2054_v0 = vpop.f32.mrb[132].mxu0 }
 0x35a   :  { %v1798_v24 = vpack.c.bf16 %v1728_v22, %v1726_v20  ;;  %v2055_v25 = vadd.f32 %v2054_v0, %v4767_v58  ;;  %v2056_v26 = vpop.f32.mrb[133].mxu0 }
 0x35b   :  { %v1799_v27 = vpack.c.bf16 %v1729_v23, %v1727_v5  ;;  %v2057_v28 = vadd.f32 %v2056_v26, %v4771_v60  ;;  %v1585_v30 = vpop.f32.mrb[116].mxu1  ;;  %v2058_v31 = vpop.f32.mrb[134].mxu0 }
 0x35c   :  { %v1586_v32 = vadd.f32 %v1585_v30, %v4593_v55  ;;  %v2059_v45 = vadd.f32 %v2058_v31, %v4767_v58  ;;  %v1587_v34 = vpop.f32.mrb[117].mxu1  ;;  %v2060_v36 = vpop.f32.mrb[135].mxu0  ;;  %v2367_v14 = vmax.f32 %v2055_v25, 0.0 }
 0x35d   :  { %v1588_v40 = vadd.f32 %v1587_v34, %v4597_v57  ;;  %v2061_v42 = vadd.f32 %v2060_v36, %v4771_v60  ;;  %v1589_v43 = vpop.f32.mrb[118].mxu1  ;;  %2322 = vmatprep.mubr.bf16.mxu0 %v1799_v27  ;;  %v2368_v47 = vmax.f32 %v2057_v28, 0.0 }
 0x35e   :  { %v2369_v44 = vmax.f32 %v2059_v45, 0.0  ;;  %v1590_v46 = vadd.f32 %v1589_v43, %v4593_v55  ;;  %v1591_v37 = vpop.f32.mrb[119].mxu1  ;;  %2323 = vmatmul.mubr.bf16.gmra.mrb[240].mxu0 %v1798_v24  ;;  %v1730_v50 = vmax.f32 %v1586_v32, 0.0 }
 0x35f   :  { %v2370_v48 = vmax.f32 %v2061_v42, 0.0  ;;  %v1592_v49 = vadd.f32 %v1591_v37, %v4597_v57  ;;  %v1731_v53 = vmax.f32 %v1588_v40, 0.0 }
 0x360   :  { %v4793_v52 = vpack.c.bf16 %v2369_v44, %v2367_v14  ;;  %v1732_v51 = vmax.f32 %v1590_v46, 0.0 }
 0x361   :  { %v4795_v54 = vpack.c.bf16 %v2370_v48, %v2368_v47  ;;  %v1733_v59 = vmax.f32 %v1592_v49, 0.0  ;;  %v2064_v56 = vpop.f32.mrb[136].mxu0 }
 0x362   :  { %v1800_v6 = vpack.c.bf16 %v1732_v51, %v1730_v50  ;;  %v2065_v61 = vadd.f32 %v2064_v56, %v4767_v58  ;;  %v2066_v62 = vpop.f32.mrb[137].mxu0 }
 0x363   :  { %v1801_v1 = vpack.c.bf16 %v1733_v59, %v1731_v53  ;;  %v2067_v2 = vadd.f32 %v2066_v62, %v4771_v60  ;;  %v1595_v3 = vpop.f32.mrb[120].mxu1  ;;  %v2068_v4 = vpop.f32.mrb[138].mxu0 }
 0x364   :  { %v1596_v29 = vadd.f32 %v1595_v3, %v4593_v55  ;;  %v2069_v63 = vadd.f32 %v2068_v4, %v4767_v58  ;;  %v1597_v7 = vpop.f32.mrb[121].mxu1  ;;  %v2070_v33 = vpop.f32.mrb[139].mxu0  ;;  %v2371_v11 = vmax.f32 %v2065_v61, 0.0 }
 0x365   :  { %v1598_v8 = vadd.f32 %v1597_v7, %v4597_v57  ;;  %v2071_v10 = vadd.f32 %v2070_v33, %v4771_v60  ;;  %v1599_v35 = vpop.f32.mrb[122].mxu1  ;;  %2332 = vmatprep.mubr.bf16.mxu0 %v1801_v1  ;;  %v2372_v15 = vmax.f32 %v2067_v2, 0.0 }
 0x366   :  { %v2373_v12 = vmax.f32 %v2069_v63, 0.0  ;;  %v1600_v41 = vadd.f32 %v1599_v35, %v4593_v55  ;;  %v1601_v13 = vpop.f32.mrb[123].mxu1  ;;  %2333 = vmatmul.mubr.bf16.gmra.mrb[244].mxu0 %v1800_v6  ;;  %v1734_v17 = vmax.f32 %v1596_v29, 0.0 }
 0x367   :  { %v2374_v16 = vmax.f32 %v2071_v10, 0.0  ;;  %v1602_v38 = vadd.f32 %v1601_v13, %v4597_v57  ;;  %v1735_v19 = vmax.f32 %v1598_v8, 0.0 }
 0x368   :  { %v2495_v18 = vpack.c.bf16 %v2373_v12, %v2371_v11  ;;  %v1736_v39 = vmax.f32 %v1600_v41, 0.0 }
 0x369   :  { %v2496_v20 = vpack.c.bf16 %v2374_v16, %v2372_v15  ;;  %v1737_v22 = vmax.f32 %v1602_v38, 0.0  ;;  %v2074_v5 = vpop.f32.mrb[140].mxu0 }
 0x36a   :  { %v1802_v23 = vpack.c.bf16 %v1736_v39, %v1734_v17  ;;  %v2075_v0 = vadd.f32 %v2074_v5, %v4767_v58  ;;  %v2076_v24 = vpop.f32.mrb[141].mxu0 }
 0x36b   :  { %v1803_v25 = vpack.c.bf16 %v1737_v22, %v1735_v19  ;;  %v2077_v26 = vadd.f32 %v2076_v24, %v4771_v60  ;;  %v1605_v27 = vpop.f32.mrb[124].mxu1  ;;  %v2078_v28 = vpop.f32.mrb[142].mxu0  ;;  %2738 = vmatprep.mubr.bf16.mxu1 %v2496_v20 }
 0x36c   :  { %v1606_v30 = vadd.f32 %v1605_v27, %v4593_v55  ;;  %v2079_v31 = vadd.f32 %v2078_v28, %v4767_v58  ;;  %v1607_v32 = vpop.f32.mrb[125].mxu1  ;;  %v2080_v45 = vpop.f32.mrb[143].mxu0  ;;  %2739 = vmatmul.mubr.bf16.vlgmr.msra.gmra.mrb[128].mxu1 %v2495_v18  ;;  %v2375_v42 = vmax.f32 %v2075_v0, 0.0 }
 0x36d   :  { %v1608_v34 = vadd.f32 %v1607_v32, %v4597_v57  ;;  %v2081_v36 = vadd.f32 %v2080_v45, %v4771_v60  ;;  %v1609_v40 = vpop.f32.mrb[126].mxu1  ;;  %2342 = vmatprep.mubr.bf16.mxu0 %v1803_v25  ;;  %v2376_v46 = vmax.f32 %v2077_v26, 0.0 }
 0x36e   :  { %v2377_v43 = vmax.f32 %v2079_v31, 0.0  ;;  %v1610_v14 = vadd.f32 %v1609_v40, %v4593_v55  ;;  %v1611_v44 = vpop.f32.mrb[127].mxu1  ;;  %2343 = vmatmul.mubr.bf16.gmra.mrb[248].mxu0 %v1802_v23  ;;  %v1738_v48 = vmax.f32 %v1606_v30, 0.0 }
 0x36f   :  { %v2378_v37 = vmax.f32 %v2081_v36, 0.0  ;;  %v1612_v47 = vadd.f32 %v1611_v44, %v4597_v57  ;;  %v1739_v51 = vmax.f32 %v1608_v34, 0.0 }
 0x370   :  { %v2497_v49 = vpack.c.bf16 %v2377_v43, %v2375_v42  ;;  %v1740_v50 = vmax.f32 %v1610_v14, 0.0 }
 0x371   :  { %v2498_v53 = vpack.c.bf16 %v2378_v37, %v2376_v46  ;;  %v1741_v59 = vmax.f32 %v1612_v47, 0.0  ;;  %v2084_v56 = vpop.f32.mrb[144].mxu0 }
 0x372   :  { %v1804_v6 = vpack.c.bf16 %v1740_v50, %v1738_v48  ;;  %v2085_v61 = vadd.f32 %v2084_v56, %v4767_v58  ;;  %v2086_v62 = vpop.f32.mrb[145].mxu0 }
 0x373   :  { %v1805_v1 = vpack.c.bf16 %v1741_v59, %v1739_v51  ;;  %v2087_v55 = vadd.f32 %v2086_v62, %v4771_v60  ;;  %v2088_v2 = vpop.f32.mrb[146].mxu0  ;;  %2746 = vmatprep.mubr.bf16.mxu1 %v2498_v53 }
 0x374   :  { %v2089_v3 = vadd.f32 %v2088_v2, %v4767_v58  ;;  %v2090_v4 = vpop.f32.mrb[147].mxu0  ;;  %2747 = vmatmul.mubr.bf16.gmra.mrb[132].mxu1 %v2497_v49  ;;  %v2379_v29 = vmax.f32 %v2085_v61, 0.0 }
 0x375   :  { %v2091_v57 = vadd.f32 %v2090_v4, %v4771_v60  ;;  %2352 = vmatprep.mubr.bf16.mxu0 %v1805_v1  ;;  %v2380_v7 = vmax.f32 %v2087_v55, 0.0 }
 0x376   :  { %v2381_v63 = vmax.f32 %v2089_v3, 0.0  ;;  %2353 = vmatmul.mubr.bf16.gmra.mrb[252].mxu0 %v1804_v6 }
 0x377   :  { %v2382_v33 = vmax.f32 %v2091_v57, 0.0  ;;  %2722 = vmatprep.mubr.bf16.mxu0 %v4783_v9 }
 0x378   :  { %v2499_v8 = vpack.c.bf16 %v2381_v63, %v2379_v29 }
 0x379   :  { %v2500_v10 = vpack.c.bf16 %v2382_v33, %v2380_v7  ;;  %v2094_v35 = vpop.f32.mrb[148].mxu0 }
 0x37a   :  { %v2095_v11 = vadd.f32 %v2094_v35, %v4767_v58  ;;  %v2096_v12 = vpop.f32.mrb[149].mxu0 }
 0x37b   :  { %v2097_v41 = vadd.f32 %v2096_v12, %v4771_v60  ;;  %v2098_v13 = vpop.f32.mrb[150].mxu0  ;;  %2754 = vmatprep.mubr.bf16.mxu1 %v2500_v10 }
 0x37c   :  { %v2099_v15 = vadd.f32 %v2098_v13, %v4767_v58  ;;  %v2100_v16 = vpop.f32.mrb[151].mxu0  ;;  %2755 = vmatmul.mubr.bf16.gmra.mrb[136].mxu1 %v2499_v8  ;;  %v2383_v17 = vmax.f32 %v2095_v11, 0.0 }
 0x37d   :  { %v2101_v38 = vadd.f32 %v2100_v16, %v4771_v60  ;;  %v2384_v9 = vmax.f32 %v2097_v41, 0.0 }
 0x37e   :  { %v2385_v18 = vmax.f32 %v2099_v15, 0.0  ;;  %2723 = vmatmul.mubr.bf16.vlgmr.msra.gmra.mrb[0].mxu0 %v4781_v21 }
 0x37f   :  { %v2386_v39 = vmax.f32 %v2101_v38, 0.0  ;;  %2730 = vmatprep.mubr.bf16.mxu0 %v4795_v54 }
 0x380   :  { %v2501_v19 = vpack.c.bf16 %v2385_v18, %v2383_v17 }
 0x381   :  { %v2502_v20 = vpack.c.bf16 %v2386_v39, %v2384_v9  ;;  %v2104_v22 = vpop.f32.mrb[152].mxu0 }
 0x382   :  { %v2105_v5 = vadd.f32 %v2104_v22, %v4767_v58  ;;  %v2106_v23 = vpop.f32.mrb[153].mxu0 }
 0x383   :  { %v2107_v0 = vadd.f32 %v2106_v23, %v4771_v60  ;;  %v2108_v24 = vpop.f32.mrb[154].mxu0  ;;  %2762 = vmatprep.mubr.bf16.mxu1 %v2502_v20 }
 0x384   :  { %v2109_v25 = vadd.f32 %v2108_v24, %v4767_v58  ;;  %v2110_v26 = vpop.f32.mrb[155].mxu0  ;;  %2763 = vmatmul.mubr.bf16.gmra.mrb[140].mxu1 %v2501_v19  ;;  %v2387_v27 = vmax.f32 %v2105_v5, 0.0 }
 0x385   :  { %v2111_v21 = vadd.f32 %v2110_v26, %v4771_v60  ;;  %v2388_v54 = vmax.f32 %v2107_v0, 0.0 }
 0x386   :  { %v2389_v28 = vmax.f32 %v2109_v25, 0.0  ;;  %2731 = vmatmul.mubr.bf16.gmra.mrb[4].mxu0 %v4793_v52 }
 0x387   :  { %v2390_v30 = vmax.f32 %v2111_v21, 0.0 }
 0x388   :  { %v2503_v31 = vpack.c.bf16 %v2389_v28, %v2387_v27 }
 0x389   :  { %v2504_v32 = vpack.c.bf16 %v2390_v30, %v2388_v54  ;;  %v2114_v45 = vpop.f32.mrb[156].mxu0 }
 0x38a   :  { %v2115_v34 = vadd.f32 %v2114_v45, %v4767_v58  ;;  %v2116_v36 = vpop.f32.mrb[157].mxu0 }
 0x38b   :  { %v2117_v40 = vadd.f32 %v2116_v36, %v4771_v60  ;;  %v2118_v42 = vpop.f32.mrb[158].mxu0  ;;  %2770 = vmatprep.mubr.bf16.mxu1 %v2504_v32 }
 0x38c   :  { %v2119_v43 = vadd.f32 %v2118_v42, %v4767_v58  ;;  %v2120_v14 = vpop.f32.mrb[159].mxu0  ;;  %2771 = vmatmul.mubr.bf16.gmra.mrb[144].mxu1 %v2503_v31  ;;  %v2391_v46 = vmax.f32 %v2115_v34, 0.0 }
 0x38d   :  { %v2121_v44 = vadd.f32 %v2120_v14, %v4771_v60  ;;  %v2392_v37 = vmax.f32 %v2117_v40, 0.0 }
 0x38e   :  { %v2393_v52 = vmax.f32 %v2119_v43, 0.0 }
 0x38f   :  { %v2394_v47 = vmax.f32 %v2121_v44, 0.0 }
 0x390   :  { %v2505_v48 = vpack.c.bf16 %v2393_v52, %v2391_v46 }
 0x391   :  { %v2506_v49 = vpack.c.bf16 %v2394_v47, %v2392_v37  ;;  %v2124_v50 = vpop.f32.mrb[160].mxu0 }
 0x392   :  { %v2125_v51 = vadd.f32 %v2124_v50, %v4767_v58  ;;  %v2126_v53 = vpop.f32.mrb[161].mxu0 }
 0x393   :  { %v2127_v59 = vadd.f32 %v2126_v53, %v4771_v60  ;;  %v2128_v56 = vpop.f32.mrb[162].mxu0  ;;  %2778 = vmatprep.mubr.bf16.mxu1 %v2506_v49 }
 0x394   :  { %v2129_v6 = vadd.f32 %v2128_v56, %v4767_v58  ;;  %v2130_v61 = vpop.f32.mrb[163].mxu0  ;;  %2779 = vmatmul.mubr.bf16.gmra.mrb[148].mxu1 %v2505_v48  ;;  %v2395_v1 = vmax.f32 %v2125_v51, 0.0 }
 0x395   :  { %v2131_v62 = vadd.f32 %v2130_v61, %v4771_v60  ;;  %v2396_v2 = vmax.f32 %v2127_v59, 0.0 }
 0x396   :  { %v2397_v55 = vmax.f32 %v2129_v6, 0.0 }
 0x397   :  { %v2398_v3 = vmax.f32 %v2131_v62, 0.0 }
 0x398   :  { %v2507_v4 = vpack.c.bf16 %v2397_v55, %v2395_v1 }
 0x399   :  { %v2508_v57 = vpack.c.bf16 %v2398_v3, %v2396_v2  ;;  %v2134_v29 = vpop.f32.mrb[164].mxu0 }
 0x39a   :  { %v2135_v63 = vadd.f32 %v2134_v29, %v4767_v58  ;;  %v2136_v7 = vpop.f32.mrb[165].mxu0 }
 0x39b   :  { %v2137_v33 = vadd.f32 %v2136_v7, %v4771_v60  ;;  %v2138_v8 = vpop.f32.mrb[166].mxu0  ;;  %2786 = vmatprep.mubr.bf16.mxu1 %v2508_v57 }
 0x39c   :  { %v2139_v10 = vadd.f32 %v2138_v8, %v4767_v58  ;;  %v2140_v35 = vpop.f32.mrb[167].mxu0  ;;  %2787 = vmatmul.mubr.bf16.gmra.mrb[152].mxu1 %v2507_v4  ;;  %v2399_v12 = vmax.f32 %v2135_v63, 0.0 }
 0x39d   :  { %v2141_v11 = vadd.f32 %v2140_v35, %v4771_v60  ;;  %v2400_v13 = vmax.f32 %v2137_v33, 0.0 }
 0x39e   :  { %v2401_v41 = vmax.f32 %v2139_v10, 0.0 }
 0x39f   :  { %v2402_v15 = vmax.f32 %v2141_v11, 0.0 }
 0x3a0   :  { %v2509_v16 = vpack.c.bf16 %v2401_v41, %v2399_v12 }
 0x3a1   :  { %v2510_v38 = vpack.c.bf16 %v2402_v15, %v2400_v13  ;;  %v2144_v17 = vpop.f32.mrb[168].mxu0 }
 0x3a2   :  { %v2145_v18 = vadd.f32 %v2144_v17, %v4767_v58  ;;  %v2146_v9 = vpop.f32.mrb[169].mxu0 }
 0x3a3   :  { %v2147_v39 = vadd.f32 %v2146_v9, %v4771_v60  ;;  %v2148_v19 = vpop.f32.mrb[170].mxu0  ;;  %2794 = vmatprep.mubr.bf16.mxu1 %v2510_v38 }
 0x3a4   :  { %v2149_v20 = vadd.f32 %v2148_v19, %v4767_v58  ;;  %v2150_v22 = vpop.f32.mrb[171].mxu0  ;;  %2795 = vmatmul.mubr.bf16.gmra.mrb[156].mxu1 %v2509_v16  ;;  %v2403_v23 = vmax.f32 %v2145_v18, 0.0 }
 0x3a5   :  { %v2151_v5 = vadd.f32 %v2150_v22, %v4771_v60  ;;  %v2404_v24 = vmax.f32 %v2147_v39, 0.0 }
 0x3a6   :  { %v2405_v0 = vmax.f32 %v2149_v20, 0.0 }
 0x3a7   :  { %v2406_v25 = vmax.f32 %v2151_v5, 0.0 }
 0x3a8   :  { %v2511_v26 = vpack.c.bf16 %v2405_v0, %v2403_v23 }
 0x3a9   :  { %v2512_v21 = vpack.c.bf16 %v2406_v25, %v2404_v24  ;;  %v2154_v27 = vpop.f32.mrb[172].mxu0 }
 0x3aa   :  { %v2155_v28 = vadd.f32 %v2154_v27, %v4767_v58  ;;  %v2156_v54 = vpop.f32.mrb[173].mxu0 }
 0x3ab   :  { %v2157_v30 = vadd.f32 %v2156_v54, %v4771_v60  ;;  %v2158_v31 = vpop.f32.mrb[174].mxu0  ;;  %2802 = vmatprep.mubr.bf16.mxu1 %v2512_v21 }
 0x3ac   :  { %v2159_v32 = vadd.f32 %v2158_v31, %v4767_v58  ;;  %v2160_v45 = vpop.f32.mrb[175].mxu0  ;;  %2803 = vmatmul.mubr.bf16.gmra.mrb[160].mxu1 %v2511_v26  ;;  %v2407_v36 = vmax.f32 %v2155_v28, 0.0 }
 0x3ad   :  { %v2161_v34 = vadd.f32 %v2160_v45, %v4771_v60  ;;  %v2408_v42 = vmax.f32 %v2157_v30, 0.0 }
 0x3ae   :  { %v2409_v40 = vmax.f32 %v2159_v32, 0.0 }
 0x3af   :  { %v2410_v43 = vmax.f32 %v2161_v34, 0.0 }
 0x3b0   :  { %v2513_v14 = vpack.c.bf16 %v2409_v40, %v2407_v36 }
 0x3b1   :  { %v2514_v44 = vpack.c.bf16 %v2410_v43, %v2408_v42  ;;  %v2164_v46 = vpop.f32.mrb[176].mxu0 }
 0x3b2   :  { %v2165_v52 = vadd.f32 %v2164_v46, %v4767_v58  ;;  %v2166_v37 = vpop.f32.mrb[177].mxu0 }
 0x3b3   :  { %v2167_v47 = vadd.f32 %v2166_v37, %v4771_v60  ;;  %v2168_v48 = vpop.f32.mrb[178].mxu0  ;;  %2810 = vmatprep.mubr.bf16.mxu1 %v2514_v44 }
 0x3b4   :  { %v2169_v49 = vadd.f32 %v2168_v48, %v4767_v58  ;;  %v2170_v50 = vpop.f32.mrb[179].mxu0  ;;  %2811 = vmatmul.mubr.bf16.gmra.mrb[164].mxu1 %v2513_v14  ;;  %v2411_v53 = vmax.f32 %v2165_v52, 0.0 }
 0x3b5   :  { %v2171_v51 = vadd.f32 %v2170_v50, %v4771_v60  ;;  %v2412_v56 = vmax.f32 %v2167_v47, 0.0 }
 0x3b6   :  { %v2413_v59 = vmax.f32 %v2169_v49, 0.0 }
 0x3b7   :  { %v2414_v6 = vmax.f32 %v2171_v51, 0.0 }
 0x3b8   :  { %v2515_v61 = vpack.c.bf16 %v2413_v59, %v2411_v53 }
 0x3b9   :  { %v2516_v62 = vpack.c.bf16 %v2414_v6, %v2412_v56  ;;  %v2174_v1 = vpop.f32.mrb[180].mxu0 }
 0x3ba   :  { %v2175_v55 = vadd.f32 %v2174_v1, %v4767_v58  ;;  %v2176_v2 = vpop.f32.mrb[181].mxu0 }
 0x3bb   :  { %v2177_v3 = vadd.f32 %v2176_v2, %v4771_v60  ;;  %v2178_v4 = vpop.f32.mrb[182].mxu0  ;;  %2818 = vmatprep.mubr.bf16.mxu1 %v2516_v62 }
 0x3bc   :  { %v2179_v57 = vadd.f32 %v2178_v4, %v4767_v58  ;;  %v2180_v29 = vpop.f32.mrb[183].mxu0  ;;  %2819 = vmatmul.mubr.bf16.gmra.mrb[168].mxu1 %v2515_v61  ;;  %v2415_v7 = vmax.f32 %v2175_v55, 0.0 }
 0x3bd   :  { %v2181_v63 = vadd.f32 %v2180_v29, %v4771_v60  ;;  %v2416_v8 = vmax.f32 %v2177_v3, 0.0 }
 0x3be   :  { %v2417_v33 = vmax.f32 %v2179_v57, 0.0 }
 0x3bf   :  { %v2418_v10 = vmax.f32 %v2181_v63, 0.0 }
 0x3c0   :  { %v2517_v35 = vpack.c.bf16 %v2417_v33, %v2415_v7 }
 0x3c1   :  { %v2518_v11 = vpack.c.bf16 %v2418_v10, %v2416_v8  ;;  %v2184_v12 = vpop.f32.mrb[184].mxu0 }
 0x3c2   :  { %v2185_v41 = vadd.f32 %v2184_v12, %v4767_v58  ;;  %v2186_v13 = vpop.f32.mrb[185].mxu0 }
 0x3c3   :  { %v2187_v15 = vadd.f32 %v2186_v13, %v4771_v60  ;;  %v2188_v16 = vpop.f32.mrb[186].mxu0  ;;  %2826 = vmatprep.mubr.bf16.mxu1 %v2518_v11 }
 0x3c4   :  { %v2189_v38 = vadd.f32 %v2188_v16, %v4767_v58  ;;  %v2190_v17 = vpop.f32.mrb[187].mxu0  ;;  %2827 = vmatmul.mubr.bf16.gmra.mrb[172].mxu1 %v2517_v35  ;;  %v2419_v9 = vmax.f32 %v2185_v41, 0.0 }
 0x3c5   :  { %v2191_v18 = vadd.f32 %v2190_v17, %v4771_v60  ;;  %v2420_v19 = vmax.f32 %v2187_v15, 0.0 }
 0x3c6   :  { %v2421_v39 = vmax.f32 %v2189_v38, 0.0 }
 0x3c7   :  { %v2422_v20 = vmax.f32 %v2191_v18, 0.0 }
 0x3c8   :  { %v2519_v22 = vpack.c.bf16 %v2421_v39, %v2419_v9 }
 0x3c9   :  { %v2520_v5 = vpack.c.bf16 %v2422_v20, %v2420_v19  ;;  %v2194_v23 = vpop.f32.mrb[188].mxu0 }
 0x3ca   :  { %v2195_v0 = vadd.f32 %v2194_v23, %v4767_v58  ;;  %v2196_v24 = vpop.f32.mrb[189].mxu0 }
 0x3cb   :  { %v2197_v25 = vadd.f32 %v2196_v24, %v4771_v60  ;;  %v2198_v26 = vpop.f32.mrb[190].mxu0  ;;  %2834 = vmatprep.mubr.bf16.mxu1 %v2520_v5 }
 0x3cc   :  { %v2199_v21 = vadd.f32 %v2198_v26, %v4767_v58  ;;  %v2200_v27 = vpop.f32.mrb[191].mxu0  ;;  %2835 = vmatmul.mubr.bf16.gmra.mrb[176].mxu1 %v2519_v22  ;;  %v2423_v54 = vmax.f32 %v2195_v0, 0.0 }
 0x3cd   :  { %v2201_v28 = vadd.f32 %v2200_v27, %v4771_v60  ;;  %v2424_v31 = vmax.f32 %v2197_v25, 0.0 }
 0x3ce   :  { %v2425_v30 = vmax.f32 %v2199_v21, 0.0 }
 0x3cf   :  { %v2426_v32 = vmax.f32 %v2201_v28, 0.0 }
 0x3d0   :  { %v2521_v45 = vpack.c.bf16 %v2425_v30, %v2423_v54 }
 0x3d1   :  { %v2522_v34 = vpack.c.bf16 %v2426_v32, %v2424_v31  ;;  %v2204_v36 = vpop.f32.mrb[192].mxu0 }
 0x3d2   :  { %v2205_v40 = vadd.f32 %v2204_v36, %v4767_v58  ;;  %v2206_v42 = vpop.f32.mrb[193].mxu0 }
 0x3d3   :  { %v2207_v43 = vadd.f32 %v2206_v42, %v4771_v60  ;;  %v2208_v14 = vpop.f32.mrb[194].mxu0  ;;  %2842 = vmatprep.mubr.bf16.mxu1 %v2522_v34 }
 0x3d4   :  { %v2209_v44 = vadd.f32 %v2208_v14, %v4767_v58  ;;  %v2210_v46 = vpop.f32.mrb[195].mxu0  ;;  %2843 = vmatmul.mubr.bf16.gmra.mrb[180].mxu1 %v2521_v45  ;;  %v2427_v37 = vmax.f32 %v2205_v40, 0.0 }
 0x3d5   :  { %v2211_v52 = vadd.f32 %v2210_v46, %v4771_v60  ;;  %v2428_v48 = vmax.f32 %v2207_v43, 0.0 }
 0x3d6   :  { %v2429_v47 = vmax.f32 %v2209_v44, 0.0 }
 0x3d7   :  { %v2430_v49 = vmax.f32 %v2211_v52, 0.0 }
 0x3d8   :  { %v2523_v50 = vpack.c.bf16 %v2429_v47, %v2427_v37 }
 0x3d9   :  { %v2524_v51 = vpack.c.bf16 %v2430_v49, %v2428_v48  ;;  %v2214_v53 = vpop.f32.mrb[196].mxu0 }
 0x3da   :  { %v2215_v59 = vadd.f32 %v2214_v53, %v4767_v58  ;;  %v2216_v56 = vpop.f32.mrb[197].mxu0 }
 0x3db   :  { %v2217_v6 = vadd.f32 %v2216_v56, %v4771_v60  ;;  %v2218_v61 = vpop.f32.mrb[198].mxu0  ;;  %2850 = vmatprep.mubr.bf16.mxu1 %v2524_v51 }
 0x3dc   :  { %v2219_v62 = vadd.f32 %v2218_v61, %v4767_v58  ;;  %v2220_v1 = vpop.f32.mrb[199].mxu0  ;;  %2851 = vmatmul.mubr.bf16.gmra.mrb[184].mxu1 %v2523_v50  ;;  %v2431_v2 = vmax.f32 %v2215_v59, 0.0 }
 0x3dd   :  { %v2221_v55 = vadd.f32 %v2220_v1, %v4771_v60  ;;  %v2432_v4 = vmax.f32 %v2217_v6, 0.0 }
 0x3de   :  { %v2433_v3 = vmax.f32 %v2219_v62, 0.0 }
 0x3df   :  { %v2434_v57 = vmax.f32 %v2221_v55, 0.0 }
 0x3e0   :  { %v2525_v29 = vpack.c.bf16 %v2433_v3, %v2431_v2 }
 0x3e1   :  { %v2526_v63 = vpack.c.bf16 %v2434_v57, %v2432_v4  ;;  %v2224_v7 = vpop.f32.mrb[200].mxu0 }
 0x3e2   :  { %v2225_v33 = vadd.f32 %v2224_v7, %v4767_v58  ;;  %v2226_v8 = vpop.f32.mrb[201].mxu0 }
 0x3e3   :  { %v2227_v10 = vadd.f32 %v2226_v8, %v4771_v60  ;;  %v2228_v35 = vpop.f32.mrb[202].mxu0  ;;  %2858 = vmatprep.mubr.bf16.mxu1 %v2526_v63 }
 0x3e4   :  { %v2229_v11 = vadd.f32 %v2228_v35, %v4767_v58  ;;  %v2230_v12 = vpop.f32.mrb[203].mxu0  ;;  %2859 = vmatmul.mubr.bf16.gmra.mrb[188].mxu1 %v2525_v29  ;;  %v2435_v13 = vmax.f32 %v2225_v33, 0.0 }
 0x3e5   :  { %v2231_v41 = vadd.f32 %v2230_v12, %v4771_v60  ;;  %v2436_v16 = vmax.f32 %v2227_v10, 0.0 }
 0x3e6   :  { %v2437_v15 = vmax.f32 %v2229_v11, 0.0 }
 0x3e7   :  { %v2438_v38 = vmax.f32 %v2231_v41, 0.0 }
 0x3e8   :  { %v2527_v17 = vpack.c.bf16 %v2437_v15, %v2435_v13 }
 0x3e9   :  { %v2528_v18 = vpack.c.bf16 %v2438_v38, %v2436_v16  ;;  %v2234_v9 = vpop.f32.mrb[204].mxu0 }
 0x3ea   :  { %v2235_v39 = vadd.f32 %v2234_v9, %v4767_v58  ;;  %v2236_v19 = vpop.f32.mrb[205].mxu0 }
 0x3eb   :  { %v2237_v20 = vadd.f32 %v2236_v19, %v4771_v60  ;;  %v2238_v22 = vpop.f32.mrb[206].mxu0  ;;  %2866 = vmatprep.mubr.bf16.mxu1 %v2528_v18 }
 0x3ec   :  { %v2239_v5 = vadd.f32 %v2238_v22, %v4767_v58  ;;  %v2240_v23 = vpop.f32.mrb[207].mxu0  ;;  %2867 = vmatmul.mubr.bf16.gmra.mrb[192].mxu1 %v2527_v17  ;;  %v2439_v24 = vmax.f32 %v2235_v39, 0.0 }
 0x3ed   :  { %v2241_v0 = vadd.f32 %v2240_v23, %v4771_v60  ;;  %v2440_v26 = vmax.f32 %v2237_v20, 0.0 }
 0x3ee   :  { %v2441_v25 = vmax.f32 %v2239_v5, 0.0 }
 0x3ef   :  { %v2442_v21 = vmax.f32 %v2241_v0, 0.0 }
 0x3f0   :  { %v2529_v27 = vpack.c.bf16 %v2441_v25, %v2439_v24 }
 0x3f1   :  { %v2530_v28 = vpack.c.bf16 %v2442_v21, %v2440_v26  ;;  %v2244_v54 = vpop.f32.mrb[208].mxu0 }
 0x3f2   :  { %v2245_v30 = vadd.f32 %v2244_v54, %v4767_v58  ;;  %v2246_v31 = vpop.f32.mrb[209].mxu0 }
 0x3f3   :  { %v2247_v32 = vadd.f32 %v2246_v31, %v4771_v60  ;;  %v2248_v45 = vpop.f32.mrb[210].mxu0  ;;  %2874 = vmatprep.mubr.bf16.mxu1 %v2530_v28 }
 0x3f4   :  { %v2249_v34 = vadd.f32 %v2248_v45, %v4767_v58  ;;  %v2250_v36 = vpop.f32.mrb[211].mxu0  ;;  %2875 = vmatmul.mubr.bf16.gmra.mrb[196].mxu1 %v2529_v27  ;;  %v2443_v42 = vmax.f32 %v2245_v30, 0.0 }
 0x3f5   :  { %v2251_v40 = vadd.f32 %v2250_v36, %v4771_v60  ;;  %v2444_v14 = vmax.f32 %v2247_v32, 0.0 }
 0x3f6   :  { %v2445_v43 = vmax.f32 %v2249_v34, 0.0 }
 0x3f7   :  { %v2446_v44 = vmax.f32 %v2251_v40, 0.0 }
 0x3f8   :  { %v2531_v46 = vpack.c.bf16 %v2445_v43, %v2443_v42 }
 0x3f9   :  { %v2532_v52 = vpack.c.bf16 %v2446_v44, %v2444_v14  ;;  %v2254_v37 = vpop.f32.mrb[212].mxu0 }
 0x3fa   :  { %v2255_v47 = vadd.f32 %v2254_v37, %v4767_v58  ;;  %v2256_v48 = vpop.f32.mrb[213].mxu0 }
 0x3fb   :  { %v2257_v49 = vadd.f32 %v2256_v48, %v4771_v60  ;;  %v2258_v50 = vpop.f32.mrb[214].mxu0  ;;  %2882 = vmatprep.mubr.bf16.mxu1 %v2532_v52 }
 0x3fc   :  { %v2259_v51 = vadd.f32 %v2258_v50, %v4767_v58  ;;  %v2260_v53 = vpop.f32.mrb[215].mxu0  ;;  %2883 = vmatmul.mubr.bf16.gmra.mrb[200].mxu1 %v2531_v46  ;;  %v2447_v56 = vmax.f32 %v2255_v47, 0.0 }
 0x3fd   :  { %v2261_v59 = vadd.f32 %v2260_v53, %v4771_v60  ;;  %v2448_v61 = vmax.f32 %v2257_v49, 0.0 }
 0x3fe   :  { %v2449_v6 = vmax.f32 %v2259_v51, 0.0 }
 0x3ff   :  { %v2450_v62 = vmax.f32 %v2261_v59, 0.0 }
 0x400   :  { %v2533_v1 = vpack.c.bf16 %v2449_v6, %v2447_v56 }
 0x401   :  { %v2534_v55 = vpack.c.bf16 %v2450_v62, %v2448_v61  ;;  %v2264_v2 = vpop.f32.mrb[216].mxu0 }
 0x402   :  { %v2265_v3 = vadd.f32 %v2264_v2, %v4767_v58  ;;  %v2266_v4 = vpop.f32.mrb[217].mxu0 }
 0x403   :  { %v2267_v57 = vadd.f32 %v2266_v4, %v4771_v60  ;;  %v2268_v29 = vpop.f32.mrb[218].mxu0  ;;  %2890 = vmatprep.mubr.bf16.mxu1 %v2534_v55 }
 0x404   :  { %v2269_v63 = vadd.f32 %v2268_v29, %v4767_v58  ;;  %v2270_v7 = vpop.f32.mrb[219].mxu0  ;;  %2891 = vmatmul.mubr.bf16.gmra.mrb[204].mxu1 %v2533_v1  ;;  %v2451_v8 = vmax.f32 %v2265_v3, 0.0 }
 0x405   :  { %v2271_v33 = vadd.f32 %v2270_v7, %v4771_v60  ;;  %v2452_v35 = vmax.f32 %v2267_v57, 0.0 }
 0x406   :  { %v2453_v10 = vmax.f32 %v2269_v63, 0.0 }
 0x407   :  { %v2454_v11 = vmax.f32 %v2271_v33, 0.0 }
 0x408   :  { %v2535_v12 = vpack.c.bf16 %v2453_v10, %v2451_v8 }
 0x409   :  { %v2536_v41 = vpack.c.bf16 %v2454_v11, %v2452_v35  ;;  %v2274_v13 = vpop.f32.mrb[220].mxu0 }
 0x40a   :  { %v2275_v15 = vadd.f32 %v2274_v13, %v4767_v58  ;;  %v2276_v16 = vpop.f32.mrb[221].mxu0 }
 0x40b   :  { %v2277_v38 = vadd.f32 %v2276_v16, %v4771_v60  ;;  %v2278_v17 = vpop.f32.mrb[222].mxu0  ;;  %2898 = vmatprep.mubr.bf16.mxu1 %v2536_v41 }
 0x40c   :  { %v2279_v18 = vadd.f32 %v2278_v17, %v4767_v58  ;;  %v2280_v9 = vpop.f32.mrb[223].mxu0  ;;  %2899 = vmatmul.mubr.bf16.gmra.mrb[208].mxu1 %v2535_v12  ;;  %v2455_v19 = vmax.f32 %v2275_v15, 0.0 }
 0x40d   :  { %v2281_v39 = vadd.f32 %v2280_v9, %v4771_v60  ;;  %v2456_v22 = vmax.f32 %v2277_v38, 0.0 }
 0x40e   :  { %v2457_v20 = vmax.f32 %v2279_v18, 0.0 }
 0x40f   :  { %v2458_v5 = vmax.f32 %v2281_v39, 0.0 }
 0x410   :  { %v2537_v23 = vpack.c.bf16 %v2457_v20, %v2455_v19 }
 0x411   :  { %v2538_v0 = vpack.c.bf16 %v2458_v5, %v2456_v22  ;;  %v2284_v24 = vpop.f32.mrb[224].mxu0 }
 0x412   :  { %v2285_v25 = vadd.f32 %v2284_v24, %v4767_v58  ;;  %v2286_v26 = vpop.f32.mrb[225].mxu0 }
 0x413   :  { %v2287_v21 = vadd.f32 %v2286_v26, %v4771_v60  ;;  %v2288_v27 = vpop.f32.mrb[226].mxu0  ;;  %2906 = vmatprep.mubr.bf16.mxu1 %v2538_v0 }
 0x414   :  { %v2289_v28 = vadd.f32 %v2288_v27, %v4767_v58  ;;  %v2290_v54 = vpop.f32.mrb[227].mxu0  ;;  %2907 = vmatmul.mubr.bf16.gmra.mrb[212].mxu1 %v2537_v23  ;;  %v2459_v31 = vmax.f32 %v2285_v25, 0.0 }
 0x415   :  { %v2291_v30 = vadd.f32 %v2290_v54, %v4771_v60  ;;  %v2460_v45 = vmax.f32 %v2287_v21, 0.0 }
 0x416   :  { %v2461_v32 = vmax.f32 %v2289_v28, 0.0 }
 0x417   :  { %v2462_v34 = vmax.f32 %v2291_v30, 0.0 }
 0x418   :  { %v2539_v36 = vpack.c.bf16 %v2461_v32, %v2459_v31 }
 0x419   :  { %v2540_v40 = vpack.c.bf16 %v2462_v34, %v2460_v45  ;;  %v2294_v42 = vpop.f32.mrb[228].mxu0 }
 0x41a   :  { %v2295_v43 = vadd.f32 %v2294_v42, %v4767_v58  ;;  %v2296_v14 = vpop.f32.mrb[229].mxu0 }
 0x41b   :  { %v2297_v44 = vadd.f32 %v2296_v14, %v4771_v60  ;;  %v2298_v46 = vpop.f32.mrb[230].mxu0  ;;  %2914 = vmatprep.mubr.bf16.mxu1 %v2540_v40 }
 0x41c   :  { %v2299_v52 = vadd.f32 %v2298_v46, %v4767_v58  ;;  %v2300_v37 = vpop.f32.mrb[231].mxu0  ;;  %2915 = vmatmul.mubr.bf16.gmra.mrb[216].mxu1 %v2539_v36  ;;  %v2463_v48 = vmax.f32 %v2295_v43, 0.0 }
 0x41d   :  { %v2301_v47 = vadd.f32 %v2300_v37, %v4771_v60  ;;  %v2464_v50 = vmax.f32 %v2297_v44, 0.0  ;;  %v4921_v37 = vld [vmem:[#allocation16] ss:$0 sm:$0xff] }
 0x41e   :  { %v2465_v49 = vmax.f32 %v2299_v52, 0.0 }
 0x41f   :  { %v2466_v51 = vmax.f32 %v2301_v47, 0.0 }
 0x420   :  { %v2541_v53 = vpack.c.bf16 %v2465_v49, %v2463_v48 }
 0x421   :  { %v2542_v59 = vpack.c.bf16 %v2466_v51, %v2464_v50  ;;  %v2304_v56 = vpop.f32.mrb[232].mxu0 }
 0x422   :  { %v2305_v6 = vadd.f32 %v2304_v56, %v4767_v58  ;;  %v2306_v61 = vpop.f32.mrb[233].mxu0 }
 0x423   :  { %v2307_v62 = vadd.f32 %v2306_v61, %v4771_v60  ;;  %v2308_v1 = vpop.f32.mrb[234].mxu0  ;;  %2922 = vmatprep.mubr.bf16.mxu1 %v2542_v59 }
 0x424   :  { %v2309_v55 = vadd.f32 %v2308_v1, %v4767_v58  ;;  %v2310_v2 = vpop.f32.mrb[235].mxu0  ;;  %2923 = vmatmul.mubr.bf16.gmra.mrb[220].mxu1 %v2541_v53  ;;  %v2467_v4 = vmax.f32 %v2305_v6, 0.0 }
 0x425   :  { %v2311_v3 = vadd.f32 %v2310_v2, %v4771_v60  ;;  %v2468_v29 = vmax.f32 %v2307_v62, 0.0 }
 0x426   :  { %v2469_v57 = vmax.f32 %v2309_v55, 0.0 }
 0x427   :  { %v2470_v63 = vmax.f32 %v2311_v3, 0.0 }
 0x428   :  { %v2543_v7 = vpack.c.bf16 %v2469_v57, %v2467_v4 }
 0x429   :  { %v2544_v33 = vpack.c.bf16 %v2470_v63, %v2468_v29  ;;  %v2314_v8 = vpop.f32.mrb[236].mxu0 }
 0x42a   :  { %v2315_v10 = vadd.f32 %v2314_v8, %v4767_v58  ;;  %v2316_v35 = vpop.f32.mrb[237].mxu0 }
 0x42b   :  { %v2317_v11 = vadd.f32 %v2316_v35, %v4771_v60  ;;  %v2318_v12 = vpop.f32.mrb[238].mxu0  ;;  %2930 = vmatprep.mubr.bf16.mxu1 %v2544_v33 }
 0x42c   :  { %v2319_v41 = vadd.f32 %v2318_v12, %v4767_v58  ;;  %v2320_v13 = vpop.f32.mrb[239].mxu0  ;;  %2931 = vmatmul.mubr.bf16.gmra.mrb[224].mxu1 %v2543_v7  ;;  %v2471_v16 = vmax.f32 %v2315_v10, 0.0 }
 0x42d   :  { %v2321_v15 = vadd.f32 %v2320_v13, %v4771_v60  ;;  %v2472_v17 = vmax.f32 %v2317_v11, 0.0 }
 0x42e   :  { %v2473_v38 = vmax.f32 %v2319_v41, 0.0 }
 0x42f   :  { %v2474_v18 = vmax.f32 %v2321_v15, 0.0 }
 0x430   :  { %v2545_v9 = vpack.c.bf16 %v2473_v38, %v2471_v16 }
 0x431   :  { %v2546_v39 = vpack.c.bf16 %v2474_v18, %v2472_v17  ;;  %v2324_v19 = vpop.f32.mrb[240].mxu0 }
 0x432   :  { %v2325_v20 = vadd.f32 %v2324_v19, %v4767_v58  ;;  %v2326_v22 = vpop.f32.mrb[241].mxu0 }
 0x433   :  { %v2327_v5 = vadd.f32 %v2326_v22, %v4771_v60  ;;  %v2328_v23 = vpop.f32.mrb[242].mxu0  ;;  %2938 = vmatprep.mubr.bf16.mxu1 %v2546_v39 }
 0x434   :  { %v2329_v0 = vadd.f32 %v2328_v23, %v4767_v58  ;;  %v2330_v24 = vpop.f32.mrb[243].mxu0  ;;  %2939 = vmatmul.mubr.bf16.gmra.mrb[228].mxu1 %v2545_v9  ;;  %v2475_v26 = vmax.f32 %v2325_v20, 0.0 }
 0x435   :  { %v2331_v25 = vadd.f32 %v2330_v24, %v4771_v60  ;;  %v2476_v27 = vmax.f32 %v2327_v5, 0.0 }
 0x436   :  { %v2477_v21 = vmax.f32 %v2329_v0, 0.0 }
 0x437   :  { %v2478_v28 = vmax.f32 %v2331_v25, 0.0 }
 0x438   :  { %v2547_v54 = vpack.c.bf16 %v2477_v21, %v2475_v26 }
 0x439   :  { %v2548_v30 = vpack.c.bf16 %v2478_v28, %v2476_v27  ;;  %v2334_v31 = vpop.f32.mrb[244].mxu0 }
 0x43a   :  { %v2335_v32 = vadd.f32 %v2334_v31, %v4767_v58  ;;  %v2336_v45 = vpop.f32.mrb[245].mxu0 }
 0x43b   :  { %v2337_v34 = vadd.f32 %v2336_v45, %v4771_v60  ;;  %v2338_v36 = vpop.f32.mrb[246].mxu0  ;;  %2946 = vmatprep.mubr.bf16.mxu1 %v2548_v30 }
 0x43c   :  { %v2339_v40 = vadd.f32 %v2338_v36, %v4767_v58  ;;  %v2340_v42 = vpop.f32.mrb[247].mxu0  ;;  %2947 = vmatmul.mubr.bf16.gmra.mrb[232].mxu1 %v2547_v54  ;;  %v2479_v14 = vmax.f32 %v2335_v32, 0.0 }
 0x43d   :  { %v2341_v43 = vadd.f32 %v2340_v42, %v4771_v60  ;;  %v2480_v46 = vmax.f32 %v2337_v34, 0.0 }
 0x43e   :  { %v2481_v44 = vmax.f32 %v2339_v40, 0.0 }
 0x43f   :  { %v2482_v52 = vmax.f32 %v2341_v43, 0.0  ;;  %v2740_v47 = vpop.f32.mrb[128].mxu1 }
 0x440   :  { %v2549_v48 = vpack.c.bf16 %v2481_v44, %v2479_v14  ;;  %v2742_v49 = vpop.f32.mrb[129].mxu1  ;;  %v2741_v59 = vadd.f32 %v4921_v37, %v2740_v47 }
 0x441   :  { %v2550_v50 = vpack.c.bf16 %v2482_v52, %v2480_v46  ;;  %v2344_v51 = vpop.f32.mrb[248].mxu0  ;;  %v2743_v53 = vpop.f32.mrb[130].mxu1 }
 0x442   :  { %v2345_v56 = vadd.f32 %v2344_v51, %v4767_v58  ;;  %v2744_v6 = vadd.f32 %v4921_v37, %v2743_v53  ;;  %v2346_v61 = vpop.f32.mrb[249].mxu0  ;;  %v2745_v62 = vpop.f32.mrb[131].mxu1 }
 0x443   :  { %v2347_v1 = vadd.f32 %v2346_v61, %v4771_v60  ;;  %v2348_v55 = vpop.f32.mrb[250].mxu0  ;;  %2954 = vmatprep.mubr.bf16.mxu1 %v2550_v50 }
 0x444   :  { %v3590_v2 = vpack.c.bf16 %v2744_v6, %v2741_v59  ;;  %v2349_v3 = vadd.f32 %v2348_v55, %v4767_v58  ;;  %v2350_v4 = vpop.f32.mrb[251].mxu0  ;;  %2955 = vmatmul.mubr.bf16.gmra.mrb[236].mxu1 %v2549_v48  ;;  %v2483_v29 = vmax.f32 %v2345_v56, 0.0 }
 0x445   :  { %v2351_v57 = vadd.f32 %v2350_v4, %v4771_v60  ;;  %v2484_v7 = vmax.f32 %v2347_v1, 0.0 }
 0x446   :  { %3738 = vst [vmem:[#allocation17 + $0x10] sm:$0xff] %v3590_v2   ;;  %v2485_v63 = vmax.f32 %v2349_v3, 0.0 }
 0x447   :  { %v2486_v33 = vmax.f32 %v2351_v57, 0.0  ;;  %v2748_v8 = vpop.f32.mrb[132].mxu1 }
 0x448   :  { %v2551_v10 = vpack.c.bf16 %v2485_v63, %v2483_v29  ;;  %v2750_v35 = vpop.f32.mrb[133].mxu1  ;;  %v2749_v13 = vadd.f32 %v4921_v37, %v2748_v8 }
 0x449   :  { %v2552_v11 = vpack.c.bf16 %v2486_v33, %v2484_v7  ;;  %v2354_v12 = vpop.f32.mrb[252].mxu0  ;;  %v2751_v41 = vpop.f32.mrb[134].mxu1 }
 0x44a   :  { %v2355_v15 = vadd.f32 %v2354_v12, %v4767_v58  ;;  %v2752_v16 = vadd.f32 %v4921_v37, %v2751_v41  ;;  %v2356_v38 = vpop.f32.mrb[253].mxu0  ;;  %v2753_v17 = vpop.f32.mrb[135].mxu1 }
 0x44b   :  { %v2357_v18 = vadd.f32 %v2356_v38, %v4771_v60  ;;  %v2358_v9 = vpop.f32.mrb[254].mxu0  ;;  %2962 = vmatprep.mubr.bf16.mxu1 %v2552_v11 }
 0x44c   :  { %v3595_v39 = vpack.c.bf16 %v2752_v16, %v2749_v13  ;;  %v2359_v19 = vadd.f32 %v2358_v9, %v4767_v58  ;;  %v2360_v20 = vpop.f32.mrb[255].mxu0  ;;  %2963 = vmatmul.mubr.bf16.gmra.mrb[240].mxu1 %v2551_v10  ;;  %v2487_v5 = vmax.f32 %v2355_v15, 0.0 }
 0x44d   :  { %v2361_v22 = vadd.f32 %v2360_v20, %v4771_v60  ;;  %v2488_v0 = vmax.f32 %v2357_v18, 0.0 }
 0x44e   :  { %3739 = vst [vmem:[#allocation17 + $0x18] sm:$0xff] %v3595_v39   ;;  %v2489_v23 = vmax.f32 %v2359_v19, 0.0 }
 0x44f   :  { %v2490_v24 = vmax.f32 %v2361_v22, 0.0  ;;  %v2756_v25 = vpop.f32.mrb[136].mxu1 }
 0x450   :  { %v2553_v26 = vpack.c.bf16 %v2489_v23, %v2487_v5  ;;  %v2758_v21 = vpop.f32.mrb[137].mxu1  ;;  %v2757_v30 = vadd.f32 %v4921_v37, %v2756_v25 }
 0x451   :  { %v2554_v27 = vpack.c.bf16 %v2490_v24, %v2488_v0  ;;  %v2724_v28 = vpop.f32.mrb[0].mxu0  ;;  %v2759_v54 = vpop.f32.mrb[138].mxu1 }
 0x452   :  { %v2760_v31 = vadd.f32 %v4921_v37, %v2759_v54  ;;  %v2726_v58 = vpop.f32.mrb[1].mxu0  ;;  %v2761_v32 = vpop.f32.mrb[139].mxu1  ;;  %v2725_v60 = vadd.f32 %v4921_v37, %v2724_v28 }
 0x453   :  { %v2727_v45 = vpop.f32.mrb[2].mxu0  ;;  %2970 = vmatprep.mubr.bf16.mxu1 %v2554_v27 }
 0x454   :  { %v3600_v34 = vpack.c.bf16 %v2760_v31, %v2757_v30  ;;  %v2728_v36 = vadd.f32 %v4921_v37, %v2727_v45  ;;  %v2729_v40 = vpop.f32.mrb[3].mxu0  ;;  %2971 = vmatmul.mubr.bf16.gmra.mrb[244].mxu1 %v2553_v26 }
 0x456   :  { %3740 = vst [vmem:[#allocation17 + $0x20] sm:$0xff] %v3600_v34   ;;  %v3580_v42 = vpack.c.bf16 %v2728_v36, %v2725_v60 }
 0x457   :  { %v2764_v43 = vpop.f32.mrb[140].mxu1 }
 0x458   :  { %3581 = vst [vmem:[#allocation17] sm:$0xff] %v3580_v42   ;;  %v2766_v14 = vpop.f32.mrb[141].mxu1  ;;  %v2765_v52 = vadd.f32 %v4921_v37, %v2764_v43 }
 0x459   :  { %v2732_v44 = vpop.f32.mrb[4].mxu0  ;;  %v2767_v46 = vpop.f32.mrb[142].mxu1 }
 0x45a   :  { %v2768_v47 = vadd.f32 %v4921_v37, %v2767_v46  ;;  %v2734_v48 = vpop.f32.mrb[5].mxu0  ;;  %v2769_v49 = vpop.f32.mrb[143].mxu1  ;;  %v2733_v51 = vadd.f32 %v4921_v37, %v2732_v44 }
 0x45b   :  { %v2735_v50 = vpop.f32.mrb[6].mxu0 }
 0x45c   :  { %v3605_v53 = vpack.c.bf16 %v2768_v47, %v2765_v52  ;;  %v2736_v59 = vadd.f32 %v4921_v37, %v2735_v50  ;;  %v2737_v56 = vpop.f32.mrb[7].mxu0 }
 0x45e   :  { %3741 = vst [vmem:[#allocation17 + $0x28] sm:$0xff] %v3605_v53   ;;  %v3585_v6 = vpack.c.bf16 %v2736_v59, %v2733_v51 }
 0x45f   :  { %v2772_v61 = vpop.f32.mrb[144].mxu1 }
 0x460   :  { %3737 = vst [vmem:[#allocation17 + $0x8] sm:$0xff] %v3585_v6   ;;  %v2774_v62 = vpop.f32.mrb[145].mxu1  ;;  %v2773_v55 = vadd.f32 %v4921_v37, %v2772_v61 }
 0x461   :  { %v2775_v1 = vpop.f32.mrb[146].mxu1 }
 0x462   :  { %v2776_v2 = vadd.f32 %v4921_v37, %v2775_v1  ;;  %v2777_v3 = vpop.f32.mrb[147].mxu1 }
 0x464   :  { %v3610_v4 = vpack.c.bf16 %v2776_v2, %v2773_v55 }
 0x466   :  { %3742 = vst [vmem:[#allocation17 + $0x30] sm:$0xff] %v3610_v4  }
 0x467   :  { %v2780_v57 = vpop.f32.mrb[148].mxu1 }
 0x468   :  { %v2782_v29 = vpop.f32.mrb[149].mxu1  ;;  %v2781_v7 = vadd.f32 %v4921_v37, %v2780_v57 }
 0x469   :  { %v2783_v63 = vpop.f32.mrb[150].mxu1 }
 0x46a   :  { %v2784_v33 = vadd.f32 %v4921_v37, %v2783_v63  ;;  %v2785_v8 = vpop.f32.mrb[151].mxu1 }
 0x46c   :  { %v3615_v10 = vpack.c.bf16 %v2784_v33, %v2781_v7 }
 0x46e   :  { %3743 = vst [vmem:[#allocation17 + $0x38] sm:$0xff] %v3615_v10  }
 0x46f   :  { %v2788_v35 = vpop.f32.mrb[152].mxu1 }
 0x470   :  { %v2790_v11 = vpop.f32.mrb[153].mxu1  ;;  %v2789_v41 = vadd.f32 %v4921_v37, %v2788_v35 }
 0x471   :  { %v2791_v12 = vpop.f32.mrb[154].mxu1 }
 0x472   :  { %v2792_v13 = vadd.f32 %v4921_v37, %v2791_v12  ;;  %v2793_v15 = vpop.f32.mrb[155].mxu1 }
 0x474   :  { %v3620_v16 = vpack.c.bf16 %v2792_v13, %v2789_v41 }
 0x476   :  { %3744 = vst [vmem:[#allocation17 + $0x40] sm:$0xff] %v3620_v16  }
 0x477   :  { %v2796_v38 = vpop.f32.mrb[156].mxu1 }
 0x478   :  { %v2798_v17 = vpop.f32.mrb[157].mxu1  ;;  %v2797_v9 = vadd.f32 %v4921_v37, %v2796_v38 }
 0x479   :  { %v2799_v18 = vpop.f32.mrb[158].mxu1 }
 0x47a   :  { %v2800_v39 = vadd.f32 %v4921_v37, %v2799_v18  ;;  %v2801_v19 = vpop.f32.mrb[159].mxu1 }
 0x47c   :  { %v3625_v20 = vpack.c.bf16 %v2800_v39, %v2797_v9 }
 0x47e   :  { %3745 = vst [vmem:[#allocation17 + $0x48] sm:$0xff] %v3625_v20  }
 0x47f   :  { %v2804_v22 = vpop.f32.mrb[160].mxu1 }
 0x480   :  { %v2806_v5 = vpop.f32.mrb[161].mxu1  ;;  %v2805_v0 = vadd.f32 %v4921_v37, %v2804_v22 }
 0x481   :  { %v2807_v23 = vpop.f32.mrb[162].mxu1 }
 0x482   :  { %v2808_v24 = vadd.f32 %v4921_v37, %v2807_v23  ;;  %v2809_v25 = vpop.f32.mrb[163].mxu1 }
 0x484   :  { %v3630_v26 = vpack.c.bf16 %v2808_v24, %v2805_v0 }
 0x486   :  { %3746 = vst [vmem:[#allocation17 + $0x50] sm:$0xff] %v3630_v26  }
 0x487   :  { %v2812_v21 = vpop.f32.mrb[164].mxu1 }
 0x488   :  { %v2814_v27 = vpop.f32.mrb[165].mxu1  ;;  %v2813_v54 = vadd.f32 %v4921_v37, %v2812_v21 }
 0x489   :  { %v2815_v28 = vpop.f32.mrb[166].mxu1 }
 0x48a   :  { %v2816_v30 = vadd.f32 %v4921_v37, %v2815_v28  ;;  %v2817_v31 = vpop.f32.mrb[167].mxu1 }
 0x48c   :  { %v3635_v58 = vpack.c.bf16 %v2816_v30, %v2813_v54 }
 0x48e   :  { %3747 = vst [vmem:[#allocation17 + $0x58] sm:$0xff] %v3635_v58  }
 0x48f   :  { %v2820_v32 = vpop.f32.mrb[168].mxu1 }
 0x490   :  { %v2822_v45 = vpop.f32.mrb[169].mxu1  ;;  %v2821_v34 = vadd.f32 %v4921_v37, %v2820_v32 }
 0x491   :  { %v2823_v60 = vpop.f32.mrb[170].mxu1 }
 0x492   :  { %v2824_v36 = vadd.f32 %v4921_v37, %v2823_v60  ;;  %v2825_v40 = vpop.f32.mrb[171].mxu1 }
 0x494   :  { %v3640_v42 = vpack.c.bf16 %v2824_v36, %v2821_v34 }
 0x496   :  { %3748 = vst [vmem:[#allocation17 + $0x60] sm:$0xff] %v3640_v42  }
 0x497   :  { %v2828_v43 = vpop.f32.mrb[172].mxu1 }
 0x498   :  { %v2830_v14 = vpop.f32.mrb[173].mxu1  ;;  %v2829_v46 = vadd.f32 %v4921_v37, %v2828_v43 }
 0x499   :  { %v2831_v44 = vpop.f32.mrb[174].mxu1 }
 0x49a   :  { %v2832_v52 = vadd.f32 %v4921_v37, %v2831_v44  ;;  %v2833_v47 = vpop.f32.mrb[175].mxu1 }
 0x49c   :  { %v3645_v48 = vpack.c.bf16 %v2832_v52, %v2829_v46 }
 0x49e   :  { %3749 = vst [vmem:[#allocation17 + $0x68] sm:$0xff] %v3645_v48  }
 0x49f   :  { %v2836_v49 = vpop.f32.mrb[176].mxu1 }
 0x4a0   :  { %v2838_v50 = vpop.f32.mrb[177].mxu1  ;;  %v2837_v53 = vadd.f32 %v4921_v37, %v2836_v49 }
 0x4a1   :  { %v2839_v51 = vpop.f32.mrb[178].mxu1 }
 0x4a2   :  { %v2840_v59 = vadd.f32 %v4921_v37, %v2839_v51  ;;  %v2841_v56 = vpop.f32.mrb[179].mxu1 }
 0x4a4   :  { %v3650_v6 = vpack.c.bf16 %v2840_v59, %v2837_v53 }
 0x4a6   :  { %3750 = vst [vmem:[#allocation17 + $0x70] sm:$0xff] %v3650_v6  }
 0x4a7   :  { %v2844_v61 = vpop.f32.mrb[180].mxu1 }
 0x4a8   :  { %v2846_v62 = vpop.f32.mrb[181].mxu1  ;;  %v2845_v55 = vadd.f32 %v4921_v37, %v2844_v61 }
 0x4a9   :  { %v2847_v1 = vpop.f32.mrb[182].mxu1 }
 0x4aa   :  { %v2848_v2 = vadd.f32 %v4921_v37, %v2847_v1  ;;  %v2849_v3 = vpop.f32.mrb[183].mxu1 }
 0x4ac   :  { %v3655_v4 = vpack.c.bf16 %v2848_v2, %v2845_v55 }
 0x4ae   :  { %3751 = vst [vmem:[#allocation17 + $0x78] sm:$0xff] %v3655_v4  }
 0x4af   :  { %v2852_v57 = vpop.f32.mrb[184].mxu1 }
 0x4b0   :  { %v2854_v29 = vpop.f32.mrb[185].mxu1  ;;  %v2853_v7 = vadd.f32 %v4921_v37, %v2852_v57 }
 0x4b1   :  { %v2855_v63 = vpop.f32.mrb[186].mxu1 }
 0x4b2   :  { %v2856_v33 = vadd.f32 %v4921_v37, %v2855_v63  ;;  %v2857_v8 = vpop.f32.mrb[187].mxu1 }
 0x4b4   :  { %v3660_v10 = vpack.c.bf16 %v2856_v33, %v2853_v7 }
 0x4b6   :  { %3752 = vst [vmem:[#allocation17 + $0x80] sm:$0xff] %v3660_v10  }
 0x4b7   :  { %v2860_v35 = vpop.f32.mrb[188].mxu1 }
 0x4b8   :  { %v2862_v11 = vpop.f32.mrb[189].mxu1  ;;  %v2861_v41 = vadd.f32 %v4921_v37, %v2860_v35 }
 0x4b9   :  { %v2863_v12 = vpop.f32.mrb[190].mxu1 }
 0x4ba   :  { %v2864_v13 = vadd.f32 %v4921_v37, %v2863_v12  ;;  %v2865_v15 = vpop.f32.mrb[191].mxu1 }
 0x4bc   :  { %v3665_v16 = vpack.c.bf16 %v2864_v13, %v2861_v41 }
 0x4be   :  { %3753 = vst [vmem:[#allocation17 + $0x88] sm:$0xff] %v3665_v16  }
 0x4bf   :  { %v2868_v38 = vpop.f32.mrb[192].mxu1 }
 0x4c0   :  { %v2870_v17 = vpop.f32.mrb[193].mxu1  ;;  %v2869_v9 = vadd.f32 %v4921_v37, %v2868_v38 }
 0x4c1   :  { %v2871_v18 = vpop.f32.mrb[194].mxu1 }
 0x4c2   :  { %v2872_v39 = vadd.f32 %v4921_v37, %v2871_v18  ;;  %v2873_v19 = vpop.f32.mrb[195].mxu1 }
 0x4c4   :  { %v3670_v20 = vpack.c.bf16 %v2872_v39, %v2869_v9 }
 0x4c6   :  { %3754 = vst [vmem:[#allocation17 + $0x90] sm:$0xff] %v3670_v20  }
 0x4c7   :  { %v2876_v22 = vpop.f32.mrb[196].mxu1 }
 0x4c8   :  { %v2878_v5 = vpop.f32.mrb[197].mxu1  ;;  %v2877_v0 = vadd.f32 %v4921_v37, %v2876_v22 }
 0x4c9   :  { %v2879_v23 = vpop.f32.mrb[198].mxu1 }
 0x4ca   :  { %v2880_v24 = vadd.f32 %v4921_v37, %v2879_v23  ;;  %v2881_v25 = vpop.f32.mrb[199].mxu1 }
 0x4cc   :  { %v3675_v26 = vpack.c.bf16 %v2880_v24, %v2877_v0 }
 0x4ce   :  { %3755 = vst [vmem:[#allocation17 + $0x98] sm:$0xff] %v3675_v26  }
 0x4cf   :  { %v2884_v21 = vpop.f32.mrb[200].mxu1 }
 0x4d0   :  { %v2886_v27 = vpop.f32.mrb[201].mxu1  ;;  %v2885_v54 = vadd.f32 %v4921_v37, %v2884_v21 }
 0x4d1   :  { %v2887_v28 = vpop.f32.mrb[202].mxu1 }
 0x4d2   :  { %v2888_v30 = vadd.f32 %v4921_v37, %v2887_v28  ;;  %v2889_v31 = vpop.f32.mrb[203].mxu1 }
 0x4d4   :  { %v3680_v58 = vpack.c.bf16 %v2888_v30, %v2885_v54 }
 0x4d6   :  { %3756 = vst [vmem:[#allocation17 + $0xa0] sm:$0xff] %v3680_v58  }
 0x4d7   :  { %v2892_v32 = vpop.f32.mrb[204].mxu1 }
 0x4d8   :  { %v2894_v45 = vpop.f32.mrb[205].mxu1  ;;  %v2893_v34 = vadd.f32 %v4921_v37, %v2892_v32 }
 0x4d9   :  { %v2895_v60 = vpop.f32.mrb[206].mxu1 }
 0x4da   :  { %v2896_v36 = vadd.f32 %v4921_v37, %v2895_v60  ;;  %v2897_v40 = vpop.f32.mrb[207].mxu1 }
 0x4dc   :  { %v3685_v42 = vpack.c.bf16 %v2896_v36, %v2893_v34 }
 0x4de   :  { %3757 = vst [vmem:[#allocation17 + $0xa8] sm:$0xff] %v3685_v42  }
 0x4df   :  { %v2900_v43 = vpop.f32.mrb[208].mxu1 }
 0x4e0   :  { %v2902_v14 = vpop.f32.mrb[209].mxu1  ;;  %v2901_v46 = vadd.f32 %v4921_v37, %v2900_v43 }
 0x4e1   :  { %v2903_v44 = vpop.f32.mrb[210].mxu1 }
 0x4e2   :  { %v2904_v52 = vadd.f32 %v4921_v37, %v2903_v44  ;;  %v2905_v47 = vpop.f32.mrb[211].mxu1 }
 0x4e4   :  { %v3690_v48 = vpack.c.bf16 %v2904_v52, %v2901_v46 }
 0x4e6   :  { %3758 = vst [vmem:[#allocation17 + $0xb0] sm:$0xff] %v3690_v48  }
 0x4e7   :  { %v2908_v49 = vpop.f32.mrb[212].mxu1 }
 0x4e8   :  { %v2910_v50 = vpop.f32.mrb[213].mxu1  ;;  %v2909_v53 = vadd.f32 %v4921_v37, %v2908_v49 }
 0x4e9   :  { %v2911_v51 = vpop.f32.mrb[214].mxu1 }
 0x4ea   :  { %v2912_v59 = vadd.f32 %v4921_v37, %v2911_v51  ;;  %v2913_v56 = vpop.f32.mrb[215].mxu1 }
 0x4ec   :  { %v3695_v6 = vpack.c.bf16 %v2912_v59, %v2909_v53 }
 0x4ee   :  { %3759 = vst [vmem:[#allocation17 + $0xb8] sm:$0xff] %v3695_v6  }
 0x4ef   :  { %v2916_v61 = vpop.f32.mrb[216].mxu1 }
 0x4f0   :  { %v2918_v62 = vpop.f32.mrb[217].mxu1  ;;  %v2917_v55 = vadd.f32 %v4921_v37, %v2916_v61 }
 0x4f1   :  { %v2919_v1 = vpop.f32.mrb[218].mxu1 }
 0x4f2   :  { %v2920_v2 = vadd.f32 %v4921_v37, %v2919_v1  ;;  %v2921_v3 = vpop.f32.mrb[219].mxu1 }
 0x4f4   :  { %v3700_v4 = vpack.c.bf16 %v2920_v2, %v2917_v55 }
 0x4f6   :  { %3760 = vst [vmem:[#allocation17 + $0xc0] sm:$0xff] %v3700_v4  }
 0x4f7   :  { %v2924_v57 = vpop.f32.mrb[220].mxu1 }
 0x4f8   :  { %v2926_v29 = vpop.f32.mrb[221].mxu1  ;;  %v2925_v7 = vadd.f32 %v4921_v37, %v2924_v57 }
 0x4f9   :  { %v2927_v63 = vpop.f32.mrb[222].mxu1 }
 0x4fa   :  { %v2928_v33 = vadd.f32 %v4921_v37, %v2927_v63  ;;  %v2929_v8 = vpop.f32.mrb[223].mxu1 }
 0x4fc   :  { %v3705_v10 = vpack.c.bf16 %v2928_v33, %v2925_v7 }
 0x4fe   :  { %3761 = vst [vmem:[#allocation17 + $0xc8] sm:$0xff] %v3705_v10  }
 0x4ff   :  { %v2932_v35 = vpop.f32.mrb[224].mxu1 }
 0x500   :  { %v2934_v11 = vpop.f32.mrb[225].mxu1  ;;  %v2933_v41 = vadd.f32 %v4921_v37, %v2932_v35 }
 0x501   :  { %v2935_v12 = vpop.f32.mrb[226].mxu1 }
 0x502   :  { %v2936_v13 = vadd.f32 %v4921_v37, %v2935_v12  ;;  %v2937_v15 = vpop.f32.mrb[227].mxu1 }
 0x504   :  { %v3710_v16 = vpack.c.bf16 %v2936_v13, %v2933_v41 }
 0x506   :  { %3762 = vst [vmem:[#allocation17 + $0xd0] sm:$0xff] %v3710_v16  }
 0x507   :  { %v2940_v38 = vpop.f32.mrb[228].mxu1 }
 0x508   :  { %v2942_v17 = vpop.f32.mrb[229].mxu1  ;;  %v2941_v9 = vadd.f32 %v4921_v37, %v2940_v38 }
 0x509   :  { %v2943_v18 = vpop.f32.mrb[230].mxu1 }
 0x50a   :  { %v2944_v39 = vadd.f32 %v4921_v37, %v2943_v18  ;;  %v2945_v19 = vpop.f32.mrb[231].mxu1 }
 0x50c   :  { %v3715_v20 = vpack.c.bf16 %v2944_v39, %v2941_v9 }
 0x50e   :  { %3763 = vst [vmem:[#allocation17 + $0xd8] sm:$0xff] %v3715_v20  }
 0x50f   :  { %v2948_v22 = vpop.f32.mrb[232].mxu1 }
 0x510   :  { %v2950_v5 = vpop.f32.mrb[233].mxu1  ;;  %v2949_v0 = vadd.f32 %v4921_v37, %v2948_v22 }
 0x511   :  { %v2951_v23 = vpop.f32.mrb[234].mxu1 }
 0x512   :  { %v2952_v24 = vadd.f32 %v4921_v37, %v2951_v23  ;;  %v2953_v25 = vpop.f32.mrb[235].mxu1 }
 0x514   :  { %v3720_v26 = vpack.c.bf16 %v2952_v24, %v2949_v0 }
 0x516   :  { %3764 = vst [vmem:[#allocation17 + $0xe0] sm:$0xff] %v3720_v26  }
 0x517   :  { %v2956_v21 = vpop.f32.mrb[236].mxu1 }
 0x518   :  { %v2958_v27 = vpop.f32.mrb[237].mxu1  ;;  %v2957_v54 = vadd.f32 %v4921_v37, %v2956_v21 }
 0x519   :  { %v2959_v28 = vpop.f32.mrb[238].mxu1 }
 0x51a   :  { %v2960_v30 = vadd.f32 %v4921_v37, %v2959_v28  ;;  %v2961_v31 = vpop.f32.mrb[239].mxu1 }
 0x51c   :  { %v3725_v58 = vpack.c.bf16 %v2960_v30, %v2957_v54 }
 0x51e   :  { %3765 = vst [vmem:[#allocation17 + $0xe8] sm:$0xff] %v3725_v58  }
 0x51f   :  { %v2964_v32 = vpop.f32.mrb[240].mxu1 }
 0x520   :  { %v2966_v45 = vpop.f32.mrb[241].mxu1  ;;  %v2965_v34 = vadd.f32 %v4921_v37, %v2964_v32 }
 0x521   :  { %v2967_v60 = vpop.f32.mrb[242].mxu1 }
 0x522   :  { %v2968_v36 = vadd.f32 %v4921_v37, %v2967_v60  ;;  %v2969_v40 = vpop.f32.mrb[243].mxu1 }
 0x524   :  { %v3730_v42 = vpack.c.bf16 %v2968_v36, %v2965_v34 }
 0x526   :  { %3766 = vst [vmem:[#allocation17 + $0xf0] sm:$0xff] %v3730_v42  }
 0x527   :  { %v2972_v43 = vpop.f32.mrb[244].mxu1 }
 0x528   :  { %v2974_v14 = vpop.f32.mrb[245].mxu1  ;;  %v2973_v46 = vadd.f32 %v4921_v37, %v2972_v43 }
 0x529   :  { %v2975_v44 = vpop.f32.mrb[246].mxu1 }
 0x52a   :  { %v2976_v52 = vadd.f32 %v4921_v37, %v2975_v44  ;;  %v2977_v47 = vpop.f32.mrb[247].mxu1 }
 0x52c   :  { %v3735_v48 = vpack.c.bf16 %v2976_v52, %v2973_v46 }
 0x52e   :  { %3767 = vst [vmem:[#allocation17 + $0xf8] sm:$0xff] %v3735_v48  }
 0x52f   :  { %4192 = shalt.err (!%p4189_p6)
}
 0x530   :  { %s4193_s29 = scalar_lea.hbm %s5019_s9, 4096 }
 0x531   :  { %p4194_p7 = scmp.ne.s32.totalorder %s5019_s9, %s4193_s29  ;;  %p4197_p8 = scmp.lt.u32.totalorder %s4193_s29, %s5019_s9 }
 0x533   :  { %p4199_p9 = pnand %p4197_p8, %p4194_p7 }
 0x535   :  { %4202 = shalt.err (!%p4199_p9)
}
 0x536   :  { %3310 = dma.vmem_to_hbm [thread:$0]  %s3305_s2, 4096, %s5019_s9, [#allocation4], %s4222_s19, %s4222_s19, %s4223_s20  }
 0x537   :  { %4213 = dma.done.wait [#allocation4], 4096  }
 0x538   :  { %4214 = vsyncadd [#allocation4], 4294963200 }
 0x539   :  { %3314 = vsyncpa [#allocation3], 1 }
 0x53a   :  { %3315 = vsyncpa [#allocation6], 1 }
 0x53b   :  { %3316 = vsyncpa [#allocation9], 1 }
 0x53c   :  { %3317 = vsyncpa [#allocation12], 1 }
 0x53d   :  { %3318 = vsyncpa [#allocation15], 1 }
 0x53e   :  { %3319 = vsyncpa [#allocation4], 1 }

</bundles_post_ra>
